<compile_context>
chip_gen: v7x
topology: tpu7x:2x2x1
jax: 0.10.0
libtpu: 0.0.40
codegen_flags: <defaults>
</compile_context>

<pallas_src>
import math
import jax
import jax.numpy as jnp
from jax import lax
from jax.experimental import pallas as pl
from jax.experimental.pallas import tpu as pltpu

# ---------------------------------------------------------------------------
# Model hyper-params (d2l bert.small; classifier head fixed by the module: 256 -> 3)
# ---------------------------------------------------------------------------
VOCAB = 100
VOCAB_PAD = 128    # token table padded to 128 rows for the one-hot matmul
D = 256            # num_hiddens
H = 4              # num_heads
HD = D // H        # head dim = 64
F = 512            # ffn_num_hiddens
L = 2              # num_layers
NUM_CLASSES = 3
LOGIT_PAD = 128    # lane-dense logits store; real classes live in [:, :NUM_CLASSES]
LN_EPS = 1e-5

# --- static slab layout -----------------------------------------------------
LAYER_COLS = 4 * D + F            # wq|wk|wv|wo|w1 columns per layer in slab A
WH_COL = L * LAYER_COLS           # 3072
WOUT_COL = WH_COL + D             # 3328
COLS_A = WOUT_COL + LOGIT_PAD     # 3456  (27 * 128 lanes)
RPL = 10                          # vector-slab rows per layer
ROW_BH = L * RPL                  # 20
ROW_BOUT = ROW_BH + 1             # 21
NUM_VEC_ROWS = ROW_BOUT + 1       # 22
SEG_ROW = VOCAB_PAD               # seg_emb occupies rows 128..129 of emb slab
POS_ROW = 136                     # pos_emb rows start (8-aligned)

# Exact softmax normalization by default.  Set True to use the EUP approximate
# reciprocal (nearly free, but attention rows then sum to ~1, not exactly 1).
APPROX_SOFTMAX_RECIP = False


def _layernorm(x, gamma, beta):
    mu = jnp.mean(x, axis=-1, keepdims=True)
    var = jnp.mean((x - mu) ** 2, axis=-1, keepdims=True)
    return (x - mu) * lax.rsqrt(var + LN_EPS) * gamma + beta


# ---------------------------------------------------------------------------
# Fused Pallas kernel: embeddings + 2 encoder blocks + classifier head.
# ---------------------------------------------------------------------------
def _make_kernel(B, S):
    M = B * S

    def kernel(tok_ref, seg_ref, vl_ref, emb_ref, a_ref, b2_ref, vec_ref, out_ref):
        def vrow(r, width=D):                         # one bias / LN row (f32)
            return vec_ref[r:r + 1, :width]

        # ---- fused embeddings: exact token lookup as one-hot @ table (MXU) ----
        tok3 = tok_ref[...][:, :, None]                              # (B,S,1) int32
        one_hot = (tok3 == lax.broadcasted_iota(jnp.int32, (1, 1, VOCAB_PAD), 2)
                   ).astype(jnp.float32)                             # (B,S,128)
        x_tok = jnp.dot(one_hot.reshape(M, VOCAB_PAD), emb_ref[0:VOCAB_PAD, :],
                        preferred_element_type=jnp.float32)          # (M,D)
        seg3 = seg_ref[...].astype(jnp.float32)[:, :, None]          # (B,S,1)
        seg0 = emb_ref[SEG_ROW:SEG_ROW + 1, :][None]                 # (1,1,D)
        seg1 = emb_ref[SEG_ROW + 1:SEG_ROW + 2, :][None]
        pos3 = emb_ref[POS_ROW:POS_ROW + S, :][None]                 # (1,S,D)
        x3 = x_tok.reshape(B, S, D) + seg3 * seg1 + (1.0 - seg3) * seg0 + pos3
        xf = x3.reshape(M, D)                                        # (M,D) f32

        # ---- key-padding mask bias, computed ONCE (0 / -1e6 additive) ---------
        # valid_len == 0 -> uniform softmax over padded keys (matches d2l).
        vl3 = vl_ref[...][:, :, None]                                # (B,1,1) int32
        key_iota = lax.broadcasted_iota(jnp.int32, (1, 1, S), 2)
        bias = jnp.where(key_iota < vl3, 0.0, -1e6).astype(jnp.float32)  # (B,1,S)

        for l in range(L):                                           # static unroll, L=2
            base = l * LAYER_COLS
            rb = l * RPL
            xb = xf.astype(jnp.bfloat16)

            # Q/K/V projections on all B*S rows (1/sqrt(HD) pre-folded into wq,bq)
            q = jnp.dot(xb, a_ref[:, base:base + D],
                        preferred_element_type=jnp.float32) + vrow(rb + 0)
            k = jnp.dot(xb, a_ref[:, base + D:base + 2 * D],
                        preferred_element_type=jnp.float32) + vrow(rb + 1)
            v = jnp.dot(xb, a_ref[:, base + 2 * D:base + 3 * D],
                        preferred_element_type=jnp.float32) + vrow(rb + 2)
            q3 = q.reshape(B, S, D).astype(jnp.bfloat16)
            k3 = k.reshape(B, S, D).astype(jnp.bfloat16)
            v3 = v.reshape(B, S, D).astype(jnp.bfloat16)

            # Multi-head attention, batched over the batch dim (one dot per head).
            heads = []
            for h in range(H):                                       # static, H=4
                c0 = h * HD
                s = lax.dot_general(q3[:, :, c0:c0 + HD], k3[:, :, c0:c0 + HD],
                                    (((2,), (2,)), ((0,), (0,))),
                                    preferred_element_type=jnp.float32)   # (B,S,S)
                s = s + bias
                s = s - jnp.max(s, axis=-1, keepdims=True)
                p = jnp.exp(s)
                denom = jnp.sum(p, axis=-1, keepdims=True)
                p = p * pl.reciprocal(denom, approx=APPROX_SOFTMAX_RECIP)
                heads.append(lax.dot_general(p.astype(jnp.bfloat16),
                                             v3[:, :, c0:c0 + HD],
                                             (((2,), (1,)), ((0,), (0,))),
                                             preferred_element_type=jnp.float32))
            # Lane-concat heads, single K=256 output projection.
            attn = jnp.concatenate(heads, axis=-1).reshape(M, D).astype(jnp.bfloat16)
            attn = jnp.dot(attn, a_ref[:, base + 3 * D:base + 4 * D],
                           preferred_element_type=jnp.float32) + vrow(rb + 3)

            # AddNorm 1 (dropout = identity in eval)
            y = _layernorm(xf + attn, vrow(rb + 4), vrow(rb + 5))

            # Position-wise FFN (ReLU)
            f = jnp.dot(y.astype(jnp.bfloat16), a_ref[:, base + 4 * D:base + 4 * D + F],
                        preferred_element_type=jnp.float32) + vrow(rb + 6, F)
            f = jnp.maximum(f, 0.0)
            f = jnp.dot(f.astype(jnp.bfloat16), b2_ref[:, l * D:(l + 1) * D],
                        preferred_element_type=jnp.float32) + vrow(rb + 7)

            # AddNorm 2
            xf = _layernorm(y + f, vrow(rb + 8), vrow(rb + 9))

        # ---- classifier head on [CLS] rows -----------------------------------
        cls = xf.reshape(B, S, D)[:, 0:1, :].reshape(B, D)
        hdn = jnp.tanh(jnp.dot(cls.astype(jnp.bfloat16), a_ref[:, WH_COL:WH_COL + D],
                               preferred_element_type=jnp.float32)
                       + vec_ref[ROW_BH:ROW_BH + 1, :D])
        logits = (jnp.dot(hdn.astype(jnp.bfloat16),
                          a_ref[:, WOUT_COL:WOUT_COL + LOGIT_PAD],
                          preferred_element_type=jnp.float32)
                  + vec_ref[ROW_BOUT:ROW_BOUT + 1, :LOGIT_PAD])
        out_ref[...] = logits                                        # (B, LOGIT_PAD)

    return kernel


# ---------------------------------------------------------------------------
# Weight packing into contiguous slabs (few large DMAs instead of ~36 tiny ones)
# ---------------------------------------------------------------------------
def _prep_weights(params):
    scale = 1.0 / math.sqrt(HD)
    slab_a = jnp.zeros((D, COLS_A), jnp.float32)
    vec = jnp.zeros((NUM_VEC_ROWS, F), jnp.float32)

    def put_vec(v, row, arr):
        a = jnp.asarray(arr, jnp.float32).reshape(1, -1)
        return v.at[row:row + 1, :a.shape[1]].set(a)

    for l, lp in enumerate(params["layers"]):
        base = l * LAYER_COLS
        rb = l * RPL
        slab_a = slab_a.at[:, base:base + D].set(lp["wq"] * scale)   # scale folded
        slab_a = slab_a.at[:, base + D:base + 2 * D].set(lp["wk"])
        slab_a = slab_a.at[:, base + 2 * D:base + 3 * D].set(lp["wv"])
        slab_a = slab_a.at[:, base + 3 * D:base + 4 * D].set(lp["wo"])
        slab_a = slab_a.at[:, base + 4 * D:base + 4 * D + F].set(lp["w1"])
        vec = put_vec(vec, rb + 0, lp["bq"] * scale)                 # scale folded
        vec = put_vec(vec, rb + 1, lp["bk"])
        vec = put_vec(vec, rb + 2, lp["bv"])
        vec = put_vec(vec, rb + 3, lp["bo"])
        vec = put_vec(vec, rb + 4, lp["g1"])
        vec = put_vec(vec, rb + 5, lp["be1"])
        vec = put_vec(vec, rb + 6, lp["b1"])
        vec = put_vec(vec, rb + 7, lp["b2"])
        vec = put_vec(vec, rb + 8, lp["g2"])
        vec = put_vec(vec, rb + 9, lp["be2"])
    slab_a = slab_a.at[:, WH_COL:WH_COL + D].set(params["wh"])
    slab_a = slab_a.at[:, WOUT_COL:WOUT_COL + NUM_CLASSES].set(params["wout"])
    vec = put_vec(vec, ROW_BH, params["bh"])
    vec = put_vec(vec, ROW_BOUT, params["bout"])

    slab_b = jnp.concatenate([lp["w2"] for lp in params["layers"]], axis=1)  # (F, L*D)
    return slab_a.astype(jnp.bfloat16), slab_b.astype(jnp.bfloat16), vec


def _prep_embeddings(params, S):
    emb = jnp.zeros((POS_ROW + S, D), jnp.float32)
    emb = emb.at[:VOCAB, :].set(params["tok_emb"])
    emb = emb.at[SEG_ROW:SEG_ROW + 2, :].set(params["seg_emb"])
    emb = emb.at[POS_ROW:POS_ROW + S, :].set(params["pos_emb"][0, :S, :])
    return emb


# ---------------------------------------------------------------------------
# Full forward: BERTClassifier(inputs) with inputs = (tokens, segments, valid_lens)
# ---------------------------------------------------------------------------
def bert_classifier_forward(params, tokens, segments, valid_lens):
    B, S = tokens.shape
    slab_a, slab_b, vec = _prep_weights(params)
    emb = _prep_embeddings(params, S)
    vl = valid_lens.astype(jnp.int32).reshape(B, 1)

    M = B * S
    flops = (2 * M * VOCAB_PAD * D
             + L * (2 * M * D * (4 * D + 2 * F) + 4 * B * H * S * S * HD)
             + 2 * B * D * D + 2 * B * D * LOGIT_PAD)
    transcendentals = L * B * H * S * S + B * D
    bytes_accessed = int(tokens.size * 4 + segments.size * 4 + vl.size * 4
                         + emb.size * 4 + vec.size * 4
                         + slab_a.size * 2 + slab_b.size * 2 + B * LOGIT_PAD * 4)

    vmem_spec = pl.BlockSpec(memory_space=pltpu.MemorySpace.VMEM)
    out = pl.pallas_call(
        _make_kernel(B, S),
        out_shape=jax.ShapeDtypeStruct((B, LOGIT_PAD), jnp.float32),
        in_specs=[vmem_spec] * 7,
        out_specs=vmem_spec,
        cost_estimate=pl.CostEstimate(flops=int(flops),
                                      transcendentals=int(transcendentals),
                                      bytes_accessed=bytes_accessed),
    )(tokens.astype(jnp.int32), segments.astype(jnp.int32), vl,
      emb, slab_a, slab_b, vec)
    return out[:, :NUM_CLASSES]


# ---------------------------------------------------------------------------
# Deterministic parameter initialization (synthetic; shapes from the module)
# ---------------------------------------------------------------------------
def init_params(key, max_len=64):
    keys = iter(jax.random.split(key, 64))

    def w(shape, scale=0.02):
        return (scale * jax.random.normal(next(keys), shape)).astype(jnp.float32)

    params = {
        "tok_emb": w((VOCAB, D)),
        "seg_emb": w((2, D)),
        "pos_emb": w((1, max_len, D)),
        "layers": [],
        "wh": w((D, D)), "bh": jnp.zeros((1, D), jnp.float32),      # bert.hidden Linear
        "wout": w((D, NUM_CLASSES)),                                 # self.output = Linear(256, 3)
        "bout": jnp.zeros((1, NUM_CLASSES), jnp.float32),
    }
    for _ in range(L):
        params["layers"].append({
            "wq": w((D, D)), "bq": jnp.zeros((1, D), jnp.float32),
            "wk": w((D, D)), "bk": jnp.zeros((1, D), jnp.float32),
            "wv": w((D, D)), "bv": jnp.zeros((1, D), jnp.float32),
            "wo": w((D, D)), "bo": jnp.zeros((1, D), jnp.float32),
            "g1": jnp.ones((1, D), jnp.float32), "be1": jnp.zeros((1, D), jnp.float32),
            "w1": w((D, F)), "b1": jnp.zeros((1, F), jnp.float32),
            "w2": w((F, D)), "b2": jnp.zeros((1, D), jnp.float32),
            "g2": jnp.ones((1, D), jnp.float32), "be2": jnp.zeros((1, D), jnp.float32),
        })
    return params


if __name__ == "__main__":
    key = jax.random.PRNGKey(0)
    k_param, k_tok = jax.random.split(key, 2)

    B, S = 2, 8
    params = init_params(k_param, max_len=64)
    tokens = jax.random.randint(k_tok, (B, S), 0, VOCAB, dtype=jnp.int32)
    segments = jnp.concatenate(
        [jnp.zeros((B, S // 2), jnp.int32), jnp.ones((B, S // 2), jnp.int32)], axis=1)
    valid_lens = jnp.array([S, 5], dtype=jnp.int32)

    logits = bert_classifier_forward(params, tokens, segments, valid_lens)
    jax.block_until_ready(logits)
    assert logits.shape == (B, NUM_CLASSES)
    assert bool(jnp.all(jnp.isfinite(logits)))
    print("KERNEL_OK")
</pallas_src>

<mosaic_0001>
module attributes {stable_mosaic.version = 11 : i64} {
  func.func @kernel(%arg0: memref<2x8xi32, #tpu.memory_space<vmem>>, %arg1: memref<2x8xi32, #tpu.memory_space<vmem>>, %arg2: memref<2x1xi32, #tpu.memory_space<vmem>>, %arg3: memref<144x256xf32, #tpu.memory_space<vmem>>, %arg4: memref<256x3456xbf16, #tpu.memory_space<vmem>>, %arg5: memref<512x512xbf16, #tpu.memory_space<vmem>>, %arg6: memref<22x512xf32, #tpu.memory_space<vmem>>, %arg7: memref<2x128xf32, #tpu.memory_space<vmem>>) attributes {dimension_semantics = [], scalar_prefetch = 0 : i64, scratch_operands = 0 : i64, tpu.core_type = #tpu.core_type<tc>} {
    %c0 = arith.constant 0 : index
    %c0_0 = arith.constant 0 : index
    %0 = vector.load %arg0[%c0, %c0_0] : memref<2x8xi32, #tpu.memory_space<vmem>>, vector<2x8xi32>
    %1 = vector.shape_cast %0 : vector<2x8xi32> to vector<2x8x1xi32>
    %2 = tpu.iota {dimensions = array<i32: 2>} : vector<1x1x128xi32>
    %3 = vector.broadcast %1 : vector<2x8x1xi32> to vector<2x8x128xi32>
    %4 = vector.broadcast %2 : vector<1x1x128xi32> to vector<2x8x128xi32>
    %5 = arith.cmpi eq, %3, %4 : vector<2x8x128xi32>
    %6 = arith.extui %5 : vector<2x8x128xi1> to vector<2x8x128xi32>
    %7 = arith.sitofp %6 : vector<2x8x128xi32> to vector<2x8x128xf32>
    %8 = vector.shape_cast %7 : vector<2x8x128xf32> to vector<16x128xf32>
    %c0_1 = arith.constant 0 : index
    %c0_2 = arith.constant 0 : index
    %9 = vector.load %arg3[%c0_1, %c0_2] : memref<144x256xf32, #tpu.memory_space<vmem>>, vector<128x256xf32>
    %cst = arith.constant dense<0.000000e+00> : vector<16x256xf32>
    %10 = tpu.matmul %8, %9, %cst {dimension_numbers = #tpu.dot_dimension_numbers<[1], [0], [0], [1], [0, 0, 1, 1], [], []>} : vector<16x128xf32>, vector<128x256xf32>, vector<16x256xf32> -> vector<16x256xf32>
    %c0_3 = arith.constant 0 : index
    %c0_4 = arith.constant 0 : index
    %11 = vector.load %arg1[%c0_3, %c0_4] : memref<2x8xi32, #tpu.memory_space<vmem>>, vector<2x8xi32>
    %12 = arith.sitofp %11 : vector<2x8xi32> to vector<2x8xf32>
    %13 = vector.shape_cast %12 : vector<2x8xf32> to vector<2x8x1xf32>
    %c128 = arith.constant 128 : index
    %c0_5 = arith.constant 0 : index
    %14 = vector.load %arg3[%c128, %c0_5] : memref<144x256xf32, #tpu.memory_space<vmem>>, vector<1x256xf32>
    %15 = vector.shape_cast %14 : vector<1x256xf32> to vector<1x1x256xf32>
    %c129 = arith.constant 129 : index
    %c0_6 = arith.constant 0 : index
    %16 = vector.load %arg3[%c129, %c0_6] : memref<144x256xf32, #tpu.memory_space<vmem>>, vector<1x256xf32>
    %17 = vector.shape_cast %16 : vector<1x256xf32> to vector<1x1x256xf32>
    %c136 = arith.constant 136 : index
    %c0_7 = arith.constant 0 : index
    %18 = vector.load %arg3[%c136, %c0_7] : memref<144x256xf32, #tpu.memory_space<vmem>>, vector<8x256xf32>
    %19 = vector.shape_cast %18 : vector<8x256xf32> to vector<1x8x256xf32>
    %20 = vector.shape_cast %10 : vector<16x256xf32> to vector<2x8x256xf32>
    %21 = vector.broadcast %13 : vector<2x8x1xf32> to vector<2x8x256xf32>
    %22 = vector.broadcast %17 : vector<1x1x256xf32> to vector<2x8x256xf32>
    %23 = arith.mulf %21, %22 : vector<2x8x256xf32>
    %24 = arith.addf %20, %23 : vector<2x8x256xf32>
    %cst_8 = arith.constant 1.000000e+00 : f32
    %25 = vector.broadcast %cst_8 : f32 to vector<2x8x1xf32>
    %26 = arith.subf %25, %13 : vector<2x8x1xf32>
    %27 = vector.broadcast %26 : vector<2x8x1xf32> to vector<2x8x256xf32>
    %28 = vector.broadcast %15 : vector<1x1x256xf32> to vector<2x8x256xf32>
    %29 = arith.mulf %27, %28 : vector<2x8x256xf32>
    %30 = arith.addf %24, %29 : vector<2x8x256xf32>
    %31 = vector.broadcast %19 : vector<1x8x256xf32> to vector<2x8x256xf32>
    %32 = arith.addf %30, %31 : vector<2x8x256xf32>
    %33 = vector.shape_cast %32 : vector<2x8x256xf32> to vector<16x256xf32>
    %c0_9 = arith.constant 0 : index
    %c0_10 = arith.constant 0 : index
    %34 = vector.load %arg2[%c0_9, %c0_10] : memref<2x1xi32, #tpu.memory_space<vmem>>, vector<2x1xi32>
    %35 = vector.shape_cast %34 : vector<2x1xi32> to vector<2x1x1xi32>
    %36 = tpu.iota {dimensions = array<i32: 2>} : vector<1x1x8xi32>
    %37 = vector.broadcast %36 : vector<1x1x8xi32> to vector<2x1x8xi32>
    %38 = vector.broadcast %35 : vector<2x1x1xi32> to vector<2x1x8xi32>
    %39 = arith.cmpi slt, %37, %38 : vector<2x1x8xi32>
    %cst_11 = arith.constant 0.000000e+00 : f32
    %cst_12 = arith.constant -1.000000e+06 : f32
    %40 = vector.broadcast %cst_11 : f32 to vector<2x1x8xf32>
    %41 = vector.broadcast %cst_12 : f32 to vector<2x1x8xf32>
    %42 = arith.select %39, %40, %41 : vector<2x1x8xi1>, vector<2x1x8xf32>
    %43 = arith.truncf %33 : vector<16x256xf32> to vector<16x256xbf16>
    %c0_13 = arith.constant 0 : index
    %c0_14 = arith.constant 0 : index
    %44 = vector.load %arg4[%c0_13, %c0_14] : memref<256x3456xbf16, #tpu.memory_space<vmem>>, vector<256x256xbf16>
    %cst_15 = arith.constant dense<0.000000e+00> : vector<16x256xf32>
    %45 = tpu.matmul %43, %44, %cst_15 {dimension_numbers = #tpu.dot_dimension_numbers<[1], [0], [0], [1], [0, 0, 1, 1], [], []>} : vector<16x256xbf16>, vector<256x256xbf16>, vector<16x256xf32> -> vector<16x256xf32>
    %c0_16 = arith.constant 0 : index
    %c0_17 = arith.constant 0 : index
    %46 = vector.load %arg6[%c0_16, %c0_17] : memref<22x512xf32, #tpu.memory_space<vmem>>, vector<1x256xf32>
    %47 = vector.broadcast %46 : vector<1x256xf32> to vector<16x256xf32>
    %48 = arith.addf %45, %47 : vector<16x256xf32>
    %c0_18 = arith.constant 0 : index
    %c256 = arith.constant 256 : index
    %49 = vector.load %arg4[%c0_18, %c256] : memref<256x3456xbf16, #tpu.memory_space<vmem>>, vector<256x256xbf16>
    %cst_19 = arith.constant dense<0.000000e+00> : vector<16x256xf32>
    %50 = tpu.matmul %43, %49, %cst_19 {dimension_numbers = #tpu.dot_dimension_numbers<[1], [0], [0], [1], [0, 0, 1, 1], [], []>} : vector<16x256xbf16>, vector<256x256xbf16>, vector<16x256xf32> -> vector<16x256xf32>
    %c1 = arith.constant 1 : index
    %c0_20 = arith.constant 0 : index
    %51 = vector.load %arg6[%c1, %c0_20] : memref<22x512xf32, #tpu.memory_space<vmem>>, vector<1x256xf32>
    %52 = vector.broadcast %51 : vector<1x256xf32> to vector<16x256xf32>
    %53 = arith.addf %50, %52 : vector<16x256xf32>
    %c0_21 = arith.constant 0 : index
    %c512 = arith.constant 512 : index
    %54 = vector.load %arg4[%c0_21, %c512] : memref<256x3456xbf16, #tpu.memory_space<vmem>>, vector<256x256xbf16>
    %cst_22 = arith.constant dense<0.000000e+00> : vector<16x256xf32>
    %55 = tpu.matmul %43, %54, %cst_22 {dimension_numbers = #tpu.dot_dimension_numbers<[1], [0], [0], [1], [0, 0, 1, 1], [], []>} : vector<16x256xbf16>, vector<256x256xbf16>, vector<16x256xf32> -> vector<16x256xf32>
    %c2 = arith.constant 2 : index
    %c0_23 = arith.constant 0 : index
    %56 = vector.load %arg6[%c2, %c0_23] : memref<22x512xf32, #tpu.memory_space<vmem>>, vector<1x256xf32>
    %57 = vector.broadcast %56 : vector<1x256xf32> to vector<16x256xf32>
    %58 = arith.addf %55, %57 : vector<16x256xf32>
    %59 = vector.shape_cast %48 : vector<16x256xf32> to vector<2x8x256xf32>
    %60 = arith.truncf %59 : vector<2x8x256xf32> to vector<2x8x256xbf16>
    %61 = vector.shape_cast %53 : vector<16x256xf32> to vector<2x8x256xf32>
    %62 = arith.truncf %61 : vector<2x8x256xf32> to vector<2x8x256xbf16>
    %63 = vector.shape_cast %58 : vector<16x256xf32> to vector<2x8x256xf32>
    %64 = arith.truncf %63 : vector<2x8x256xf32> to vector<2x8x256xbf16>
    %65 = vector.extract_strided_slice %60 {offsets = [0, 0, 0], sizes = [2, 8, 64], strides = [1, 1, 1]} : vector<2x8x256xbf16> to vector<2x8x64xbf16>
    %66 = vector.extract_strided_slice %62 {offsets = [0, 0, 0], sizes = [2, 8, 64], strides = [1, 1, 1]} : vector<2x8x256xbf16> to vector<2x8x64xbf16>
    %cst_24 = arith.constant dense<0.000000e+00> : vector<2x8x8xf32>
    %67 = tpu.matmul %65, %66, %cst_24 {dimension_numbers = #tpu.dot_dimension_numbers<[2], [2], [1], [1], [0, 0, 0, 1, 1, 1], [0], [0]>} : vector<2x8x64xbf16>, vector<2x8x64xbf16>, vector<2x8x8xf32> -> vector<2x8x8xf32>
    %68 = vector.broadcast %42 : vector<2x1x8xf32> to vector<2x8x8xf32>
    %69 = arith.addf %67, %68 : vector<2x8x8xf32>
    %cst_25 = arith.constant dense<0xFF800000> : vector<2x8xf32>
    %70 = vector.multi_reduction <maximumf>, %69, %cst_25 [2] : vector<2x8x8xf32> to vector<2x8xf32>
    %71 = vector.shape_cast %70 : vector<2x8xf32> to vector<2x8x1xf32>
    %72 = vector.broadcast %71 : vector<2x8x1xf32> to vector<2x8x8xf32>
    %73 = arith.subf %69, %72 : vector<2x8x8xf32>
    %74 = math.exp %73 : vector<2x8x8xf32>
    %cst_26 = arith.constant dense<0.000000e+00> : vector<2x8xf32>
    %75 = vector.multi_reduction <add>, %74, %cst_26 [2] : vector<2x8x8xf32> to vector<2x8xf32>
    %76 = vector.shape_cast %75 : vector<2x8xf32> to vector<2x8x1xf32>
    %77 = tpu.reciprocal %76 : vector<2x8x1xf32> -> vector<2x8x1xf32>
    %78 = vector.broadcast %77 : vector<2x8x1xf32> to vector<2x8x8xf32>
    %79 = arith.mulf %74, %78 : vector<2x8x8xf32>
    %80 = arith.truncf %79 : vector<2x8x8xf32> to vector<2x8x8xbf16>
    %81 = vector.extract_strided_slice %64 {offsets = [0, 0, 0], sizes = [2, 8, 64], strides = [1, 1, 1]} : vector<2x8x256xbf16> to vector<2x8x64xbf16>
    %cst_27 = arith.constant dense<0.000000e+00> : vector<2x8x64xf32>
    %82 = tpu.matmul %80, %81, %cst_27 {dimension_numbers = #tpu.dot_dimension_numbers<[2], [1], [1], [2], [0, 0, 0, 1, 1, 2], [0], [0]>} : vector<2x8x8xbf16>, vector<2x8x64xbf16>, vector<2x8x64xf32> -> vector<2x8x64xf32>
    %83 = vector.extract_strided_slice %60 {offsets = [0, 0, 64], sizes = [2, 8, 64], strides = [1, 1, 1]} : vector<2x8x256xbf16> to vector<2x8x64xbf16>
    %84 = vector.extract_strided_slice %62 {offsets = [0, 0, 64], sizes = [2, 8, 64], strides = [1, 1, 1]} : vector<2x8x256xbf16> to vector<2x8x64xbf16>
    %cst_28 = arith.constant dense<0.000000e+00> : vector<2x8x8xf32>
    %85 = tpu.matmul %83, %84, %cst_28 {dimension_numbers = #tpu.dot_dimension_numbers<[2], [2], [1], [1], [0, 0, 0, 1, 1, 1], [0], [0]>} : vector<2x8x64xbf16>, vector<2x8x64xbf16>, vector<2x8x8xf32> -> vector<2x8x8xf32>
    %86 = vector.broadcast %42 : vector<2x1x8xf32> to vector<2x8x8xf32>
    %87 = arith.addf %85, %86 : vector<2x8x8xf32>
    %cst_29 = arith.constant dense<0xFF800000> : vector<2x8xf32>
    %88 = vector.multi_reduction <maximumf>, %87, %cst_29 [2] : vector<2x8x8xf32> to vector<2x8xf32>
    %89 = vector.shape_cast %88 : vector<2x8xf32> to vector<2x8x1xf32>
    %90 = vector.broadcast %89 : vector<2x8x1xf32> to vector<2x8x8xf32>
    %91 = arith.subf %87, %90 : vector<2x8x8xf32>
    %92 = math.exp %91 : vector<2x8x8xf32>
    %cst_30 = arith.constant dense<0.000000e+00> : vector<2x8xf32>
    %93 = vector.multi_reduction <add>, %92, %cst_30 [2] : vector<2x8x8xf32> to vector<2x8xf32>
    %94 = vector.shape_cast %93 : vector<2x8xf32> to vector<2x8x1xf32>
    %95 = tpu.reciprocal %94 : vector<2x8x1xf32> -> vector<2x8x1xf32>
    %96 = vector.broadcast %95 : vector<2x8x1xf32> to vector<2x8x8xf32>
    %97 = arith.mulf %92, %96 : vector<2x8x8xf32>
    %98 = arith.truncf %97 : vector<2x8x8xf32> to vector<2x8x8xbf16>
    %99 = vector.extract_strided_slice %64 {offsets = [0, 0, 64], sizes = [2, 8, 64], strides = [1, 1, 1]} : vector<2x8x256xbf16> to vector<2x8x64xbf16>
    %cst_31 = arith.constant dense<0.000000e+00> : vector<2x8x64xf32>
    %100 = tpu.matmul %98, %99, %cst_31 {dimension_numbers = #tpu.dot_dimension_numbers<[2], [1], [1], [2], [0, 0, 0, 1, 1, 2], [0], [0]>} : vector<2x8x8xbf16>, vector<2x8x64xbf16>, vector<2x8x64xf32> -> vector<2x8x64xf32>
    %101 = vector.extract_strided_slice %60 {offsets = [0, 0, 128], sizes = [2, 8, 64], strides = [1, 1, 1]} : vector<2x8x256xbf16> to vector<2x8x64xbf16>
    %102 = vector.extract_strided_slice %62 {offsets = [0, 0, 128], sizes = [2, 8, 64], strides = [1, 1, 1]} : vector<2x8x256xbf16> to vector<2x8x64xbf16>
    %cst_32 = arith.constant dense<0.000000e+00> : vector<2x8x8xf32>
    %103 = tpu.matmul %101, %102, %cst_32 {dimension_numbers = #tpu.dot_dimension_numbers<[2], [2], [1], [1], [0, 0, 0, 1, 1, 1], [0], [0]>} : vector<2x8x64xbf16>, vector<2x8x64xbf16>, vector<2x8x8xf32> -> vector<2x8x8xf32>
    %104 = vector.broadcast %42 : vector<2x1x8xf32> to vector<2x8x8xf32>
    %105 = arith.addf %103, %104 : vector<2x8x8xf32>
    %cst_33 = arith.constant dense<0xFF800000> : vector<2x8xf32>
    %106 = vector.multi_reduction <maximumf>, %105, %cst_33 [2] : vector<2x8x8xf32> to vector<2x8xf32>
    %107 = vector.shape_cast %106 : vector<2x8xf32> to vector<2x8x1xf32>
    %108 = vector.broadcast %107 : vector<2x8x1xf32> to vector<2x8x8xf32>
    %109 = arith.subf %105, %108 : vector<2x8x8xf32>
    %110 = math.exp %109 : vector<2x8x8xf32>
    %cst_34 = arith.constant dense<0.000000e+00> : vector<2x8xf32>
    %111 = vector.multi_reduction <add>, %110, %cst_34 [2] : vector<2x8x8xf32> to vector<2x8xf32>
    %112 = vector.shape_cast %111 : vector<2x8xf32> to vector<2x8x1xf32>
    %113 = tpu.reciprocal %112 : vector<2x8x1xf32> -> vector<2x8x1xf32>
    %114 = vector.broadcast %113 : vector<2x8x1xf32> to vector<2x8x8xf32>
    %115 = arith.mulf %110, %114 : vector<2x8x8xf32>
    %116 = arith.truncf %115 : vector<2x8x8xf32> to vector<2x8x8xbf16>
    %117 = vector.extract_strided_slice %64 {offsets = [0, 0, 128], sizes = [2, 8, 64], strides = [1, 1, 1]} : vector<2x8x256xbf16> to vector<2x8x64xbf16>
    %cst_35 = arith.constant dense<0.000000e+00> : vector<2x8x64xf32>
    %118 = tpu.matmul %116, %117, %cst_35 {dimension_numbers = #tpu.dot_dimension_numbers<[2], [1], [1], [2], [0, 0, 0, 1, 1, 2], [0], [0]>} : vector<2x8x8xbf16>, vector<2x8x64xbf16>, vector<2x8x64xf32> -> vector<2x8x64xf32>
    %119 = vector.extract_strided_slice %60 {offsets = [0, 0, 192], sizes = [2, 8, 64], strides = [1, 1, 1]} : vector<2x8x256xbf16> to vector<2x8x64xbf16>
    %120 = vector.extract_strided_slice %62 {offsets = [0, 0, 192], sizes = [2, 8, 64], strides = [1, 1, 1]} : vector<2x8x256xbf16> to vector<2x8x64xbf16>
    %cst_36 = arith.constant dense<0.000000e+00> : vector<2x8x8xf32>
    %121 = tpu.matmul %119, %120, %cst_36 {dimension_numbers = #tpu.dot_dimension_numbers<[2], [2], [1], [1], [0, 0, 0, 1, 1, 1], [0], [0]>} : vector<2x8x64xbf16>, vector<2x8x64xbf16>, vector<2x8x8xf32> -> vector<2x8x8xf32>
    %122 = vector.broadcast %42 : vector<2x1x8xf32> to vector<2x8x8xf32>
    %123 = arith.addf %121, %122 : vector<2x8x8xf32>
    %cst_37 = arith.constant dense<0xFF800000> : vector<2x8xf32>
    %124 = vector.multi_reduction <maximumf>, %123, %cst_37 [2] : vector<2x8x8xf32> to vector<2x8xf32>
    %125 = vector.shape_cast %124 : vector<2x8xf32> to vector<2x8x1xf32>
    %126 = vector.broadcast %125 : vector<2x8x1xf32> to vector<2x8x8xf32>
    %127 = arith.subf %123, %126 : vector<2x8x8xf32>
    %128 = math.exp %127 : vector<2x8x8xf32>
    %cst_38 = arith.constant dense<0.000000e+00> : vector<2x8xf32>
    %129 = vector.multi_reduction <add>, %128, %cst_38 [2] : vector<2x8x8xf32> to vector<2x8xf32>
    %130 = vector.shape_cast %129 : vector<2x8xf32> to vector<2x8x1xf32>
    %131 = tpu.reciprocal %130 : vector<2x8x1xf32> -> vector<2x8x1xf32>
    %132 = vector.broadcast %131 : vector<2x8x1xf32> to vector<2x8x8xf32>
    %133 = arith.mulf %128, %132 : vector<2x8x8xf32>
    %134 = arith.truncf %133 : vector<2x8x8xf32> to vector<2x8x8xbf16>
    %135 = vector.extract_strided_slice %64 {offsets = [0, 0, 192], sizes = [2, 8, 64], strides = [1, 1, 1]} : vector<2x8x256xbf16> to vector<2x8x64xbf16>
    %cst_39 = arith.constant dense<0.000000e+00> : vector<2x8x64xf32>
    %136 = tpu.matmul %134, %135, %cst_39 {dimension_numbers = #tpu.dot_dimension_numbers<[2], [1], [1], [2], [0, 0, 0, 1, 1, 2], [0], [0]>} : vector<2x8x8xbf16>, vector<2x8x64xbf16>, vector<2x8x64xf32> -> vector<2x8x64xf32>
    %137 = tpu.concatenate %82, %100, %118, %136 in 2 : vector<2x8x64xf32>, vector<2x8x64xf32>, vector<2x8x64xf32>, vector<2x8x64xf32> -> vector<2x8x256xf32>
    %138 = vector.shape_cast %137 : vector<2x8x256xf32> to vector<16x256xf32>
    %139 = arith.truncf %138 : vector<16x256xf32> to vector<16x256xbf16>
    %c0_40 = arith.constant 0 : index
    %c768 = arith.constant 768 : index
    %140 = vector.load %arg4[%c0_40, %c768] : memref<256x3456xbf16, #tpu.memory_space<vmem>>, vector<256x256xbf16>
    %cst_41 = arith.constant dense<0.000000e+00> : vector<16x256xf32>
    %141 = tpu.matmul %139, %140, %cst_41 {dimension_numbers = #tpu.dot_dimension_numbers<[1], [0], [0], [1], [0, 0, 1, 1], [], []>} : vector<16x256xbf16>, vector<256x256xbf16>, vector<16x256xf32> -> vector<16x256xf32>
    %c3 = arith.constant 3 : index
    %c0_42 = arith.constant 0 : index
    %142 = vector.load %arg6[%c3, %c0_42] : memref<22x512xf32, #tpu.memory_space<vmem>>, vector<1x256xf32>
    %143 = vector.broadcast %142 : vector<1x256xf32> to vector<16x256xf32>
    %144 = arith.addf %141, %143 : vector<16x256xf32>
    %145 = arith.addf %33, %144 : vector<16x256xf32>
    %c4 = arith.constant 4 : index
    %c0_43 = arith.constant 0 : index
    %146 = vector.load %arg6[%c4, %c0_43] : memref<22x512xf32, #tpu.memory_space<vmem>>, vector<1x256xf32>
    %c5 = arith.constant 5 : index
    %c0_44 = arith.constant 0 : index
    %147 = vector.load %arg6[%c5, %c0_44] : memref<22x512xf32, #tpu.memory_space<vmem>>, vector<1x256xf32>
    %cst_45 = arith.constant dense<0.000000e+00> : vector<16xf32>
    %148 = vector.multi_reduction <add>, %145, %cst_45 [1] : vector<16x256xf32> to vector<16xf32>
    %149 = vector.shape_cast %148 : vector<16xf32> to vector<16x1xf32>
    %cst_46 = arith.constant 2.560000e+02 : f32
    %150 = vector.broadcast %cst_46 : f32 to vector<16x1xf32>
    %151 = arith.divf %149, %150 : vector<16x1xf32>
    %152 = vector.broadcast %151 : vector<16x1xf32> to vector<16x256xf32>
    %153 = arith.subf %145, %152 : vector<16x256xf32>
    %154 = arith.mulf %153, %153 : vector<16x256xf32>
    %cst_47 = arith.constant dense<0.000000e+00> : vector<16xf32>
    %155 = vector.multi_reduction <add>, %154, %cst_47 [1] : vector<16x256xf32> to vector<16xf32>
    %156 = vector.shape_cast %155 : vector<16xf32> to vector<16x1xf32>
    %cst_48 = arith.constant 2.560000e+02 : f32
    %157 = vector.broadcast %cst_48 : f32 to vector<16x1xf32>
    %158 = arith.divf %156, %157 : vector<16x1xf32>
    %159 = vector.broadcast %151 : vector<16x1xf32> to vector<16x256xf32>
    %160 = arith.subf %145, %159 : vector<16x256xf32>
    %cst_49 = arith.constant 9.99999974E-6 : f32
    %161 = vector.broadcast %cst_49 : f32 to vector<16x1xf32>
    %162 = arith.addf %158, %161 : vector<16x1xf32>
    %163 = math.rsqrt %162 : vector<16x1xf32>
    %164 = vector.broadcast %163 : vector<16x1xf32> to vector<16x256xf32>
    %165 = arith.mulf %160, %164 : vector<16x256xf32>
    %166 = vector.broadcast %146 : vector<1x256xf32> to vector<16x256xf32>
    %167 = arith.mulf %165, %166 : vector<16x256xf32>
    %168 = vector.broadcast %147 : vector<1x256xf32> to vector<16x256xf32>
    %169 = arith.addf %167, %168 : vector<16x256xf32>
    %170 = arith.truncf %169 : vector<16x256xf32> to vector<16x256xbf16>
    %c0_50 = arith.constant 0 : index
    %c1024 = arith.constant 1024 : index
    %171 = vector.load %arg4[%c0_50, %c1024] : memref<256x3456xbf16, #tpu.memory_space<vmem>>, vector<256x512xbf16>
    %cst_51 = arith.constant dense<0.000000e+00> : vector<16x512xf32>
    %172 = tpu.matmul %170, %171, %cst_51 {dimension_numbers = #tpu.dot_dimension_numbers<[1], [0], [0], [1], [0, 0, 1, 1], [], []>} : vector<16x256xbf16>, vector<256x512xbf16>, vector<16x512xf32> -> vector<16x512xf32>
    %c6 = arith.constant 6 : index
    %c0_52 = arith.constant 0 : index
    %173 = vector.load %arg6[%c6, %c0_52] : memref<22x512xf32, #tpu.memory_space<vmem>>, vector<1x512xf32>
    %174 = vector.broadcast %173 : vector<1x512xf32> to vector<16x512xf32>
    %175 = arith.addf %172, %174 : vector<16x512xf32>
    %cst_53 = arith.constant 0.000000e+00 : f32
    %176 = vector.broadcast %cst_53 : f32 to vector<16x512xf32>
    %177 = arith.maximumf %175, %176 : vector<16x512xf32>
    %178 = arith.truncf %177 : vector<16x512xf32> to vector<16x512xbf16>
    %c0_54 = arith.constant 0 : index
    %c0_55 = arith.constant 0 : index
    %179 = vector.load %arg5[%c0_54, %c0_55] : memref<512x512xbf16, #tpu.memory_space<vmem>>, vector<512x256xbf16>
    %cst_56 = arith.constant dense<0.000000e+00> : vector<16x256xf32>
    %180 = tpu.matmul %178, %179, %cst_56 {dimension_numbers = #tpu.dot_dimension_numbers<[1], [0], [0], [1], [0, 0, 1, 1], [], []>} : vector<16x512xbf16>, vector<512x256xbf16>, vector<16x256xf32> -> vector<16x256xf32>
    %c7 = arith.constant 7 : index
    %c0_57 = arith.constant 0 : index
    %181 = vector.load %arg6[%c7, %c0_57] : memref<22x512xf32, #tpu.memory_space<vmem>>, vector<1x256xf32>
    %182 = vector.broadcast %181 : vector<1x256xf32> to vector<16x256xf32>
    %183 = arith.addf %180, %182 : vector<16x256xf32>
    %184 = arith.addf %169, %183 : vector<16x256xf32>
    %c8 = arith.constant 8 : index
    %c0_58 = arith.constant 0 : index
    %185 = vector.load %arg6[%c8, %c0_58] : memref<22x512xf32, #tpu.memory_space<vmem>>, vector<1x256xf32>
    %c9 = arith.constant 9 : index
    %c0_59 = arith.constant 0 : index
    %186 = vector.load %arg6[%c9, %c0_59] : memref<22x512xf32, #tpu.memory_space<vmem>>, vector<1x256xf32>
    %cst_60 = arith.constant dense<0.000000e+00> : vector<16xf32>
    %187 = vector.multi_reduction <add>, %184, %cst_60 [1] : vector<16x256xf32> to vector<16xf32>
    %188 = vector.shape_cast %187 : vector<16xf32> to vector<16x1xf32>
    %cst_61 = arith.constant 2.560000e+02 : f32
    %189 = vector.broadcast %cst_61 : f32 to vector<16x1xf32>
    %190 = arith.divf %188, %189 : vector<16x1xf32>
    %191 = vector.broadcast %190 : vector<16x1xf32> to vector<16x256xf32>
    %192 = arith.subf %184, %191 : vector<16x256xf32>
    %193 = arith.mulf %192, %192 : vector<16x256xf32>
    %cst_62 = arith.constant dense<0.000000e+00> : vector<16xf32>
    %194 = vector.multi_reduction <add>, %193, %cst_62 [1] : vector<16x256xf32> to vector<16xf32>
    %195 = vector.shape_cast %194 : vector<16xf32> to vector<16x1xf32>
    %cst_63 = arith.constant 2.560000e+02 : f32
    %196 = vector.broadcast %cst_63 : f32 to vector<16x1xf32>
    %197 = arith.divf %195, %196 : vector<16x1xf32>
    %198 = vector.broadcast %190 : vector<16x1xf32> to vector<16x256xf32>
    %199 = arith.subf %184, %198 : vector<16x256xf32>
    %cst_64 = arith.constant 9.99999974E-6 : f32
    %200 = vector.broadcast %cst_64 : f32 to vector<16x1xf32>
    %201 = arith.addf %197, %200 : vector<16x1xf32>
    %202 = math.rsqrt %201 : vector<16x1xf32>
    %203 = vector.broadcast %202 : vector<16x1xf32> to vector<16x256xf32>
    %204 = arith.mulf %199, %203 : vector<16x256xf32>
    %205 = vector.broadcast %185 : vector<1x256xf32> to vector<16x256xf32>
    %206 = arith.mulf %204, %205 : vector<16x256xf32>
    %207 = vector.broadcast %186 : vector<1x256xf32> to vector<16x256xf32>
    %208 = arith.addf %206, %207 : vector<16x256xf32>
    %209 = arith.truncf %208 : vector<16x256xf32> to vector<16x256xbf16>
    %c0_65 = arith.constant 0 : index
    %c1536 = arith.constant 1536 : index
    %210 = vector.load %arg4[%c0_65, %c1536] : memref<256x3456xbf16, #tpu.memory_space<vmem>>, vector<256x256xbf16>
    %cst_66 = arith.constant dense<0.000000e+00> : vector<16x256xf32>
    %211 = tpu.matmul %209, %210, %cst_66 {dimension_numbers = #tpu.dot_dimension_numbers<[1], [0], [0], [1], [0, 0, 1, 1], [], []>} : vector<16x256xbf16>, vector<256x256xbf16>, vector<16x256xf32> -> vector<16x256xf32>
    %c10 = arith.constant 10 : index
    %c0_67 = arith.constant 0 : index
    %212 = vector.load %arg6[%c10, %c0_67] : memref<22x512xf32, #tpu.memory_space<vmem>>, vector<1x256xf32>
    %213 = vector.broadcast %212 : vector<1x256xf32> to vector<16x256xf32>
    %214 = arith.addf %211, %213 : vector<16x256xf32>
    %c0_68 = arith.constant 0 : index
    %c1792 = arith.constant 1792 : index
    %215 = vector.load %arg4[%c0_68, %c1792] : memref<256x3456xbf16, #tpu.memory_space<vmem>>, vector<256x256xbf16>
    %cst_69 = arith.constant dense<0.000000e+00> : vector<16x256xf32>
    %216 = tpu.matmul %209, %215, %cst_69 {dimension_numbers = #tpu.dot_dimension_numbers<[1], [0], [0], [1], [0, 0, 1, 1], [], []>} : vector<16x256xbf16>, vector<256x256xbf16>, vector<16x256xf32> -> vector<16x256xf32>
    %c11 = arith.constant 11 : index
    %c0_70 = arith.constant 0 : index
    %217 = vector.load %arg6[%c11, %c0_70] : memref<22x512xf32, #tpu.memory_space<vmem>>, vector<1x256xf32>
    %218 = vector.broadcast %217 : vector<1x256xf32> to vector<16x256xf32>
    %219 = arith.addf %216, %218 : vector<16x256xf32>
    %c0_71 = arith.constant 0 : index
    %c2048 = arith.constant 2048 : index
    %220 = vector.load %arg4[%c0_71, %c2048] : memref<256x3456xbf16, #tpu.memory_space<vmem>>, vector<256x256xbf16>
    %cst_72 = arith.constant dense<0.000000e+00> : vector<16x256xf32>
    %221 = tpu.matmul %209, %220, %cst_72 {dimension_numbers = #tpu.dot_dimension_numbers<[1], [0], [0], [1], [0, 0, 1, 1], [], []>} : vector<16x256xbf16>, vector<256x256xbf16>, vector<16x256xf32> -> vector<16x256xf32>
    %c12 = arith.constant 12 : index
    %c0_73 = arith.constant 0 : index
    %222 = vector.load %arg6[%c12, %c0_73] : memref<22x512xf32, #tpu.memory_space<vmem>>, vector<1x256xf32>
    %223 = vector.broadcast %222 : vector<1x256xf32> to vector<16x256xf32>
    %224 = arith.addf %221, %223 : vector<16x256xf32>
    %225 = vector.shape_cast %214 : vector<16x256xf32> to vector<2x8x256xf32>
    %226 = arith.truncf %225 : vector<2x8x256xf32> to vector<2x8x256xbf16>
    %227 = vector.shape_cast %219 : vector<16x256xf32> to vector<2x8x256xf32>
    %228 = arith.truncf %227 : vector<2x8x256xf32> to vector<2x8x256xbf16>
    %229 = vector.shape_cast %224 : vector<16x256xf32> to vector<2x8x256xf32>
    %230 = arith.truncf %229 : vector<2x8x256xf32> to vector<2x8x256xbf16>
    %231 = vector.extract_strided_slice %226 {offsets = [0, 0, 0], sizes = [2, 8, 64], strides = [1, 1, 1]} : vector<2x8x256xbf16> to vector<2x8x64xbf16>
    %232 = vector.extract_strided_slice %228 {offsets = [0, 0, 0], sizes = [2, 8, 64], strides = [1, 1, 1]} : vector<2x8x256xbf16> to vector<2x8x64xbf16>
    %cst_74 = arith.constant dense<0.000000e+00> : vector<2x8x8xf32>
    %233 = tpu.matmul %231, %232, %cst_74 {dimension_numbers = #tpu.dot_dimension_numbers<[2], [2], [1], [1], [0, 0, 0, 1, 1, 1], [0], [0]>} : vector<2x8x64xbf16>, vector<2x8x64xbf16>, vector<2x8x8xf32> -> vector<2x8x8xf32>
    %234 = vector.broadcast %42 : vector<2x1x8xf32> to vector<2x8x8xf32>
    %235 = arith.addf %233, %234 : vector<2x8x8xf32>
    %cst_75 = arith.constant dense<0xFF800000> : vector<2x8xf32>
    %236 = vector.multi_reduction <maximumf>, %235, %cst_75 [2] : vector<2x8x8xf32> to vector<2x8xf32>
    %237 = vector.shape_cast %236 : vector<2x8xf32> to vector<2x8x1xf32>
    %238 = vector.broadcast %237 : vector<2x8x1xf32> to vector<2x8x8xf32>
    %239 = arith.subf %235, %238 : vector<2x8x8xf32>
    %240 = math.exp %239 : vector<2x8x8xf32>
    %cst_76 = arith.constant dense<0.000000e+00> : vector<2x8xf32>
    %241 = vector.multi_reduction <add>, %240, %cst_76 [2] : vector<2x8x8xf32> to vector<2x8xf32>
    %242 = vector.shape_cast %241 : vector<2x8xf32> to vector<2x8x1xf32>
    %243 = tpu.reciprocal %242 : vector<2x8x1xf32> -> vector<2x8x1xf32>
    %244 = vector.broadcast %243 : vector<2x8x1xf32> to vector<2x8x8xf32>
    %245 = arith.mulf %240, %244 : vector<2x8x8xf32>
    %246 = arith.truncf %245 : vector<2x8x8xf32> to vector<2x8x8xbf16>
    %247 = vector.extract_strided_slice %230 {offsets = [0, 0, 0], sizes = [2, 8, 64], strides = [1, 1, 1]} : vector<2x8x256xbf16> to vector<2x8x64xbf16>
    %cst_77 = arith.constant dense<0.000000e+00> : vector<2x8x64xf32>
    %248 = tpu.matmul %246, %247, %cst_77 {dimension_numbers = #tpu.dot_dimension_numbers<[2], [1], [1], [2], [0, 0, 0, 1, 1, 2], [0], [0]>} : vector<2x8x8xbf16>, vector<2x8x64xbf16>, vector<2x8x64xf32> -> vector<2x8x64xf32>
    %249 = vector.extract_strided_slice %226 {offsets = [0, 0, 64], sizes = [2, 8, 64], strides = [1, 1, 1]} : vector<2x8x256xbf16> to vector<2x8x64xbf16>
    %250 = vector.extract_strided_slice %228 {offsets = [0, 0, 64], sizes = [2, 8, 64], strides = [1, 1, 1]} : vector<2x8x256xbf16> to vector<2x8x64xbf16>
    %cst_78 = arith.constant dense<0.000000e+00> : vector<2x8x8xf32>
    %251 = tpu.matmul %249, %250, %cst_78 {dimension_numbers = #tpu.dot_dimension_numbers<[2], [2], [1], [1], [0, 0, 0, 1, 1, 1], [0], [0]>} : vector<2x8x64xbf16>, vector<2x8x64xbf16>, vector<2x8x8xf32> -> vector<2x8x8xf32>
    %252 = vector.broadcast %42 : vector<2x1x8xf32> to vector<2x8x8xf32>
    %253 = arith.addf %251, %252 : vector<2x8x8xf32>
    %cst_79 = arith.constant dense<0xFF800000> : vector<2x8xf32>
    %254 = vector.multi_reduction <maximumf>, %253, %cst_79 [2] : vector<2x8x8xf32> to vector<2x8xf32>
    %255 = vector.shape_cast %254 : vector<2x8xf32> to vector<2x8x1xf32>
    %256 = vector.broadcast %255 : vector<2x8x1xf32> to vector<2x8x8xf32>
    %257 = arith.subf %253, %256 : vector<2x8x8xf32>
    %258 = math.exp %257 : vector<2x8x8xf32>
    %cst_80 = arith.constant dense<0.000000e+00> : vector<2x8xf32>
    %259 = vector.multi_reduction <add>, %258, %cst_80 [2] : vector<2x8x8xf32> to vector<2x8xf32>
    %260 = vector.shape_cast %259 : vector<2x8xf32> to vector<2x8x1xf32>
    %261 = tpu.reciprocal %260 : vector<2x8x1xf32> -> vector<2x8x1xf32>
    %262 = vector.broadcast %261 : vector<2x8x1xf32> to vector<2x8x8xf32>
    %263 = arith.mulf %258, %262 : vector<2x8x8xf32>
    %264 = arith.truncf %263 : vector<2x8x8xf32> to vector<2x8x8xbf16>
    %265 = vector.extract_strided_slice %230 {offsets = [0, 0, 64], sizes = [2, 8, 64], strides = [1, 1, 1]} : vector<2x8x256xbf16> to vector<2x8x64xbf16>
    %cst_81 = arith.constant dense<0.000000e+00> : vector<2x8x64xf32>
    %266 = tpu.matmul %264, %265, %cst_81 {dimension_numbers = #tpu.dot_dimension_numbers<[2], [1], [1], [2], [0, 0, 0, 1, 1, 2], [0], [0]>} : vector<2x8x8xbf16>, vector<2x8x64xbf16>, vector<2x8x64xf32> -> vector<2x8x64xf32>
    %267 = vector.extract_strided_slice %226 {offsets = [0, 0, 128], sizes = [2, 8, 64], strides = [1, 1, 1]} : vector<2x8x256xbf16> to vector<2x8x64xbf16>
    %268 = vector.extract_strided_slice %228 {offsets = [0, 0, 128], sizes = [2, 8, 64], strides = [1, 1, 1]} : vector<2x8x256xbf16> to vector<2x8x64xbf16>
    %cst_82 = arith.constant dense<0.000000e+00> : vector<2x8x8xf32>
    %269 = tpu.matmul %267, %268, %cst_82 {dimension_numbers = #tpu.dot_dimension_numbers<[2], [2], [1], [1], [0, 0, 0, 1, 1, 1], [0], [0]>} : vector<2x8x64xbf16>, vector<2x8x64xbf16>, vector<2x8x8xf32> -> vector<2x8x8xf32>
    %270 = vector.broadcast %42 : vector<2x1x8xf32> to vector<2x8x8xf32>
    %271 = arith.addf %269, %270 : vector<2x8x8xf32>
    %cst_83 = arith.constant dense<0xFF800000> : vector<2x8xf32>
    %272 = vector.multi_reduction <maximumf>, %271, %cst_83 [2] : vector<2x8x8xf32> to vector<2x8xf32>
    %273 = vector.shape_cast %272 : vector<2x8xf32> to vector<2x8x1xf32>
    %274 = vector.broadcast %273 : vector<2x8x1xf32> to vector<2x8x8xf32>
    %275 = arith.subf %271, %274 : vector<2x8x8xf32>
    %276 = math.exp %275 : vector<2x8x8xf32>
    %cst_84 = arith.constant dense<0.000000e+00> : vector<2x8xf32>
    %277 = vector.multi_reduction <add>, %276, %cst_84 [2] : vector<2x8x8xf32> to vector<2x8xf32>
    %278 = vector.shape_cast %277 : vector<2x8xf32> to vector<2x8x1xf32>
    %279 = tpu.reciprocal %278 : vector<2x8x1xf32> -> vector<2x8x1xf32>
    %280 = vector.broadcast %279 : vector<2x8x1xf32> to vector<2x8x8xf32>
    %281 = arith.mulf %276, %280 : vector<2x8x8xf32>
    %282 = arith.truncf %281 : vector<2x8x8xf32> to vector<2x8x8xbf16>
    %283 = vector.extract_strided_slice %230 {offsets = [0, 0, 128], sizes = [2, 8, 64], strides = [1, 1, 1]} : vector<2x8x256xbf16> to vector<2x8x64xbf16>
    %cst_85 = arith.constant dense<0.000000e+00> : vector<2x8x64xf32>
    %284 = tpu.matmul %282, %283, %cst_85 {dimension_numbers = #tpu.dot_dimension_numbers<[2], [1], [1], [2], [0, 0, 0, 1, 1, 2], [0], [0]>} : vector<2x8x8xbf16>, vector<2x8x64xbf16>, vector<2x8x64xf32> -> vector<2x8x64xf32>
    %285 = vector.extract_strided_slice %226 {offsets = [0, 0, 192], sizes = [2, 8, 64], strides = [1, 1, 1]} : vector<2x8x256xbf16> to vector<2x8x64xbf16>
    %286 = vector.extract_strided_slice %228 {offsets = [0, 0, 192], sizes = [2, 8, 64], strides = [1, 1, 1]} : vector<2x8x256xbf16> to vector<2x8x64xbf16>
    %cst_86 = arith.constant dense<0.000000e+00> : vector<2x8x8xf32>
    %287 = tpu.matmul %285, %286, %cst_86 {dimension_numbers = #tpu.dot_dimension_numbers<[2], [2], [1], [1], [0, 0, 0, 1, 1, 1], [0], [0]>} : vector<2x8x64xbf16>, vector<2x8x64xbf16>, vector<2x8x8xf32> -> vector<2x8x8xf32>
    %288 = vector.broadcast %42 : vector<2x1x8xf32> to vector<2x8x8xf32>
    %289 = arith.addf %287, %288 : vector<2x8x8xf32>
    %cst_87 = arith.constant dense<0xFF800000> : vector<2x8xf32>
    %290 = vector.multi_reduction <maximumf>, %289, %cst_87 [2] : vector<2x8x8xf32> to vector<2x8xf32>
    %291 = vector.shape_cast %290 : vector<2x8xf32> to vector<2x8x1xf32>
    %292 = vector.broadcast %291 : vector<2x8x1xf32> to vector<2x8x8xf32>
    %293 = arith.subf %289, %292 : vector<2x8x8xf32>
    %294 = math.exp %293 : vector<2x8x8xf32>
    %cst_88 = arith.constant dense<0.000000e+00> : vector<2x8xf32>
    %295 = vector.multi_reduction <add>, %294, %cst_88 [2] : vector<2x8x8xf32> to vector<2x8xf32>
    %296 = vector.shape_cast %295 : vector<2x8xf32> to vector<2x8x1xf32>
    %297 = tpu.reciprocal %296 : vector<2x8x1xf32> -> vector<2x8x1xf32>
    %298 = vector.broadcast %297 : vector<2x8x1xf32> to vector<2x8x8xf32>
    %299 = arith.mulf %294, %298 : vector<2x8x8xf32>
    %300 = arith.truncf %299 : vector<2x8x8xf32> to vector<2x8x8xbf16>
    %301 = vector.extract_strided_slice %230 {offsets = [0, 0, 192], sizes = [2, 8, 64], strides = [1, 1, 1]} : vector<2x8x256xbf16> to vector<2x8x64xbf16>
    %cst_89 = arith.constant dense<0.000000e+00> : vector<2x8x64xf32>
    %302 = tpu.matmul %300, %301, %cst_89 {dimension_numbers = #tpu.dot_dimension_numbers<[2], [1], [1], [2], [0, 0, 0, 1, 1, 2], [0], [0]>} : vector<2x8x8xbf16>, vector<2x8x64xbf16>, vector<2x8x64xf32> -> vector<2x8x64xf32>
    %303 = tpu.concatenate %248, %266, %284, %302 in 2 : vector<2x8x64xf32>, vector<2x8x64xf32>, vector<2x8x64xf32>, vector<2x8x64xf32> -> vector<2x8x256xf32>
    %304 = vector.shape_cast %303 : vector<2x8x256xf32> to vector<16x256xf32>
    %305 = arith.truncf %304 : vector<16x256xf32> to vector<16x256xbf16>
    %c0_90 = arith.constant 0 : index
    %c2304 = arith.constant 2304 : index
    %306 = vector.load %arg4[%c0_90, %c2304] : memref<256x3456xbf16, #tpu.memory_space<vmem>>, vector<256x256xbf16>
    %cst_91 = arith.constant dense<0.000000e+00> : vector<16x256xf32>
    %307 = tpu.matmul %305, %306, %cst_91 {dimension_numbers = #tpu.dot_dimension_numbers<[1], [0], [0], [1], [0, 0, 1, 1], [], []>} : vector<16x256xbf16>, vector<256x256xbf16>, vector<16x256xf32> -> vector<16x256xf32>
    %c13 = arith.constant 13 : index
    %c0_92 = arith.constant 0 : index
    %308 = vector.load %arg6[%c13, %c0_92] : memref<22x512xf32, #tpu.memory_space<vmem>>, vector<1x256xf32>
    %309 = vector.broadcast %308 : vector<1x256xf32> to vector<16x256xf32>
    %310 = arith.addf %307, %309 : vector<16x256xf32>
    %311 = arith.addf %208, %310 : vector<16x256xf32>
    %c14 = arith.constant 14 : index
    %c0_93 = arith.constant 0 : index
    %312 = vector.load %arg6[%c14, %c0_93] : memref<22x512xf32, #tpu.memory_space<vmem>>, vector<1x256xf32>
    %c15 = arith.constant 15 : index
    %c0_94 = arith.constant 0 : index
    %313 = vector.load %arg6[%c15, %c0_94] : memref<22x512xf32, #tpu.memory_space<vmem>>, vector<1x256xf32>
    %cst_95 = arith.constant dense<0.000000e+00> : vector<16xf32>
    %314 = vector.multi_reduction <add>, %311, %cst_95 [1] : vector<16x256xf32> to vector<16xf32>
    %315 = vector.shape_cast %314 : vector<16xf32> to vector<16x1xf32>
    %cst_96 = arith.constant 2.560000e+02 : f32
    %316 = vector.broadcast %cst_96 : f32 to vector<16x1xf32>
    %317 = arith.divf %315, %316 : vector<16x1xf32>
    %318 = vector.broadcast %317 : vector<16x1xf32> to vector<16x256xf32>
    %319 = arith.subf %311, %318 : vector<16x256xf32>
    %320 = arith.mulf %319, %319 : vector<16x256xf32>
    %cst_97 = arith.constant dense<0.000000e+00> : vector<16xf32>
    %321 = vector.multi_reduction <add>, %320, %cst_97 [1] : vector<16x256xf32> to vector<16xf32>
    %322 = vector.shape_cast %321 : vector<16xf32> to vector<16x1xf32>
    %cst_98 = arith.constant 2.560000e+02 : f32
    %323 = vector.broadcast %cst_98 : f32 to vector<16x1xf32>
    %324 = arith.divf %322, %323 : vector<16x1xf32>
    %325 = vector.broadcast %317 : vector<16x1xf32> to vector<16x256xf32>
    %326 = arith.subf %311, %325 : vector<16x256xf32>
    %cst_99 = arith.constant 9.99999974E-6 : f32
    %327 = vector.broadcast %cst_99 : f32 to vector<16x1xf32>
    %328 = arith.addf %324, %327 : vector<16x1xf32>
    %329 = math.rsqrt %328 : vector<16x1xf32>
    %330 = vector.broadcast %329 : vector<16x1xf32> to vector<16x256xf32>
    %331 = arith.mulf %326, %330 : vector<16x256xf32>
    %332 = vector.broadcast %312 : vector<1x256xf32> to vector<16x256xf32>
    %333 = arith.mulf %331, %332 : vector<16x256xf32>
    %334 = vector.broadcast %313 : vector<1x256xf32> to vector<16x256xf32>
    %335 = arith.addf %333, %334 : vector<16x256xf32>
    %336 = arith.truncf %335 : vector<16x256xf32> to vector<16x256xbf16>
    %c0_100 = arith.constant 0 : index
    %c2560 = arith.constant 2560 : index
    %337 = vector.load %arg4[%c0_100, %c2560] : memref<256x3456xbf16, #tpu.memory_space<vmem>>, vector<256x512xbf16>
    %cst_101 = arith.constant dense<0.000000e+00> : vector<16x512xf32>
    %338 = tpu.matmul %336, %337, %cst_101 {dimension_numbers = #tpu.dot_dimension_numbers<[1], [0], [0], [1], [0, 0, 1, 1], [], []>} : vector<16x256xbf16>, vector<256x512xbf16>, vector<16x512xf32> -> vector<16x512xf32>
    %c16 = arith.constant 16 : index
    %c0_102 = arith.constant 0 : index
    %339 = vector.load %arg6[%c16, %c0_102] : memref<22x512xf32, #tpu.memory_space<vmem>>, vector<1x512xf32>
    %340 = vector.broadcast %339 : vector<1x512xf32> to vector<16x512xf32>
    %341 = arith.addf %338, %340 : vector<16x512xf32>
    %cst_103 = arith.constant 0.000000e+00 : f32
    %342 = vector.broadcast %cst_103 : f32 to vector<16x512xf32>
    %343 = arith.maximumf %341, %342 : vector<16x512xf32>
    %344 = arith.truncf %343 : vector<16x512xf32> to vector<16x512xbf16>
    %c0_104 = arith.constant 0 : index
    %c256_105 = arith.constant 256 : index
    %345 = vector.load %arg5[%c0_104, %c256_105] : memref<512x512xbf16, #tpu.memory_space<vmem>>, vector<512x256xbf16>
    %cst_106 = arith.constant dense<0.000000e+00> : vector<16x256xf32>
    %346 = tpu.matmul %344, %345, %cst_106 {dimension_numbers = #tpu.dot_dimension_numbers<[1], [0], [0], [1], [0, 0, 1, 1], [], []>} : vector<16x512xbf16>, vector<512x256xbf16>, vector<16x256xf32> -> vector<16x256xf32>
    %c17 = arith.constant 17 : index
    %c0_107 = arith.constant 0 : index
    %347 = vector.load %arg6[%c17, %c0_107] : memref<22x512xf32, #tpu.memory_space<vmem>>, vector<1x256xf32>
    %348 = vector.broadcast %347 : vector<1x256xf32> to vector<16x256xf32>
    %349 = arith.addf %346, %348 : vector<16x256xf32>
    %350 = arith.addf %335, %349 : vector<16x256xf32>
    %c18 = arith.constant 18 : index
    %c0_108 = arith.constant 0 : index
    %351 = vector.load %arg6[%c18, %c0_108] : memref<22x512xf32, #tpu.memory_space<vmem>>, vector<1x256xf32>
    %c19 = arith.constant 19 : index
    %c0_109 = arith.constant 0 : index
    %352 = vector.load %arg6[%c19, %c0_109] : memref<22x512xf32, #tpu.memory_space<vmem>>, vector<1x256xf32>
    %cst_110 = arith.constant dense<0.000000e+00> : vector<16xf32>
    %353 = vector.multi_reduction <add>, %350, %cst_110 [1] : vector<16x256xf32> to vector<16xf32>
    %354 = vector.shape_cast %353 : vector<16xf32> to vector<16x1xf32>
    %cst_111 = arith.constant 2.560000e+02 : f32
    %355 = vector.broadcast %cst_111 : f32 to vector<16x1xf32>
    %356 = arith.divf %354, %355 : vector<16x1xf32>
    %357 = vector.broadcast %356 : vector<16x1xf32> to vector<16x256xf32>
    %358 = arith.subf %350, %357 : vector<16x256xf32>
    %359 = arith.mulf %358, %358 : vector<16x256xf32>
    %cst_112 = arith.constant dense<0.000000e+00> : vector<16xf32>
    %360 = vector.multi_reduction <add>, %359, %cst_112 [1] : vector<16x256xf32> to vector<16xf32>
    %361 = vector.shape_cast %360 : vector<16xf32> to vector<16x1xf32>
    %cst_113 = arith.constant 2.560000e+02 : f32
    %362 = vector.broadcast %cst_113 : f32 to vector<16x1xf32>
    %363 = arith.divf %361, %362 : vector<16x1xf32>
    %364 = vector.broadcast %356 : vector<16x1xf32> to vector<16x256xf32>
    %365 = arith.subf %350, %364 : vector<16x256xf32>
    %cst_114 = arith.constant 9.99999974E-6 : f32
    %366 = vector.broadcast %cst_114 : f32 to vector<16x1xf32>
    %367 = arith.addf %363, %366 : vector<16x1xf32>
    %368 = math.rsqrt %367 : vector<16x1xf32>
    %369 = vector.broadcast %368 : vector<16x1xf32> to vector<16x256xf32>
    %370 = arith.mulf %365, %369 : vector<16x256xf32>
    %371 = vector.broadcast %351 : vector<1x256xf32> to vector<16x256xf32>
    %372 = arith.mulf %370, %371 : vector<16x256xf32>
    %373 = vector.broadcast %352 : vector<1x256xf32> to vector<16x256xf32>
    %374 = arith.addf %372, %373 : vector<16x256xf32>
    %375 = vector.shape_cast %374 : vector<16x256xf32> to vector<2x8x256xf32>
    %376 = vector.extract_strided_slice %375 {offsets = [0, 0, 0], sizes = [2, 1, 256], strides = [1, 1, 1]} : vector<2x8x256xf32> to vector<2x1x256xf32>
    %377 = vector.shape_cast %376 : vector<2x1x256xf32> to vector<2x256xf32>
    %378 = arith.truncf %377 : vector<2x256xf32> to vector<2x256xbf16>
    %c0_115 = arith.constant 0 : index
    %c3072 = arith.constant 3072 : index
    %379 = vector.load %arg4[%c0_115, %c3072] : memref<256x3456xbf16, #tpu.memory_space<vmem>>, vector<256x256xbf16>
    %cst_116 = arith.constant dense<0.000000e+00> : vector<2x256xf32>
    %380 = tpu.matmul %378, %379, %cst_116 {dimension_numbers = #tpu.dot_dimension_numbers<[1], [0], [0], [1], [0, 0, 1, 1], [], []>} : vector<2x256xbf16>, vector<256x256xbf16>, vector<2x256xf32> -> vector<2x256xf32>
    %c20 = arith.constant 20 : index
    %c0_117 = arith.constant 0 : index
    %381 = vector.load %arg6[%c20, %c0_117] : memref<22x512xf32, #tpu.memory_space<vmem>>, vector<1x256xf32>
    %382 = vector.broadcast %381 : vector<1x256xf32> to vector<2x256xf32>
    %383 = arith.addf %380, %382 : vector<2x256xf32>
    %384 = math.tanh %383 : vector<2x256xf32>
    %385 = arith.truncf %384 : vector<2x256xf32> to vector<2x256xbf16>
    %c0_118 = arith.constant 0 : index
    %c3328 = arith.constant 3328 : index
    %386 = vector.load %arg4[%c0_118, %c3328] : memref<256x3456xbf16, #tpu.memory_space<vmem>>, vector<256x128xbf16>
    %cst_119 = arith.constant dense<0.000000e+00> : vector<2x128xf32>
    %387 = tpu.matmul %385, %386, %cst_119 {dimension_numbers = #tpu.dot_dimension_numbers<[1], [0], [0], [1], [0, 0, 1, 1], [], []>} : vector<2x256xbf16>, vector<256x128xbf16>, vector<2x128xf32> -> vector<2x128xf32>
    %c21 = arith.constant 21 : index
    %c0_120 = arith.constant 0 : index
    %388 = vector.load %arg6[%c21, %c0_120] : memref<22x512xf32, #tpu.memory_space<vmem>>, vector<1x128xf32>
    %389 = vector.broadcast %388 : vector<1x128xf32> to vector<2x128xf32>
    %390 = arith.addf %387, %389 : vector<2x128xf32>
    %c0_121 = arith.constant 0 : index
    %c0_122 = arith.constant 0 : index
    %391 = vector.load %arg7[%c0_121, %c0_122] : memref<2x128xf32, #tpu.memory_space<vmem>>, vector<2x128xf32>
    tpu.vector_store %arg7[%c0_121, %c0_122], %390 {strides = array<i32>} : memref<2x128xf32, #tpu.memory_space<vmem>>, vector<2x128xf32>,
    return
  }
}

</mosaic_0001>

<bundles_post_ra>
// kernel: tpu_custom_call.1
= control target key start
LH: loop header
LB: loop body
LE: loop exit
PB: predicated region body
PF: predicated region fallthrough
CT: control target
= control target key end

     0   :  { %12 = vsyncpa [#allocation3], 0  ;;  %s9763_s0 = inlined_call_operand.hbm [shape: s32[2,8], index: 0, kind: input, shape index: {}]   ;;  %s9764_s1 = inlined_call_operand.hbm [shape: s32[2,8], index: 1, kind: input, shape index: {}]   ;;  %s9765_s2 = inlined_call_operand.vmem [shape: s32[2,1], index: 2, kind: input, shape index: {}]   ;;  %s9766_s3 = inlined_call_operand.hbm [shape: f32[144,256], index: 3, kind: input, shape index: {}]   ;;  %s9767_s4 = inlined_call_operand.hbm [shape: bf16[256,3456], index: 4, kind: input, shape index: {}]   ;;  %s9768_s5 = inlined_call_operand.hbm [shape: bf16[512,512], index: 5, kind: input, shape index: {}]   ;;  %s9769_s6 = inlined_call_operand.hbm [shape: f32[22,512], index: 6, kind: input, shape index: {}]   ;;  %s9770_s7 = inlined_call_operand.hbm [shape: f32[2,128], index: 7, kind: output, shape index: {}]  }
   0x1   :  { %13 = vsyncpa [#allocation6], 0 }
   0x2   :  { %14 = vsyncpa [#allocation9], 0 }
   0x3   :  { %15 = vsyncpa [#allocation12], 0 }
   0x4   :  { %16 = vsyncpa [#allocation4], 0  ;;  %s8904_s24 = smov [#allocation5]   ;;  %s8905_s26 = smov [#allocation8]  }
   0x5   :  { %s33_s25 = sshll.u32 %s8904_s24, 4  ;;  %s56_s27 = sshll.u32 %s8905_s26, 4  ;;  %s34_s25 = int_to_ptr.vmem [resolvable:$true] %s33_s25  ;;  %s8964_s27 = int_to_ptr.vmem [resolvable:$true] %s56_s27 }
   0x6   :  { %s8740_s30 = scalar_lea.hbm %s9764_s1, 32 }
   0x7   :  { %p8741_p0 = scmp.ne.s32.totalorder %s9764_s1, %s8740_s30  ;;  %p8744_p1 = scmp.lt.u32.totalorder %s8740_s30, %s9764_s1 }
   0x9   :  { %p8746_p2 = pnand %p8744_p1, %p8741_p0 }
   0xb   :  { %8749 = shalt.err (!%p8746_p2)
}
   0xc   :  { %s8750_s12 = scalar_lea.vmem %s34_s25, 32  ;;  %p8755_p4 = scmp.lt.s32.totalorder %s34_s25, %s34_s25 }
   0xd   :  { %p8751_p3 = scmp.ne.s32.totalorder %s34_s25, %s8750_s12  ;;  %p8756_p5 = scmp.lt.s32.totalorder %s8750_s12, %s8750_s12 }
   0xf   :  { %p8757_p6 = por %p8756_p5, %p8755_p4 }
  0x11   :  { %p8758_p7 = pnand %p8757_p6, %p8751_p3 }
  0x13   :  { %8761 = shalt.err (!%p8758_p7)
}
  0x14   :  { %36 = dma.hbm_to_vmem [thread:$0]  %s9764_s1, 32, %s34_s25, [#allocation6]  }
  0x15   :  { %s8762_s17 = scalar_lea.hbm %s9767_s4, 55296 }
  0x16   :  { %p8763_p8 = scmp.ne.s32.totalorder %s9767_s4, %s8762_s17  ;;  %p8766_p9 = scmp.lt.u32.totalorder %s8762_s17, %s9767_s4 }
  0x18   :  { %p8768_p10 = pnand %p8766_p9, %p8763_p8 }
  0x1a   :  { %8771 = shalt.err (!%p8768_p10)
}
  0x1b   :  { %s8772_s22 = scalar_lea.vmem %s8964_s27, 55296  ;;  %p8777_p12 = scmp.lt.s32.totalorder %s8964_s27, %s8964_s27 }
  0x1c   :  { %p8773_p11 = scmp.ne.s32.totalorder %s8964_s27, %s8772_s22  ;;  %p8778_p13 = scmp.lt.s32.totalorder %s8772_s22, %s8772_s22 }
  0x1e   :  { %p8779_p0 = por %p8778_p13, %p8777_p12 }
  0x20   :  { %p8780_p1 = pnand %p8779_p0, %p8773_p11 }
  0x22   :  { %8783 = shalt.err (!%p8780_p1)
}
  0x23   :  { %s8906_s1 = smov 1728   ;;  %s8907_s23 = smov 108  }
  0x24   :  { %62 = dma.hbm_to_vmem [thread:$0]  %s9767_s4, 55296, %s8964_s27, [#allocation9], %s8906_s1, %s8906_s1, %s8907_s23  }
  0x25   :  { %s8908_s26 = smov [#allocation2]   ;;  %s8909_s29 = smov [#allocation7]  }
  0x26   :  { %s23_s28 = sshll.u32 %s8908_s26, 4  ;;  %s44_s30 = sshll.u32 %s8909_s29, 4  ;;  %s24_s28 = int_to_ptr.vmem [resolvable:$true] %s23_s28  ;;  %s8995_s30 = int_to_ptr.vmem [resolvable:$true] %s44_s30 }
  0x27   :  { %s8784_s10 = scalar_lea.hbm %s9763_s0, 32 }
  0x28   :  { %p8785_p2 = scmp.ne.s32.totalorder %s9763_s0, %s8784_s10  ;;  %p8788_p3 = scmp.lt.u32.totalorder %s8784_s10, %s9763_s0 }
  0x2a   :  { %p8790_p4 = pnand %p8788_p3, %p8785_p2 }
  0x2c   :  { %8793 = shalt.err (!%p8790_p4)
}
  0x2d   :  { %s8794_s4 = scalar_lea.vmem %s24_s28, 32  ;;  %p8799_p6 = scmp.lt.s32.totalorder %s24_s28, %s24_s28 }
  0x2e   :  { %p8795_p5 = scmp.ne.s32.totalorder %s24_s28, %s8794_s4  ;;  %p8800_p7 = scmp.lt.s32.totalorder %s8794_s4, %s8794_s4 }
  0x30   :  { %p8801_p8 = por %p8800_p7, %p8799_p6 }
  0x32   :  { %p8802_p9 = pnand %p8801_p8, %p8795_p5 }
  0x34   :  { %8805 = shalt.err (!%p8802_p9)
}
  0x35   :  { %26 = dma.hbm_to_vmem [thread:$0]  %s9763_s0, 32, %s24_s28, [#allocation3]  }
  0x36   :  { %s8806_s18 = scalar_lea.hbm %s9766_s3, 4608 }
  0x37   :  { %p8807_p10 = scmp.ne.s32.totalorder %s9766_s3, %s8806_s18  ;;  %p8810_p11 = scmp.lt.u32.totalorder %s8806_s18, %s9766_s3 }
  0x39   :  { %p8812_p12 = pnand %p8810_p11, %p8807_p10 }
  0x3b   :  { %8815 = shalt.err (!%p8812_p12)
}
  0x3c   :  { %s8816_s1 = scalar_lea.vmem %s8995_s30, 4608  ;;  %p8821_p0 = scmp.lt.s32.totalorder %s8995_s30, %s8995_s30 }
  0x3d   :  { %p8817_p13 = scmp.ne.s32.totalorder %s8995_s30, %s8816_s1  ;;  %p8822_p1 = scmp.lt.s32.totalorder %s8816_s1, %s8816_s1 }
  0x3f   :  { %p8823_p2 = por %p8822_p1, %p8821_p0 }
  0x41   :  { %p8824_p3 = pnand %p8823_p2, %p8817_p13 }
  0x43   :  { %8827 = shalt.err (!%p8824_p3)
}
  0x44   :  { %s8910_s0 = smov 256   ;;  %s8911_s23 = smov 16  }
  0x45   :  { %50 = dma.hbm_to_vmem [thread:$0]  %s9766_s3, 4608, %s8995_s30, [#allocation6], %s8910_s0, %s8910_s0, %s8911_s23  }
  0x46   :  { %s8912_s26 = smov [#allocation10]   ;;  %s8913_s29 = smov [#allocation11]  }
  0x47   :  { %s68_s28 = sshll.u32 %s8912_s26, 4  ;;  %s80_s8 = sshll.u32 %s8913_s29, 4  ;;  %s69_s28 = int_to_ptr.vmem [resolvable:$true] %s68_s28  ;;  %s9026_s8 = int_to_ptr.vmem [resolvable:$true] %s80_s8 }
  0x48   :  { %s8828_s11 = scalar_lea.hbm %s9768_s5, 16384 }
  0x49   :  { %p8829_p4 = scmp.ne.s32.totalorder %s9768_s5, %s8828_s11  ;;  %p8832_p5 = scmp.lt.u32.totalorder %s8828_s11, %s9768_s5 }
  0x4b   :  { %p8834_p6 = pnand %p8832_p5, %p8829_p4 }
  0x4d   :  { %8837 = shalt.err (!%p8834_p6)
}
  0x4e   :  { %s8838_s3 = scalar_lea.vmem %s69_s28, 16384  ;;  %p8843_p8 = scmp.lt.s32.totalorder %s69_s28, %s69_s28 }
  0x4f   :  { %p8839_p7 = scmp.ne.s32.totalorder %s69_s28, %s8838_s3  ;;  %p8844_p9 = scmp.lt.s32.totalorder %s8838_s3, %s8838_s3 }
  0x51   :  { %p8845_p10 = por %p8844_p9, %p8843_p8 }
  0x53   :  { %p8846_p11 = pnand %p8845_p10, %p8839_p7 }
  0x55   :  { %8849 = shalt.err (!%p8846_p11)
}
  0x56   :  { %74 = dma.hbm_to_vmem [thread:$0]  %s9768_s5, 16384, %s69_s28, [#allocation9], %s8910_s0, %s8910_s0, %s8911_s23  }
  0x57   :  { %s8850_s17 = scalar_lea.hbm %s9769_s6, 1536 }
  0x58   :  { %p8851_p12 = scmp.ne.s32.totalorder %s9769_s6, %s8850_s17  ;;  %p8854_p13 = scmp.lt.u32.totalorder %s8850_s17, %s9769_s6 }
  0x5a   :  { %p8856_p0 = pnand %p8854_p13, %p8851_p12 }
  0x5c   :  { %8859 = shalt.err (!%p8856_p0)
}
  0x5d   :  { %s8860_s22 = scalar_lea.vmem %s9026_s8, 1536  ;;  %p8865_p2 = scmp.lt.s32.totalorder %s9026_s8, %s9026_s8 }
  0x5e   :  { %p8861_p1 = scmp.ne.s32.totalorder %s9026_s8, %s8860_s22  ;;  %p8866_p3 = scmp.lt.s32.totalorder %s8860_s22, %s8860_s22 }
  0x60   :  { %p8867_p4 = por %p8866_p3, %p8865_p2 }
  0x62   :  { %p8868_p5 = pnand %p8867_p4, %p8861_p1 }
  0x64   :  { %8871 = shalt.err (!%p8868_p5)
}
  0x65   :  { %s8914_s5 = smov 512   ;;  %s8915_s1 = smov 32  }
  0x66   :  { %86 = dma.hbm_to_vmem [thread:$0]  %s9769_s6, 1536, %s9026_s8, [#allocation12], %s8914_s5, %s8914_s5, %s8915_s1  }
  0x67   :  { %8894 = dma.done.wait [#allocation3], 32  }
  0x68   :  { %8895 = vsyncadd [#allocation3], 4294967264 }
  0x69   :  { %8896 = dma.done.wait [#allocation6], 4640  }
  0x6a   :  { %8897 = vsyncadd [#allocation6], 4294962656 }
  0x6b   :  { %8898 = dma.done.wait [#allocation9], 71680  }
  0x6c   :  { %8899 = vsyncadd [#allocation9], 4294895616 }
  0x6d   :  { %8900 = dma.done.wait [#allocation12], 1536  }
  0x6e   :  { %8901 = vsyncadd [#allocation12], 4294965760  ;;  %v107_v0 = vlaneseq  ;;  %v8916_v1 = vmov 0.0   ;;  %v106_v5 = vld [vmem:[#allocation2] sm:$0x3]  ;;  %v130_v6 = vld [vmem:[#allocation7 + $0x8] sm:$0xff] }
  0x6f   :  { %225 = vmatprep.mubr.f32.mxu0 %v8916_v1  ;;  %v132_v7 = vld [vmem:[#allocation7 + $0x18] sm:$0xff]  ;;  %v129_v10 = vld [vmem:[#allocation7] sm:$0xff]  ;;  %v131_v11 = vld [vmem:[#allocation7 + $0x10] sm:$0xff]  ;;  %vm8918_vm2 = vmmov 0   ;;  %vm1102_vm3 = vcmask 523264   ;;  %vm1223_vm4 = vcmask 1043456  }
  0x70   :  { %v9059_v2 = vshrl.u32 %v107_v0, 7  ;;  %v7734_v9 = vpack.c.bf16 %v132_v7, %v130_v6  ;;  %v134_v12 = vld [vmem:[#allocation7 + $0x28] sm:$0xff]  ;;  %v7736_v13 = vpack.c.bf16 %v131_v11, %v129_v10  ;;  %v136_v14 = vld [vmem:[#allocation7 + $0x38] sm:$0xff]  ;;  %v133_v15 = vld [vmem:[#allocation7 + $0x20] sm:$0xff]  ;;  %vm1195_vm6 = vcmask 64512   ;;  %s8923_s25 = smov [#allocation13]  }
  0x71   :  { %v135_v16 = vld [vmem:[#allocation7 + $0x30] sm:$0xff]  ;;  %v7738_v18 = vpack.c.bf16 %v136_v14, %v134_v12  ;;  %v138_v19 = vld [vmem:[#allocation7 + $0x48] sm:$0xff]  ;;  %v140_v20 = vld [vmem:[#allocation7 + $0x58] sm:$0xff]  ;;  %vm6458_vm8 = vcmask 1041409   ;;  %s6847_s26 = sshll.u32 %s8923_s25, 4  ;;  %s6848_s26 = int_to_ptr.vmem [resolvable:$true] %s6847_s26 }
  0x72   :  { %v9062_v3 = vsub.s32 0, %v9059_v2  ;;  %v9065_v4 = vsub.s32 1, %v9059_v2  ;;  %7735 = vmatprep.subr.bf16.mxu0 %v7734_v9  ;;  %v7740_v21 = vpack.c.bf16 %v135_v16, %v133_v15  ;;  %v7742_v22 = vpack.c.bf16 %v140_v20, %v138_v19  ;;  %v137_v23 = vld [vmem:[#allocation7 + $0x40] sm:$0xff]  ;;  %v139_v24 = vld [vmem:[#allocation7 + $0x50] sm:$0xff]  ;;  %v142_v25 = vld [vmem:[#allocation7 + $0x68] sm:$0xff]  ;;  %s8872_s28 = scalar_lea.vmem %s6848_s26, 32  ;;  %p8877_p7 = scmp.lt.s32.totalorder %s6848_s26, %s6848_s26 }
  0x73   :  { %7737 = vmatpush1.bf16.msra.mxu0 %v7736_v13  ;;  %v144_v26 = vld [vmem:[#allocation7 + $0x78] sm:$0xff]  ;;  %v7744_v27 = vpack.c.bf16 %v139_v24, %v137_v23  ;;  %v141_v29 = vld [vmem:[#allocation7 + $0x60] sm:$0xff]  ;;  %v143_v30 = vld [vmem:[#allocation7 + $0x70] sm:$0xff]  ;;  %p8873_p6 = scmp.ne.s32.totalorder %s6848_s26, %s8872_s28  ;;  %p8878_p8 = scmp.lt.s32.totalorder %s8872_s28, %s8872_s28 }
  0x74   :  { %v110_v8 = vrot.slane %v106_v5, %v9062_v3  ;;  %v117_v17 = vrot.slane %v106_v5, %v9065_v4  ;;  %7739 = vmatprep.subr.bf16.mxu0 %v7738_v18  ;;  %v7746_v28 = vpack.c.bf16 %v144_v26, %v142_v25  ;;  %v146_v31 = vld [vmem:[#allocation7 + $0x88] sm:$0xff]  ;;  %v148_v32 = vld [vmem:[#allocation7 + $0x98] sm:$0xff]  ;;  %v145_v33 = vld [vmem:[#allocation7 + $0x80] sm:$0xff]  ;;  %v7748_v36 = vpack.c.bf16 %v143_v30, %v141_v29 }
  0x75   :  { %v147_v34 = vld [vmem:[#allocation7 + $0x90] sm:$0xff]  ;;  %v238_v35 = vld [vmem:[#allocation5] sm:$0x3]  ;;  %v7826_v39 = vld [vmem:[#allocation8] ss:$108 sps:$4 sm:$0xff]   ;;  %v7750_v40 = vpack.c.bf16 %v148_v32, %v146_v31  ;;  %p8879_p9 = por %p8878_p8, %p8877_p7 }
  0x76   :  { %112 = vbcast.lane.b32.xlu0 %v110_v8, 256  ;;  %v239_v37 = vcvt.s32.f32 %v238_v35  ;;  %v7824_v38 = vld [vmem:[#allocation8 + $0x4] ss:$108 sps:$4 sm:$0xff]   ;;  %v150_v41 = vld [vmem:[#allocation7 + $0xa8] sm:$0xff]  ;;  %v152_v42 = vld [vmem:[#allocation7 + $0xb8] sm:$0xff]  ;;  %v7752_v46 = vpack.c.bf16 %v147_v34, %v145_v33  ;;  %v8917_v33 = vmov 1.0  }
  0x77   :  { %7741 = vmatpush1.bf16.msra.mxu0 %v7740_v21  ;;  %551 = vmatprep.subr.bf16.mxu1 %v7824_v38  ;;  %v7830_v44 = vld [vmem:[#allocation8 + $0xdc] ss:$108 sps:$4 sm:$0xff]   ;;  %v7832_v45 = vld [vmem:[#allocation8 + $0xd8] ss:$108 sps:$4 sm:$0xff]   ;;  %v151_v48 = vld [vmem:[#allocation7 + $0xb0] sm:$0xff]  ;;  %v7754_v50 = vpack.c.bf16 %v152_v42, %v150_v41  ;;  %p8880_p10 = pnand %p8879_p9, %p8873_p6 }
  0x78   :  { %7743 = vmatprep.subr.bf16.mxu0 %v7742_v22  ;;  %v243_v43 = vrot.slane %v239_v37, %v9062_v3  ;;  %552 = vmatpush1.bf16.msra.mxu1 %v7826_v39  ;;  %v149_v47 = vld [vmem:[#allocation7 + $0xa0] sm:$0xff]  ;;  %v250_v49 = vrot.slane %v239_v37, %v9065_v4  ;;  %v154_v51 = vld [vmem:[#allocation7 + $0xc8] sm:$0xff]  ;;  %v156_v53 = vld [vmem:[#allocation7 + $0xd8] sm:$0xff] }
  0x79   :  { %553 = vmatprep.subr.bf16.mxu1 %v7830_v44  ;;  %v7836_v52 = vld [vmem:[#allocation8 + $0x1b4] ss:$108 sps:$4 sm:$0xff]   ;;  %v7838_v54 = vld [vmem:[#allocation8 + $0x1b0] ss:$108 sps:$4 sm:$0xff]   ;;  %v7756_v55 = vpack.c.bf16 %v151_v48, %v149_v47  ;;  %v7842_v57 = vld [vmem:[#allocation8 + $0x28c] ss:$108 sps:$4 sm:$0xff]   ;;  %v7758_v58 = vpack.c.bf16 %v156_v53, %v154_v51 }
  0x7a   :  { %119 = vbcast.lane.b32.xlu0 %v117_v17, 256  ;;  %245 = vbcast.lane.b32.xlu1 %v243_v43, 256  ;;  %v153_v56 = vld [vmem:[#allocation7 + $0xc0] sm:$0xff]  ;;  %v155_v59 = vld [vmem:[#allocation7 + $0xd0] sm:$0xff]  ;;  %v158_v60 = vld [vmem:[#allocation7 + $0xe8] sm:$0xff] }
  0x7b   :  { %7745 = vmatpush1.bf16.msra.mxu0 %v7744_v27  ;;  %v160_v61 = vld [vmem:[#allocation7 + $0xf8] sm:$0xff]  ;;  %v7844_v62 = vld [vmem:[#allocation8 + $0x288] ss:$108 sps:$4 sm:$0xff]   ;;  %v7760_v63 = vpack.c.bf16 %v155_v59, %v153_v56  ;;  %v7848_v5 = vld [vmem:[#allocation8 + $0x364] ss:$108 sps:$4 sm:$0xff]  }
  0x7c   :  { %7747 = vmatprep.subr.bf16.mxu0 %v7746_v28  ;;  %554 = vmatpush1.bf16.msra.mxu1 %v7832_v45  ;;  %v7762_v6 = vpack.c.bf16 %v160_v61, %v158_v60  ;;  %v157_v7 = vld [vmem:[#allocation7 + $0xe0] sm:$0xff]  ;;  %v159_v8 = vld [vmem:[#allocation7 + $0xf0] sm:$0xff]  ;;  %v7854_v11 = vld [vmem:[#allocation8 + $0x43c] ss:$108 sps:$4 sm:$0xff]   ;;  %v9072_v28 = vand.u32 127, %v107_v0 }
  0x7d   :  { %555 = vmatprep.subr.bf16.mxu1 %v7836_v52  ;;  %v7850_v9 = vld [vmem:[#allocation8 + $0x360] ss:$108 sps:$4 sm:$0xff]   ;;  %v7764_v10 = vpack.c.bf16 %v159_v8, %v157_v7  ;;  %v7856_v13 = vld [vmem:[#allocation8 + $0x438] ss:$108 sps:$4 sm:$0xff]   ;;  %v7862_v15 = vld [vmem:[#allocation8 + $0x510] ss:$108 sps:$4 sm:$0xff]  }
  0x7e   :  { %252 = vbcast.lane.b32.xlu1 %v250_v49, 256  ;;  %v7829_v12 = vld [vmem:[#allocation8 + $0xc] ss:$108 sps:$4 sm:$0xff]   ;;  %v7860_v14 = vld [vmem:[#allocation8 + $0x514] ss:$108 sps:$4 sm:$0xff]  }
  0x7f   :  { %7749 = vmatpush1.bf16.msra.mxu0 %v7748_v36  ;;  %v7866_v16 = vld [vmem:[#allocation8 + $0x5ec] ss:$108 sps:$4 sm:$0xff]   ;;  %v7868_v17 = vld [vmem:[#allocation8 + $0x5e8] ss:$108 sps:$4 sm:$0xff]   ;;  %v7872_v18 = vld [vmem:[#allocation8 + $0x6c4] ss:$108 sps:$4 sm:$0xff]  }
  0x80   :  { %7751 = vmatprep.subr.bf16.mxu0 %v7750_v40  ;;  %556 = vmatpush1.bf16.msra.mxu1 %v7838_v54  ;;  %v7874_v19 = vld [vmem:[#allocation8 + $0x6c0] ss:$108 sps:$4 sm:$0xff]   ;;  %v7878_v20 = vld [vmem:[#allocation8 + $0x79c] ss:$108 sps:$4 sm:$0xff]   ;;  %v7880_v21 = vld [vmem:[#allocation8 + $0x798] ss:$108 sps:$4 sm:$0xff]  }
  0x81   :  { %557 = vmatprep.subr.bf16.mxu1 %v7842_v57  ;;  %v7884_v22 = vld [vmem:[#allocation8 + $0x874] ss:$108 sps:$4 sm:$0xff]   ;;  %v7886_v23 = vld [vmem:[#allocation8 + $0x870] ss:$108 sps:$4 sm:$0xff]   ;;  %v7890_v24 = vld [vmem:[#allocation8 + $0x94c] ss:$108 sps:$4 sm:$0xff]  }
  0x82   :  { %v7892_v25 = vld [vmem:[#allocation8 + $0x948] ss:$108 sps:$4 sm:$0xff]   ;;  %v7896_v26 = vld [vmem:[#allocation8 + $0xa24] ss:$108 sps:$4 sm:$0xff]   ;;  %v7898_v27 = vld [vmem:[#allocation8 + $0xa20] ss:$108 sps:$4 sm:$0xff]  }
  0x83   :  { %7753 = vmatpush1.bf16.msra.mxu0 %v7752_v46  ;;  %v7827_v29 = vld [vmem:[#allocation8 + $0x8] ss:$108 sps:$4 sm:$0xff]   ;;  %v7835_v30 = vld [vmem:[#allocation8 + $0xe4] ss:$108 sps:$4 sm:$0xff]   ;;  %v7833_v32 = vld [vmem:[#allocation8 + $0xe0] ss:$108 sps:$4 sm:$0xff]  }
  0x84   :  { %7755 = vmatprep.subr.bf16.mxu0 %v7754_v50  ;;  %558 = vmatpush1.bf16.msra.mxu1 %v7844_v62  ;;  %v7841_v34 = vld [vmem:[#allocation8 + $0x1bc] ss:$108 sps:$4 sm:$0xff]   ;;  %v7839_v36 = vld [vmem:[#allocation8 + $0x1b8] ss:$108 sps:$4 sm:$0xff]   ;;  %v7847_v0 = vld [vmem:[#allocation8 + $0x294] ss:$108 sps:$4 sm:$0xff]  }
  0x85   :  { %559 = vmatprep.subr.bf16.mxu1 %v7848_v5  ;;  %v7845_v37 = vld [vmem:[#allocation8 + $0x290] ss:$108 sps:$4 sm:$0xff]   ;;  %v7853_v38 = vld [vmem:[#allocation8 + $0x36c] ss:$108 sps:$4 sm:$0xff]   ;;  %v7851_v39 = vld [vmem:[#allocation8 + $0x368] ss:$108 sps:$4 sm:$0xff]  }
  0x86   :  { %v7859_v40 = vld [vmem:[#allocation8 + $0x444] ss:$108 sps:$4 sm:$0xff]   ;;  %v7857_v41 = vld [vmem:[#allocation8 + $0x440] ss:$108 sps:$4 sm:$0xff]   ;;  %v7865_v42 = vld [vmem:[#allocation8 + $0x51c] ss:$108 sps:$4 sm:$0xff]  }
  0x87   :  { %7757 = vmatpush1.bf16.msra.mxu0 %v7756_v55  ;;  %v7863_v43 = vld [vmem:[#allocation8 + $0x518] ss:$108 sps:$4 sm:$0xff]   ;;  %v7871_v44 = vld [vmem:[#allocation8 + $0x5f4] ss:$108 sps:$4 sm:$0xff]   ;;  %v7869_v45 = vld [vmem:[#allocation8 + $0x5f0] ss:$108 sps:$4 sm:$0xff]  }
  0x88   :  { %7759 = vmatprep.subr.bf16.mxu0 %v7758_v58  ;;  %560 = vmatpush1.bf16.msra.mxu1 %v7850_v9  ;;  %v7877_v46 = vld [vmem:[#allocation8 + $0x6cc] ss:$108 sps:$4 sm:$0xff]   ;;  %v7875_v47 = vld [vmem:[#allocation8 + $0x6c8] ss:$108 sps:$4 sm:$0xff]   ;;  %v7883_v48 = vld [vmem:[#allocation8 + $0x7a4] ss:$108 sps:$4 sm:$0xff]  }
  0x89   :  { %561 = vmatprep.subr.bf16.mxu1 %v7854_v11  ;;  %v7881_v49 = vld [vmem:[#allocation8 + $0x7a0] ss:$108 sps:$4 sm:$0xff]   ;;  %v7889_v50 = vld [vmem:[#allocation8 + $0x87c] ss:$108 sps:$4 sm:$0xff]   ;;  %v7887_v51 = vld [vmem:[#allocation8 + $0x878] ss:$108 sps:$4 sm:$0xff]  }
  0x8a   :  { %v7895_v52 = vld [vmem:[#allocation8 + $0x954] ss:$108 sps:$4 sm:$0xff]   ;;  %v7893_v53 = vld [vmem:[#allocation8 + $0x950] ss:$108 sps:$4 sm:$0xff]   ;;  %v7901_v54 = vld [vmem:[#allocation8 + $0xa2c] ss:$108 sps:$4 sm:$0xff]  }
  0x8b   :  { %7761 = vmatpush1.bf16.msra.mxu0 %v7760_v63  ;;  %v7899_v55 = vld [vmem:[#allocation8 + $0xa28] ss:$108 sps:$4 sm:$0xff]   ;;  %v7904_v57 = vld [vmem:[#allocation8 + $0xaf8] ss:$108 sps:$4 sm:$0xff]   ;;  %v7905_v59 = vld [vmem:[#allocation8 + $0xb00] ss:$108 sps:$4 sm:$0xff]  }
  0x8c   :  { %7763 = vmatprep.subr.bf16.mxu0 %v7762_v6  ;;  %562 = vmatpush1.bf16.msra.mxu1 %v7856_v13  ;;  %v7902_v56 = vld [vmem:[#allocation8 + $0xafc] ss:$108 sps:$4 sm:$0xff]   ;;  %v7907_v58 = vld [vmem:[#allocation8 + $0xb04] ss:$108 sps:$4 sm:$0xff]   ;;  %v7908_v60 = vld [vmem:[#allocation8 + $0xbd4] ss:$108 sps:$4 sm:$0xff]  }
  0x8d   :  { %563 = vmatprep.subr.bf16.mxu1 %v7860_v14  ;;  %v7910_v61 = vld [vmem:[#allocation8 + $0xbd0] ss:$108 sps:$4 sm:$0xff]   ;;  %v7911_v63 = vld [vmem:[#allocation8 + $0xbd8] ss:$108 sps:$4 sm:$0xff]   ;;  %v7916_v6 = vld [vmem:[#allocation8 + $0xca8] ss:$108 sps:$4 sm:$0xff]  }
  0x8e   :  { %v7913_v62 = vld [vmem:[#allocation8 + $0xbdc] ss:$108 sps:$4 sm:$0xff]   ;;  %v7914_v5 = vld [vmem:[#allocation8 + $0xcac] ss:$108 sps:$4 sm:$0xff]   ;;  %v7919_v7 = vld [vmem:[#allocation8 + $0xcb4] ss:$108 sps:$4 sm:$0xff]  }
  0x8f   :  { %7765 = vmatpush1.bf16.msra.mxu0 %v7764_v10  ;;  %v7917_v8 = vld [vmem:[#allocation8 + $0xcb0] ss:$108 sps:$4 sm:$0xff]   ;;  %v7922_v9 = vld [vmem:[#allocation8 + $0x14] ss:$108 sps:$4 sm:$0xff]  }
  0x90   :  { %799 = vmatprep.subr.bf16.mxu0 %v7829_v12  ;;  %564 = vmatpush1.bf16.msra.mxu1 %v7862_v15  ;;  %v257_v11 = vld [vmem:[#allocation7 + $0x101] ss:$8 sm:$0x3]  ;;  %v255_v13 = vld [vmem:[#allocation7 + $0x100] ss:$8 sm:$0x3] }
  0x91   :  { %565 = vmatprep.subr.bf16.mxu1 %v7866_v16  ;;  %v268_v12 = vrot.slane %v257_v11, %v9065_v4  ;;  %v264_v14 = vrot.slane %v257_v11, %v9062_v3  ;;  %v7953_v11 = vld [vmem:[#allocation8 + $0x958] ss:$108 sps:$4 sm:$0xff]  }
  0x94   :  { %566 = vmatpush1.bf16.msra.mxu1 %v7868_v17 }
  0x95   :  { %567 = vmatprep.subr.bf16.mxu1 %v7872_v18  ;;  %v289_v18 = vrot.slane %v255_v13, %v9065_v4 }
  0x98   :  { %568 = vmatpush1.bf16.msra.mxu1 %v7874_v19 }
  0x99   :  { %569 = vmatprep.subr.bf16.mxu1 %v7878_v20  ;;  %v285_v20 = vrot.slane %v255_v13, %v9062_v3  ;;  %v7956_v13 = vld [vmem:[#allocation8 + $0xa30] ss:$108 sps:$4 sm:$0xff]  }
  0x9c   :  { %570 = vmatpush1.bf16.msra.mxu1 %v7880_v21 }
  0x9d   :  { %571 = vmatprep.subr.bf16.mxu1 %v7884_v22 }
  0xa0   :  { %572 = vmatpush1.bf16.msra.mxu1 %v7886_v23 }
  0xa1   :  { %573 = vmatprep.subr.bf16.mxu1 %v7890_v24 }
  0xa4   :  { %574 = vmatpush1.bf16.msra.mxu1 %v7892_v25 }
  0xa5   :  { %575 = vmatprep.subr.bf16.mxu1 %v7896_v26 }
  0xa8   :  { %576 = vmatpush1.bf16.msra.mxu1 %v7898_v27 }
  0xa9   :  { %577 = vmatprep.subr.bf16.mxu1 %v7902_v56  ;;  %v7932_v56 = vld [vmem:[#allocation8 + $0x370] ss:$108 sps:$4 sm:$0xff]  }
  0xac   :  { %578 = vmatpush1.bf16.msra.mxu1 %v7904_v57  ;;  %v7937_v57 = vld [vmem:[#allocation8 + $0x44c] ss:$108 sps:$4 sm:$0xff]  }
  0xad   :  { %579 = vmatprep.subr.bf16.mxu1 %v7908_v60  ;;  %v7938_v60 = vld [vmem:[#allocation8 + $0x520] ss:$108 sps:$4 sm:$0xff]  }
  0xb0   :  { %580 = vmatpush1.bf16.msra.mxu1 %v7910_v61  ;;  %v7943_v61 = vld [vmem:[#allocation8 + $0x5fc] ss:$108 sps:$4 sm:$0xff]  }
  0xb1   :  { %581 = vmatprep.subr.bf16.mxu1 %v7914_v5  ;;  %v7944_v5 = vld [vmem:[#allocation8 + $0x6d0] ss:$108 sps:$4 sm:$0xff]  }
  0xb4   :  { %582 = vmatpush1.bf16.msra.mxu1 %v7916_v6  ;;  %v7949_v6 = vld [vmem:[#allocation8 + $0x7ac] ss:$108 sps:$4 sm:$0xff]  }
  0xb5   :  { %1047 = vmatprep.subr.bf16.mxu1 %v7922_v9  ;;  %v7950_v9 = vld [vmem:[#allocation8 + $0x880] ss:$108 sps:$4 sm:$0xff]  }
  0xe8   :  { %v113_v31 = vpop.permute.xlu0 %112 }
  0xe9   :  { %vm123_vm0 = vcmp.eq.s32.totalorder %v113_v31, %v9072_v28 }
  0xea   :  { %6861 = vmatmul.mubr.msk.f32.vlgmr.msra.gmra.mrb[0].mxu0 %vm123_vm0, %v8917_v33 }
  0xeb   :  { %231 = vmatprep.mubr.f32.mxu0 %v8916_v1  ;;  %800 = vmatpush1.bf16.msra.mxu0 %v7827_v29 }
  0xec   :  { %v120_v35 = vpop.permute.xlu0 %119  ;;  %801 = vmatprep.subr.bf16.mxu0 %v7835_v30  ;;  %v246_v10 = vpop.permute.xlu1 %245 }
  0xed   :  { %vm124_vm1 = vcmp.eq.s32.totalorder %v120_v35, %v9072_v28  ;;  %v279_v16 = vsub.f32 1.0, %v246_v10  ;;  %v272_v17 = vmul.f32 %v268_v12, %v246_v10  ;;  %v271_v19 = vmul.f32 %v264_v14, %v246_v10  ;;  %v7955_v10 = vld [vmem:[#allocation8 + $0x95c] ss:$108 sps:$4 sm:$0xff]  }
  0xee   :  { %6862 = vmatmul.mubr.msk.f32.gmra.mrb[2].mxu0 %vm124_vm1, %v8917_v33 }
  0xef   :  { %802 = vmatpush1.bf16.msra.mxu0 %v7833_v32  ;;  %v293_v26 = vmul.f32 %v289_v18, %v279_v16  ;;  %v292_v30 = vmul.f32 %v285_v20, %v279_v16  ;;  %v7964_v16 = vld [vmem:[#allocation8 + $0xbe4] ss:$108 sps:$4 sm:$0xff]  }
  0xf0   :  { %803 = vmatprep.subr.bf16.mxu0 %v7841_v34  ;;  %v253_v15 = vpop.permute.xlu1 %252 }
  0xf1   :  { %v280_v21 = vsub.f32 1.0, %v253_v15  ;;  %v273_v24 = vmul.f32 %v264_v14, %v253_v15  ;;  %v274_v27 = vmul.f32 %v268_v12, %v253_v15  ;;  %v7958_v12 = vld [vmem:[#allocation8 + $0xa34] ss:$108 sps:$4 sm:$0xff]   ;;  %v7961_v14 = vld [vmem:[#allocation8 + $0xb0c] ss:$108 sps:$4 sm:$0xff]  }
  0xf2   :  { %v7959_v15 = vld [vmem:[#allocation8 + $0xb08] ss:$108 sps:$4 sm:$0xff]  }
  0xf3   :  { %804 = vmatpush1.bf16.msra.mxu0 %v7839_v36  ;;  %v294_v31 = vmul.f32 %v285_v20, %v280_v21  ;;  %v295_v33 = vmul.f32 %v289_v18, %v280_v21  ;;  %v7967_v18 = vld [vmem:[#allocation8 + $0xcbc] ss:$108 sps:$4 sm:$0xff]   ;;  %v8919_v20 = vmov 0   ;;  %v8920_v21 = vmov 1966171168  }
  0xf4   :  { %805 = vmatprep.subr.bf16.mxu0 %v7847_v0  ;;  %7802 = vset.pattern.permute.xlu0 %v8919_v20 }
  0xf5   :  { %7803 = vset.pattern.permute.xlu1 %v8919_v20 }
  0xf7   :  { %806 = vmatpush1.bf16.msra.mxu0 %v7845_v37 }
  0xf8   :  { %807 = vmatprep.subr.bf16.mxu0 %v7853_v38  ;;  %v259_v38 = vld [vmem:[#allocation7 + $0x118] sm:$0xff] }
  0xfb   :  { %808 = vmatpush1.bf16.msra.mxu0 %v7851_v39 }
  0xfc   :  { %809 = vmatprep.subr.bf16.mxu0 %v7859_v40  ;;  %v258_v40 = vld [vmem:[#allocation7 + $0x110] sm:$0xff] }
  0xff   :  { %810 = vmatpush1.bf16.msra.mxu0 %v7857_v41 }
 0x100   :  { %811 = vmatprep.subr.bf16.mxu0 %v7865_v42 }
 0x103   :  { %812 = vmatpush1.bf16.msra.mxu0 %v7863_v43 }
 0x104   :  { %813 = vmatprep.subr.bf16.mxu0 %v7871_v44 }
 0x107   :  { %814 = vmatpush1.bf16.msra.mxu0 %v7869_v45 }
 0x108   :  { %815 = vmatprep.subr.bf16.mxu0 %v7877_v46 }
 0x10b   :  { %816 = vmatpush1.bf16.msra.mxu0 %v7875_v47  ;;  %v7920_v47 = vld [vmem:[#allocation8 + $0x10] ss:$108 sps:$4 sm:$0xff]  }
 0x10c   :  { %817 = vmatprep.subr.bf16.mxu0 %v7883_v48 }
 0x10f   :  { %818 = vmatpush1.bf16.msra.mxu0 %v7881_v49  ;;  %v7925_v49 = vld [vmem:[#allocation8 + $0xec] ss:$108 sps:$4 sm:$0xff]  }
 0x110   :  { %819 = vmatprep.subr.bf16.mxu0 %v7889_v50  ;;  %v7923_v50 = vld [vmem:[#allocation8 + $0xe8] ss:$108 sps:$4 sm:$0xff]  }
 0x113   :  { %820 = vmatpush1.bf16.msra.mxu0 %v7887_v51  ;;  %v7928_v51 = vld [vmem:[#allocation8 + $0x1c4] ss:$108 sps:$4 sm:$0xff]  }
 0x114   :  { %821 = vmatprep.subr.bf16.mxu0 %v7895_v52  ;;  %v7926_v52 = vld [vmem:[#allocation8 + $0x1c0] ss:$108 sps:$4 sm:$0xff]  }
 0x117   :  { %822 = vmatpush1.bf16.msra.mxu0 %v7893_v53  ;;  %v7931_v53 = vld [vmem:[#allocation8 + $0x29c] ss:$108 sps:$4 sm:$0xff]  }
 0x118   :  { %823 = vmatprep.subr.bf16.mxu0 %v7901_v54  ;;  %v7929_v54 = vld [vmem:[#allocation8 + $0x298] ss:$108 sps:$4 sm:$0xff]  }
 0x11b   :  { %824 = vmatpush1.bf16.msra.mxu0 %v7899_v55  ;;  %v7934_v55 = vld [vmem:[#allocation8 + $0x374] ss:$108 sps:$4 sm:$0xff]  }
 0x11c   :  { %825 = vmatprep.subr.bf16.mxu0 %v7907_v58  ;;  %v7935_v58 = vld [vmem:[#allocation8 + $0x448] ss:$108 sps:$4 sm:$0xff]  }
 0x11f   :  { %826 = vmatpush1.bf16.msra.mxu0 %v7905_v59  ;;  %v7940_v59 = vld [vmem:[#allocation8 + $0x524] ss:$108 sps:$4 sm:$0xff]  }
 0x120   :  { %827 = vmatprep.subr.bf16.mxu0 %v7913_v62  ;;  %v7941_v62 = vld [vmem:[#allocation8 + $0x5f8] ss:$108 sps:$4 sm:$0xff]  }
 0x123   :  { %828 = vmatpush1.bf16.msra.mxu0 %v7911_v63  ;;  %v7946_v63 = vld [vmem:[#allocation8 + $0x6d4] ss:$108 sps:$4 sm:$0xff]  }
 0x124   :  { %829 = vmatprep.subr.bf16.mxu0 %v7919_v7  ;;  %v7947_v7 = vld [vmem:[#allocation8 + $0x7a8] ss:$108 sps:$4 sm:$0xff]  }
 0x127   :  { %830 = vmatpush1.bf16.msra.mxu0 %v7917_v8  ;;  %v7952_v8 = vld [vmem:[#allocation8 + $0x884] ss:$108 sps:$4 sm:$0xff]  }
 0x128   :  { %7554 = vmatprep.subr.bf16.mxu0 %v8916_v1 }
 0x1bd   :  { %v227_v22 = vpop.f32.mrb[0].mxu0 }
 0x1be   :  { %v229_v23 = vpop.f32.mrb[1].mxu0  ;;  %v275_v29 = vadd.f32 %v271_v19, %v227_v22  ;;  %v7965_v19 = vld [vmem:[#allocation8 + $0xcb8] ss:$108 sps:$4 sm:$0xff]   ;;  %v314_v22 = vunpack.c.l.s4 %v8920_v21 }
 0x1bf   :  { %v276_v25 = vadd.f32 %v272_v17, %v229_v23  ;;  %v7962_v17 = vld [vmem:[#allocation8 + $0xbe0] ss:$108 sps:$4 sm:$0xff]   ;;  %v6863_v23 = vld.sshfl [vmem:[%s9765_s2] sm:$0x11 pattern:$0x75316420] }
 0x1c0   :  { %v296_v37 = vadd.f32 %v292_v30, %v275_v29  ;;  %v627_v30 = vld [vmem:[#allocation11 + $0x1] ss:$8 sm:$0x3]  ;;  %s8922_s2 = smov 64  }
 0x1c1   :  { %v233_v32 = vpop.f32.mrb[2].mxu0  ;;  %v297_v36 = vadd.f32 %v293_v26, %v276_v25  ;;  %v312_v25 = vcombine.high %v6863_v23, %v6863_v23 }
 0x1c2   :  { %v277_v34 = vadd.f32 %v273_v24, %v233_v32  ;;  %v235_v35 = vpop.f32.mrb[3].mxu0  ;;  %v9088_v45 = vadd.f32 %v296_v37, %v258_v40  ;;  %v315_v24 = vunpack.c.0.s8 %v314_v22  ;;  %v636_v32 = vrot.slane %v627_v30, %v9065_v4 }
 0x1c3   :  { %v278_v0 = vadd.f32 %v274_v27, %v235_v35  ;;  %v9084_v43 = vadd.f32 %v297_v36, %v259_v38 }
 0x1c4   :  { %v298_v39 = vadd.f32 %v294_v31, %v277_v34  ;;  %v318_v26 = vsub.s32 %v315_v24, %v9059_v2  ;;  %v632_v31 = vrot.slane %v627_v30, %v9062_v3 }
 0x1c5   :  { %v299_v41 = vadd.f32 %v295_v33, %v278_v0  ;;  %v9110_v33 = vld [vmem:[#allocation11] ss:$8 sm:$0x3] }
 0x1c6   :  { %v9082_v42 = vadd.f32 %v298_v39, %v258_v40  ;;  %v319_v27 = vrot.slane %v6863_v23, %v318_v26  ;;  %v326_v29 = vrot.slane %v312_v25, %v318_v26 }
 0x1c7   :  { %v9086_v44 = vadd.f32 %v299_v41, %v259_v38  ;;  %v384_v41 = vrot.slane %v9110_v33, %v9062_v3 }
 0x1c8   :  { %v9094_v48 = vpack.c.bf16 %v9082_v42, %v9088_v45  ;;  %328 = vperm.xlu0 %7802, %v319_v27   ;;  %335 = vperm.xlu1 %7803, %v326_v29  }
 0x1c9   :  { %v346_v46 = vpack.c.bf16 %v9086_v44, %v9084_v43 }
 0x1cb   :  { %583 = vmatprep.mubr.bf16.mxu1 %v346_v46  ;;  %831 = vmatprep.mubr.bf16.mxu0 %v346_v46 }
 0x1cc   :  { %584 = vmatmul.mubr.bf16.vlgmr.msra.gmra.mrb[0].mxu1 %v9094_v48  ;;  %832 = vmatmul.mubr.bf16.vlgmr.msra.gmra.mrb[4].mxu0 %v9094_v48 }
 0x1cd   :  { %1048 = vmatpush1.bf16.msra.mxu1 %v7920_v47  ;;  %1079 = vmatprep.mubr.bf16.mxu1 %v346_v46 }
 0x1ce   :  { %1049 = vmatprep.subr.bf16.mxu1 %v7925_v49  ;;  %7556 = vmatprep.mubr.msk.bf16.mxu0 %vm8918_vm2, %v8916_v1 }
 0x1d1   :  { %1050 = vmatpush1.bf16.msra.mxu1 %v7923_v50 }
 0x1d2   :  { %1051 = vmatprep.subr.bf16.mxu1 %v7928_v51 }
 0x1d5   :  { %1052 = vmatpush1.bf16.msra.mxu1 %v7926_v52 }
 0x1d6   :  { %1053 = vmatprep.subr.bf16.mxu1 %v7931_v53 }
 0x1d9   :  { %1054 = vmatpush1.bf16.msra.mxu1 %v7929_v54 }
 0x1da   :  { %1055 = vmatprep.subr.bf16.mxu1 %v7934_v55 }
 0x1dd   :  { %1056 = vmatpush1.bf16.msra.mxu1 %v7932_v56 }
 0x1de   :  { %1057 = vmatprep.subr.bf16.mxu1 %v7937_v57 }
 0x1e1   :  { %1058 = vmatpush1.bf16.msra.mxu1 %v7935_v58  ;;  %v875_v58 = vld [vmem:[#allocation11 + $0x2] ss:$8 sm:$0x3] }
 0x1e2   :  { %1059 = vmatprep.subr.bf16.mxu1 %v7940_v59  ;;  %v880_v59 = vrot.slane %v875_v58, %v9062_v3 }
 0x1e5   :  { %1060 = vmatpush1.bf16.msra.mxu1 %v7938_v60  ;;  %v884_v60 = vrot.slane %v875_v58, %v9065_v4 }
 0x1e6   :  { %1061 = vmatprep.subr.bf16.mxu1 %v7943_v61 }
 0x1e9   :  { %1062 = vmatpush1.bf16.msra.mxu1 %v7941_v62 }
 0x1ea   :  { %1063 = vmatprep.subr.bf16.mxu1 %v7946_v63 }
 0x1ed   :  { %1064 = vmatpush1.bf16.msra.mxu1 %v7944_v5 }
 0x1ee   :  { %1065 = vmatprep.subr.bf16.mxu1 %v7949_v6 }
 0x1f1   :  { %1066 = vmatpush1.bf16.msra.mxu1 %v7947_v7 }
 0x1f2   :  { %1067 = vmatprep.subr.bf16.mxu1 %v7952_v8 }
 0x1f5   :  { %1068 = vmatpush1.bf16.msra.mxu1 %v7950_v9 }
 0x1f6   :  { %1069 = vmatprep.subr.bf16.mxu1 %v7955_v10 }
 0x1f9   :  { %1070 = vmatpush1.bf16.msra.mxu1 %v7953_v11 }
 0x1fa   :  { %1071 = vmatprep.subr.bf16.mxu1 %v7958_v12 }
 0x1fd   :  { %1072 = vmatpush1.bf16.msra.mxu1 %v7956_v13 }
 0x1fe   :  { %1073 = vmatprep.subr.bf16.mxu1 %v7961_v14 }
 0x201   :  { %1074 = vmatpush1.bf16.msra.mxu1 %v7959_v15  ;;  %v8921_v15 = vmov -1000000.0  }
 0x202   :  { %1075 = vmatprep.subr.bf16.mxu1 %v7964_v16 }
 0x205   :  { %1076 = vmatpush1.bf16.msra.mxu1 %v7962_v17 }
 0x206   :  { %1077 = vmatprep.subr.bf16.mxu1 %v7967_v18 }
 0x209   :  { %1078 = vmatpush1.bf16.msra.mxu1 %v7965_v19 }
 0x20a   :  { %7542 = vmatprep.subr.bf16.mxu1 %v8916_v1 }
 0x20c   :  { %1080 = vmatmul.mubr.bf16.vlgmr.msra.gmra.mrb[4].mxu1 %v9094_v48 }
 0x20d   :  { %7544 = vmatprep.mubr.msk.bf16.mxu1 %vm8918_vm2, %v8916_v1 }
 0x247   :  { %v329_v12 = vpop.permute.xlu0 %328  ;;  %v336_v14 = vpop.permute.xlu1 %335 }
 0x248   :  { %v333_v13 = vrot.slane %v329_v12, %v9062_v3  ;;  %v340_v17 = vrot.slane %v336_v14, %v9062_v3 }
 0x24a   :  { %vm341_vm5 = vcmp.lt.s32.totalorder %v9072_v28, %v333_v13  ;;  %vm342_vm7 = vcmp.lt.s32.totalorder %v9072_v28, %v340_v17 }
 0x24b   :  { %v9154_v16 = vsel %vm341_vm5, 0.0, %v8921_v15  ;;  %v9160_v24 = vsel %vm342_vm7, 0.0, %v8921_v15 }
 0x29f   :  { %v585_v34 = vpop.f32.mrb[0].mxu1  ;;  %v833_v35 = vpop.f32.mrb[4].mxu0 }
 0x2a0   :  { %v834_v36 = vadd.f32 %v833_v35, %v632_v31  ;;  %v9112_v0 = vpop.f32.mrb[1].mxu1  ;;  %v835_v37 = vpop.f32.mrb[5].mxu0  ;;  %v586_v52 = vadd.f32 %v585_v34, %v384_v41 }
 0x2a1   :  { %v9114_v38 = vadd.f32 %v835_v37, %v636_v32  ;;  %v589_v39 = vpop.f32.mrb[2].mxu1  ;;  %v837_v40 = vpop.f32.mrb[6].mxu0 }
 0x2a2   :  { %v9118_v46 = vpack.c.bf16 %v834_v36, %v834_v36  ;;  %v9120_v47 = vpop.f32.mrb[3].mxu1  ;;  %v839_v48 = vpop.f32.mrb[7].mxu0  ;;  %v838_v51 = vadd.f32 %v837_v40, %v632_v31  ;;  %v9129_v54 = vpack.c.bf16 %v586_v52, %v586_v52  ;;  %v590_v56 = vadd.f32 %v589_v39, %v384_v41 }
 0x2a3   :  { %v9122_v49 = vadd.f32 %v839_v48, %v636_v32 }
 0x2a4   :  { %v1107_v50 = vsel %vm1102_vm3, %v9118_v46, 0  ;;  %v9127_v53 = vpack.c.bf16 %v838_v51, %v838_v51  ;;  %v1092_v57 = vpack.c.bf16 %v590_v56, %v590_v56 }
 0x2a5   :  { %7543 = vmatpush3.bf16.xpose.msra.mxu1 %v1107_v50 }
 0x2a6   :  { %7548 = vmatprep.subr.bf16.mxu1 %v8916_v1  ;;  %v1153_v55 = vsel %vm1102_vm3, %v9127_v53, 0 }
 0x2ac   :  { %7545 = vmatmul.mubr.msk.bf16.vlgmr.msra.gmra.mrb[8].mxu1 %vm1102_vm3, %v9129_v54 }
 0x2ad   :  { %7549 = vmatpush3.bf16.xpose.msra.mxu1 %v1153_v55  ;;  %7550 = vmatprep.mubr.msk.bf16.mxu1 %vm8918_vm2, %v8916_v1 }
 0x2ae   :  { %7572 = vmatprep.subr.bf16.mxu1 %v8916_v1 }
 0x2b4   :  { %7551 = vmatmul.mubr.msk.bf16.vlgmr.msra.gmra.mrb[12].mxu1 %vm1102_vm3, %v1092_v57 }
 0x2b5   :  { %7574 = vmatprep.mubr.msk.bf16.mxu1 %vm8918_vm2, %v8916_v1 }
 0x2df   :  { %v1081_v61 = vpop.f32.mrb[4].mxu1 }
 0x2e0   :  { %v1082_v62 = vadd.f32 %v1081_v61, %v880_v59  ;;  %v1083_v63 = vpop.f32.mrb[5].mxu1 }
 0x2e1   :  { %v9143_v5 = vadd.f32 %v1083_v63, %v884_v60  ;;  %v1085_v6 = vpop.f32.mrb[6].mxu1 }
 0x2e2   :  { %v9145_v7 = vpack.c.bf16 %v1082_v62, %v1082_v62  ;;  %v1086_v8 = vadd.f32 %v1085_v6, %v880_v59  ;;  %v1087_v9 = vpop.f32.mrb[7].mxu1 }
 0x2e3   :  { %v9147_v10 = vadd.f32 %v1087_v9, %v884_v60 }
 0x2e4   :  { %v1225_v11 = vsel %vm1223_vm4, %v9145_v7, 0  ;;  %v1100_v55 = vpack.c.bf16 %v1086_v8, %v1086_v8 }
 0x2e5   :  { %7555 = vmatpush3.bf16.msra.mxu0 %v1225_v11 }
 0x2e6   :  { %7560 = vmatprep.subr.bf16.mxu0 %v8916_v1 }
 0x37f   :  { %v1143_v18 = vpop.f32.mrb[8].mxu1 }
 0x380   :  { %v1144_v19 = vadd.f32 %v1143_v18, %v9154_v16  ;;  %v7546_v20 = vpop.f32.mrb[9].mxu1 }
 0x381   :  { %v1146_v21 = vpop.f32.mrb[10].mxu1 }
 0x382   :  { %v7547_v22 = vpop.f32.mrb[11].mxu1  ;;  %v1196_v23 = vsel %vm1195_vm6, %v1144_v19, -inf }
 0x383   :  { %1197 = vmax.xlane.f32.xlu1 %v1196_v23 }
 0x387   :  { %v1189_v25 = vpop.f32.mrb[12].mxu1 }
 0x388   :  { %v1190_v26 = vadd.f32 %v1189_v25, %v9160_v24  ;;  %v7552_v27 = vpop.f32.mrb[13].mxu1 }
 0x389   :  { %v1192_v29 = vpop.f32.mrb[14].mxu1 }
 0x38a   :  { %v7553_v30 = vpop.f32.mrb[15].mxu1  ;;  %v1199_v31 = vsel %vm1195_vm6, %v1190_v26, -inf }
 0x38b   :  { %1200 = vmax.xlane.f32.xlu0 %v1199_v31 }
 0x410   :  { %v1198_v32 = vpop.xlane.xlu1 %1197 }
 0x411   :  { %v1202_v34 = vsub.f32 %v1144_v19, %v1198_v32 }
 0x413   :  { %v1204_v35 = vmul.f32 1.442695, %v1202_v34 }
 0x415   :  { %8656 = vpow2.f32 %v1204_v35 }
 0x418   :  { %v1201_v36 = vpop.xlane.xlu0 %1200 }
 0x419   :  { %v1203_v28 = vsub.f32 %v1190_v26, %v1201_v36 }
 0x41b   :  { %v1206_v37 = vmul.f32 1.442695, %v1203_v28 }
 0x41d   :  { %8658 = vpow2.f32 %v1206_v37 }
 0x41f   :  { %v8657_v39 = vpop.eup %8656 }
 0x420   :  { %v1208_v40 = vsel %vm1195_vm6, %v8657_v39, 0.0 }
 0x421   :  { %1209 = vadd.xlane.f32.xlu0 %v1208_v40 }
 0x427   :  { %v8659_v41 = vpop.eup %8658 }
 0x428   :  { %v1211_v48 = vsel %vm1195_vm6, %v8659_v41, 0.0 }
 0x429   :  { %1212 = vadd.xlane.f32.xlu1 %v1211_v48 }
 0x437   :  { %1317 = vrot.lane.b32.xlu0 %v9118_v46, %s8922_s2 }
 0x43a   :  { %1369 = vrot.lane.b32.xlu1 %v9127_v53, %s8922_s2  ;;  %v1271_v53 = vsel %vm1223_vm4, %v1100_v55, 0 }
 0x43b   :  { %1366 = vrot.lane.b32.xlu0 %v1092_v57, %s8922_s2 }
 0x43e   :  { %1314 = vrot.lane.b32.xlu1 %v9129_v54, %s8922_s2 }
 0x4ae   :  { %v1210_v50 = vpop.xlane.xlu0 %1209 }
 0x4af   :  { %8660 = vrcp.f32 %v1210_v50 }
 0x4b2   :  { %v1318_v60 = vpop.permute.xlu0 %1317 }
 0x4b3   :  { %v1323_v63 = vsel %vm1102_vm3, %v1318_v60, 0 }
 0x4b6   :  { %v1213_v51 = vpop.xlane.xlu1 %1212  ;;  %v1367_v61 = vpop.permute.xlu0 %1366 }
 0x4b7   :  { %8662 = vrcp.f32 %v1213_v51 }
 0x4b9   :  { %v8661_v52 = vpop.eup %8660 }
 0x4ba   :  { %v1216_v56 = vmul.f32 %v8661_v52, %v8657_v39  ;;  %v1370_v58 = vpop.permute.xlu1 %1369 }
 0x4bb   :  { %v1375_v59 = vsel %vm1102_vm3, %v1370_v58, 0  ;;  %v9208_v58 = vpack.c.bf16 %v9122_v49, %v9122_v49 }
 0x4bc   :  { %7573 = vmatpush3.bf16.xpose.msra.mxu1 %v1375_v59  ;;  %v1218_v46 = vpack.c.bf16 %v1216_v56, %v1216_v56 }
 0x4bd   :  { %7584 = vmatprep.subr.bf16.mxu1 %v8916_v1 }
 0x4be   :  { %7557 = vmatmul.mubr.msk.bf16.vlgmr.msra.gmra.mrb[8].mxu0 %vm1195_vm6, %v1218_v46  ;;  %v1315_v6 = vpop.permute.xlu1 %1314  ;;  %v1589_v46 = vsel %vm1102_vm3, %v9208_v58, 0 }
 0x4bf   :  { %7561 = vmatpush3.bf16.msra.mxu0 %v1271_v53  ;;  %7562 = vmatprep.mubr.msk.bf16.mxu0 %vm8918_vm2, %v8916_v1 }
 0x4c0   :  { %7566 = vmatprep.subr.bf16.mxu0 %v8916_v1 }
 0x4c1   :  { %v8663_v54 = vpop.eup %8662 }
 0x4c2   :  { %v1217_v57 = vmul.f32 %v8663_v54, %v8659_v41 }
 0x4c3   :  { %7575 = vmatmul.mubr.msk.bf16.vlgmr.msra.gmra.mrb[16].mxu1 %vm1102_vm3, %v1367_v61 }
 0x4c4   :  { %v1219_v62 = vpack.c.bf16 %v1217_v57, %v1217_v57  ;;  %7586 = vmatprep.mubr.msk.bf16.mxu1 %vm8918_vm2, %v8916_v1 }
 0x4c6   :  { %7563 = vmatmul.mubr.msk.bf16.vlgmr.msra.gmra.mrb[12].mxu0 %vm1195_vm6, %v1219_v62  ;;  %v1095_v62 = vpack.c.bf16 %v9114_v38, %v9114_v38 }
 0x4c7   :  { %7568 = vmatprep.mubr.msk.bf16.mxu0 %vm8918_vm2, %v8916_v1 }
 0x4c8   :  { %7567 = vmatpush3.bf16.xpose.msra.mxu0 %v1323_v63 }
 0x4c9   :  { %7578 = vmatprep.subr.bf16.mxu0 %v8916_v1 }
 0x4cf   :  { %7569 = vmatmul.mubr.msk.bf16.vlgmr.msra.gmra.mrb[16].mxu0 %vm1102_vm3, %v1315_v6 }
 0x4d0   :  { %7580 = vmatprep.mubr.msk.bf16.mxu0 %vm8918_vm2, %v8916_v1 }
 0x591   :  { %v9191_v8 = vpop.f32.mrb[8].mxu0 }
 0x592   :  { %v7558_v9 = vpop.f32.mrb[9].mxu0 }
 0x593   :  { %v1264_v11 = vpop.f32.mrb[10].mxu0  ;;  %v9241_v9 = vpack.c.bf16 %v9143_v5, %v9143_v5 }
 0x594   :  { %v7559_v12 = vpop.f32.mrb[11].mxu0 }
 0x595   :  { %v1659_v12 = vsel %vm1223_vm4, %v9241_v9, 0 }
 0x596   :  { %v1411_v13 = vpop.f32.mrb[16].mxu1 }
 0x597   :  { %v1412_v14 = vadd.f32 %v1411_v13, %v9160_v24  ;;  %v7576_v15 = vpop.f32.mrb[17].mxu1 }
 0x598   :  { %v1414_v17 = vpop.f32.mrb[18].mxu1 }
 0x599   :  { %v9194_v18 = vpop.f32.mrb[12].mxu0  ;;  %v7577_v19 = vpop.f32.mrb[19].mxu1  ;;  %v1420_v20 = vsel %vm1195_vm6, %v1412_v14, -inf }
 0x59a   :  { %v7564_v21 = vpop.f32.mrb[13].mxu0  ;;  %1421 = vmax.xlane.f32.xlu0 %v1420_v20 }
 0x59b   :  { %v1310_v22 = vpop.f32.mrb[14].mxu0 }
 0x59c   :  { %v7565_v23 = vpop.f32.mrb[15].mxu0 }
 0x5a2   :  { %v1359_v25 = vpop.f32.mrb[16].mxu0 }
 0x5a3   :  { %v1360_v26 = vadd.f32 %v1359_v25, %v9154_v16  ;;  %v7570_v27 = vpop.f32.mrb[17].mxu0 }
 0x5a4   :  { %v1362_v29 = vpop.f32.mrb[18].mxu0 }
 0x5a5   :  { %v7571_v30 = vpop.f32.mrb[19].mxu0  ;;  %v1417_v31 = vsel %vm1195_vm6, %v1360_v26, -inf }
 0x5a6   :  { %1418 = vmax.xlane.f32.xlu1 %v1417_v31 }
 0x627   :  { %v1422_v32 = vpop.xlane.xlu0 %1421 }
 0x628   :  { %v1424_v34 = vsub.f32 %v1412_v14, %v1422_v32 }
 0x62a   :  { %v1427_v35 = vmul.f32 1.442695, %v1424_v34 }
 0x62c   :  { %8664 = vpow2.f32 %v1427_v35 }
 0x633   :  { %v1419_v36 = vpop.xlane.xlu1 %1418 }
 0x634   :  { %v1423_v28 = vsub.f32 %v1360_v26, %v1419_v36 }
 0x636   :  { %v8665_v37 = vpop.eup %8664  ;;  %v1425_v39 = vmul.f32 1.442695, %v1423_v28 }
 0x637   :  { %v1432_v40 = vsel %vm1195_vm6, %v8665_v37, 0.0 }
 0x638   :  { %8666 = vpow2.f32 %v1425_v39  ;;  %1433 = vadd.xlane.f32.xlu1 %v1432_v40 }
 0x642   :  { %v8667_v41 = vpop.eup %8666 }
 0x643   :  { %v1429_v48 = vsel %vm1195_vm6, %v8667_v41, 0.0 }
 0x644   :  { %1430 = vadd.xlane.f32.xlu0 %v1429_v48 }
 0x649   :  { %1491 = vrot.lane.b32.xlu1 %v1100_v55, %s8922_s2 }
 0x65a   :  { %1442 = vrot.lane.b32.xlu0 %v9145_v7, %s8922_s2  ;;  %v388_v7 = vrot.slane %v9110_v33, %v9065_v4  ;;  %v9223_v33 = vpack.c.bf16 %v9147_v10, %v9147_v10  ;;  %v1543_v10 = vsel %vm1102_vm3, %v1095_v62, 0 }
 0x65c   :  { %v592_v49 = vadd.f32 %v9120_v47, %v388_v7  ;;  %v1705_v63 = vsel %vm1223_vm4, %v9223_v33, 0  ;;  %v588_v38 = vadd.f32 %v9112_v0, %v388_v7 }
 0x65e   :  { %v1093_v57 = vpack.c.bf16 %v592_v49, %v592_v49  ;;  %v1091_v11 = vpack.c.bf16 %v588_v38, %v588_v38 }
 0x6c5   :  { %v1434_v50 = vpop.xlane.xlu1 %1433 }
 0x6c6   :  { %8668 = vrcp.f32 %v1434_v50 }
 0x6c9   :  { %v1492_v51 = vpop.permute.xlu1 %1491 }
 0x6ca   :  { %v1497_v52 = vsel %vm1223_vm4, %v1492_v51, 0 }
 0x6cb   :  { %7585 = vmatpush3.bf16.msra.mxu1 %v1497_v52 }
 0x6cc   :  { %7596 = vmatprep.subr.bf16.mxu1 %v8916_v1 }
 0x6d0   :  { %v8669_v56 = vpop.eup %8668 }
 0x6d1   :  { %v1438_v59 = vmul.f32 %v8669_v56, %v8665_v37  ;;  %v1431_v60 = vpop.xlane.xlu0 %1430 }
 0x6d2   :  { %8670 = vrcp.f32 %v1431_v60 }
 0x6d3   :  { %v1440_v55 = vpack.c.bf16 %v1438_v59, %v1438_v59 }
 0x6d5   :  { %v1443_v53 = vpop.permute.xlu0 %1442  ;;  %7587 = vmatmul.mubr.msk.bf16.vlgmr.msra.gmra.mrb[20].mxu1 %vm1195_vm6, %v1440_v55 }
 0x6d6   :  { %v1448_v54 = vsel %vm1223_vm4, %v1443_v53, 0  ;;  %7597 = vmatpush3.bf16.xpose.msra.mxu1 %v1589_v46  ;;  %7598 = vmatprep.mubr.msk.bf16.mxu1 %vm8918_vm2, %v8916_v1 }
 0x6d7   :  { %7579 = vmatpush3.bf16.msra.mxu0 %v1448_v54  ;;  %7608 = vmatprep.subr.bf16.mxu1 %v8916_v1 }
 0x6d8   :  { %7590 = vmatprep.subr.bf16.mxu0 %v8916_v1 }
 0x6dc   :  { %v8671_v61 = vpop.eup %8670 }
 0x6dd   :  { %v1437_v6 = vmul.f32 %v8671_v61, %v8667_v41  ;;  %7599 = vmatmul.mubr.msk.bf16.vlgmr.msra.gmra.mrb[24].mxu1 %vm1102_vm3, %v1093_v57 }
 0x6de   :  { %7609 = vmatpush3.bf16.msra.mxu1 %v1705_v63  ;;  %7610 = vmatprep.mubr.msk.bf16.mxu1 %vm8918_vm2, %v8916_v1 }
 0x6df   :  { %v1439_v47 = vpack.c.bf16 %v1437_v6, %v1437_v6  ;;  %7620 = vmatprep.subr.bf16.mxu1 %v8916_v1 }
 0x6e1   :  { %7581 = vmatmul.mubr.msk.bf16.vlgmr.msra.gmra.mrb[20].mxu0 %vm1195_vm6, %v1439_v47 }
 0x6e2   :  { %7591 = vmatpush3.bf16.xpose.msra.mxu0 %v1543_v10  ;;  %7592 = vmatprep.mubr.msk.bf16.mxu0 %vm8918_vm2, %v8916_v1 }
 0x6e3   :  { %7602 = vmatprep.subr.bf16.mxu0 %v8916_v1 }
 0x6e9   :  { %7593 = vmatmul.mubr.msk.bf16.vlgmr.msra.gmra.mrb[24].mxu0 %vm1102_vm3, %v1091_v11 }
 0x6ea   :  { %7603 = vmatpush3.bf16.msra.mxu0 %v1659_v12  ;;  %7604 = vmatprep.mubr.msk.bf16.mxu0 %vm8918_vm2, %v8916_v1 }
 0x6eb   :  { %7614 = vmatprep.subr.bf16.mxu0 %v8916_v1 }
 0x7a8   :  { %v9249_v13 = vpop.f32.mrb[20].mxu1 }
 0x7a9   :  { %v7588_v0 = vpop.f32.mrb[21].mxu1 }
 0x7aa   :  { %v1536_v14 = vpop.f32.mrb[22].mxu1 }
 0x7ab   :  { %v7589_v15 = vpop.f32.mrb[23].mxu1 }
 0x7b0   :  { %v1625_v17 = vpop.f32.mrb[24].mxu1 }
 0x7b1   :  { %v1626_v5 = vadd.f32 %v1625_v17, %v9160_v24  ;;  %v7600_v19 = vpop.f32.mrb[25].mxu1 }
 0x7b2   :  { %v1628_v20 = vpop.f32.mrb[26].mxu1 }
 0x7b3   :  { %v7601_v21 = vpop.f32.mrb[27].mxu1  ;;  %v1634_v22 = vsel %vm1195_vm6, %v1626_v5, -inf }
 0x7b4   :  { %v9253_v23 = vpop.f32.mrb[20].mxu0  ;;  %1635 = vmax.xlane.f32.xlu0 %v1634_v22 }
 0x7b5   :  { %v7809_v25 = vpack.i.bf16 %v9249_v13, %v9253_v23  ;;  %v7582_v26 = vpop.f32.mrb[21].mxu0 }
 0x7b6   :  { %v1487_v27 = vpop.f32.mrb[22].mxu0 }
 0x7b7   :  { %v7583_v29 = vpop.f32.mrb[23].mxu0 }
 0x7bc   :  { %v1579_v30 = vpop.f32.mrb[24].mxu0 }
 0x7bd   :  { %v1580_v31 = vadd.f32 %v1579_v30, %v9154_v16  ;;  %v7594_v32 = vpop.f32.mrb[25].mxu0 }
 0x7be   :  { %v1582_v34 = vpop.f32.mrb[26].mxu0 }
 0x7bf   :  { %v7595_v35 = vpop.f32.mrb[27].mxu0  ;;  %v1631_v36 = vsel %vm1195_vm6, %v1580_v31, -inf }
 0x7c0   :  { %1632 = vmax.xlane.f32.xlu1 %v1631_v36 }
 0x841   :  { %v1636_v28 = vpop.xlane.xlu0 %1635 }
 0x842   :  { %v1638_v37 = vsub.f32 %v1626_v5, %v1636_v28 }
 0x844   :  { %v1641_v39 = vmul.f32 1.442695, %v1638_v37 }
 0x846   :  { %8672 = vpow2.f32 %v1641_v39 }
 0x84d   :  { %v1633_v40 = vpop.xlane.xlu1 %1632 }
 0x84e   :  { %v1637_v41 = vsub.f32 %v1580_v31, %v1633_v40 }
 0x850   :  { %v8673_v48 = vpop.eup %8672  ;;  %v1639_v50 = vmul.f32 1.442695, %v1637_v41 }
 0x851   :  { %v1646_v51 = vsel %vm1195_vm6, %v8673_v48, 0.0 }
 0x852   :  { %8674 = vpow2.f32 %v1639_v50  ;;  %1647 = vadd.xlane.f32.xlu1 %v1646_v51 }
 0x85c   :  { %v8675_v52 = vpop.eup %8674 }
 0x85d   :  { %v1643_v56 = vsel %vm1195_vm6, %v8675_v52, 0.0 }
 0x85e   :  { %1644 = vadd.xlane.f32.xlu0 %v1643_v56 }
 0x863   :  { %1803 = vrot.lane.b32.xlu1 %v9208_v58, %s8922_s2 }
 0x867   :  { %1748 = vrot.lane.b32.xlu1 %v1091_v11, %s8922_s2 }
 0x874   :  { %1751 = vrot.lane.b32.xlu0 %v1095_v62, %s8922_s2 }
 0x878   :  { %1800 = vrot.lane.b32.xlu0 %v1093_v57, %s8922_s2 }
 0x8df   :  { %v1648_v59 = vpop.xlane.xlu1 %1647 }
 0x8e0   :  { %8676 = vrcp.f32 %v1648_v59 }
 0x8e3   :  { %v1804_v46 = vpop.permute.xlu1 %1803 }
 0x8e4   :  { %v1809_v54 = vsel %vm1102_vm3, %v1804_v46, 0 }
 0x8e7   :  { %v1749_v6 = vpop.permute.xlu1 %1748 }
 0x8ea   :  { %v8677_v60 = vpop.eup %8676 }
 0x8eb   :  { %v1652_v55 = vmul.f32 %v8677_v60, %v8673_v48  ;;  %v1645_v7 = vpop.xlane.xlu0 %1644 }
 0x8ec   :  { %8678 = vrcp.f32 %v1645_v7 }
 0x8ed   :  { %v1654_v53 = vpack.c.bf16 %v1652_v55, %v1652_v55 }
 0x8ef   :  { %7611 = vmatmul.mubr.msk.bf16.vlgmr.msra.gmra.mrb[28].mxu1 %vm1195_vm6, %v1654_v53  ;;  %v1752_v49 = vpop.permute.xlu0 %1751 }
 0x8f0   :  { %7621 = vmatpush3.bf16.xpose.msra.mxu1 %v1809_v54  ;;  %7622 = vmatprep.mubr.msk.bf16.mxu1 %vm8918_vm2, %v8916_v1  ;;  %v1757_v63 = vsel %vm1102_vm3, %v1752_v49, 0 }
 0x8f1   :  { %7632 = vmatprep.subr.bf16.mxu1 %v8916_v1 }
 0x8f3   :  { %v1801_v57 = vpop.permute.xlu0 %1800 }
 0x8f6   :  { %v8679_v58 = vpop.eup %8678 }
 0x8f7   :  { %v1651_v61 = vmul.f32 %v8679_v58, %v8675_v52  ;;  %7623 = vmatmul.mubr.msk.bf16.vlgmr.msra.gmra.mrb[32].mxu1 %vm1102_vm3, %v1801_v57 }
 0x8f8   :  { %7634 = vmatprep.mubr.msk.bf16.mxu1 %vm8918_vm2, %v8916_v1 }
 0x8f9   :  { %v1653_v62 = vpack.c.bf16 %v1651_v61, %v1651_v61  ;;  %v7968_v61 = vld [vmem:[#allocation8 + $0x18] ss:$108 sps:$4 sm:$0xff]  }
 0x8fb   :  { %7605 = vmatmul.mubr.msk.bf16.vlgmr.msra.gmra.mrb[28].mxu0 %vm1195_vm6, %v1653_v62  ;;  %v7970_v62 = vld [vmem:[#allocation8 + $0x1c] ss:$108 sps:$4 sm:$0xff]  }
 0x8fc   :  { %7615 = vmatpush3.bf16.xpose.msra.mxu0 %v1757_v63  ;;  %7616 = vmatprep.mubr.msk.bf16.mxu0 %vm8918_vm2, %v8916_v1  ;;  %v7973_v63 = vld [vmem:[#allocation8 + $0xf4] ss:$108 sps:$4 sm:$0xff]  }
 0x8fd   :  { %7626 = vmatprep.subr.bf16.mxu0 %v8916_v1 }
 0x903   :  { %7617 = vmatmul.mubr.msk.bf16.vlgmr.msra.gmra.mrb[32].mxu0 %vm1102_vm3, %v1749_v6  ;;  %v7971_v6 = vld [vmem:[#allocation8 + $0xf0] ss:$108 sps:$4 sm:$0xff]  }
 0x904   :  { %7628 = vmatprep.mubr.msk.bf16.mxu0 %vm8918_vm2, %v8916_v1 }
 0x9c2   :  { %v9282_v47 = vpop.f32.mrb[28].mxu1 }
 0x9c3   :  { %v7612_v10 = vpop.f32.mrb[29].mxu1 }
 0x9c4   :  { %v1744_v38 = vpop.f32.mrb[30].mxu1  ;;  %v7974_v10 = vld [vmem:[#allocation8 + $0x1c8] ss:$108 sps:$4 sm:$0xff]  }
 0x9c5   :  { %v7613_v11 = vpop.f32.mrb[31].mxu1  ;;  %v7977_v38 = vld [vmem:[#allocation8 + $0x2a0] ss:$108 sps:$4 sm:$0xff]  }
 0x9c6   :  { %v7982_v11 = vld [vmem:[#allocation8 + $0x37c] ss:$108 sps:$4 sm:$0xff]  }
 0x9ca   :  { %v1845_v12 = vpop.f32.mrb[32].mxu1 }
 0x9cb   :  { %v1846_v0 = vadd.f32 %v1845_v12, %v9160_v24  ;;  %v7624_v14 = vpop.f32.mrb[33].mxu1  ;;  %v7980_v12 = vld [vmem:[#allocation8 + $0x378] ss:$108 sps:$4 sm:$0xff]  }
 0x9cc   :  { %v1848_v15 = vpop.f32.mrb[34].mxu1  ;;  %v7983_v14 = vld [vmem:[#allocation8 + $0x450] ss:$108 sps:$4 sm:$0xff]  }
 0x9cd   :  { %v7625_v17 = vpop.f32.mrb[35].mxu1  ;;  %v1854_v5 = vsel %vm1195_vm6, %v1846_v0, -inf  ;;  %v7988_v15 = vld [vmem:[#allocation8 + $0x52c] ss:$108 sps:$4 sm:$0xff]  }
 0x9ce   :  { %v9286_v19 = vpop.f32.mrb[28].mxu0  ;;  %1855 = vmax.xlane.f32.xlu0 %v1854_v5  ;;  %v7986_v17 = vld [vmem:[#allocation8 + $0x528] ss:$108 sps:$4 sm:$0xff]   ;;  %v7991_v5 = vld [vmem:[#allocation8 + $0x604] ss:$108 sps:$4 sm:$0xff]  }
 0x9cf   :  { %v7606_v20 = vpop.f32.mrb[29].mxu0 }
 0x9d0   :  { %v1698_v21 = vpop.f32.mrb[30].mxu0  ;;  %v7989_v20 = vld [vmem:[#allocation8 + $0x600] ss:$108 sps:$4 sm:$0xff]  }
 0x9d1   :  { %v7607_v22 = vpop.f32.mrb[31].mxu0  ;;  %v7994_v21 = vld [vmem:[#allocation8 + $0x6dc] ss:$108 sps:$4 sm:$0xff]  }
 0x9d2   :  { %v7992_v22 = vld [vmem:[#allocation8 + $0x6d8] ss:$108 sps:$4 sm:$0xff]  }
 0x9d6   :  { %v1793_v26 = vpop.f32.mrb[32].mxu0 }
 0x9d7   :  { %v1794_v27 = vadd.f32 %v1793_v26, %v9154_v16  ;;  %v7618_v29 = vpop.f32.mrb[33].mxu0  ;;  %v7997_v26 = vld [vmem:[#allocation8 + $0x7b4] ss:$108 sps:$4 sm:$0xff]  }
 0x9d8   :  { %v1796_v30 = vpop.f32.mrb[34].mxu0  ;;  %v8000_v29 = vld [vmem:[#allocation8 + $0x88c] ss:$108 sps:$4 sm:$0xff]  }
 0x9d9   :  { %v7619_v31 = vpop.f32.mrb[35].mxu0  ;;  %v1851_v32 = vsel %vm1195_vm6, %v1794_v27, -inf  ;;  %v7998_v30 = vld [vmem:[#allocation8 + $0x888] ss:$108 sps:$4 sm:$0xff]  }
 0x9da   :  { %1852 = vmax.xlane.f32.xlu1 %v1851_v32  ;;  %v8003_v31 = vld [vmem:[#allocation8 + $0x964] ss:$108 sps:$4 sm:$0xff]   ;;  %v8001_v32 = vld [vmem:[#allocation8 + $0x960] ss:$108 sps:$4 sm:$0xff]  }
 0xa5b   :  { %v1856_v34 = vpop.xlane.xlu0 %1855 }
 0xa5c   :  { %v1858_v35 = vsub.f32 %v1846_v0, %v1856_v34  ;;  %v7985_v0 = vld [vmem:[#allocation8 + $0x454] ss:$108 sps:$4 sm:$0xff]   ;;  %v8006_v34 = vld [vmem:[#allocation8 + $0xa3c] ss:$108 sps:$4 sm:$0xff]  }
 0xa5e   :  { %v1861_v36 = vmul.f32 1.442695, %v1858_v35  ;;  %v8004_v35 = vld [vmem:[#allocation8 + $0xa38] ss:$108 sps:$4 sm:$0xff]  }
 0xa60   :  { %8680 = vpow2.f32 %v1861_v36  ;;  %v8009_v36 = vld [vmem:[#allocation8 + $0xb14] ss:$108 sps:$4 sm:$0xff]  }
 0xa67   :  { %v1853_v28 = vpop.xlane.xlu1 %1852 }
 0xa68   :  { %v1857_v37 = vsub.f32 %v1794_v27, %v1853_v28  ;;  %v7995_v27 = vld [vmem:[#allocation8 + $0x7b0] ss:$108 sps:$4 sm:$0xff]  }
 0xa69   :  { %v8007_v28 = vld [vmem:[#allocation8 + $0xb10] ss:$108 sps:$4 sm:$0xff]  }
 0xa6a   :  { %v8681_v39 = vpop.eup %8680  ;;  %v1859_v40 = vmul.f32 1.442695, %v1857_v37  ;;  %v8012_v37 = vld [vmem:[#allocation8 + $0xbec] ss:$108 sps:$4 sm:$0xff]  }
 0xa6b   :  { %v1866_v41 = vsel %vm1195_vm6, %v8681_v39, 0.0 }
 0xa6c   :  { %8682 = vpow2.f32 %v1859_v40  ;;  %1867 = vadd.xlane.f32.xlu1 %v1866_v41 }
 0xa76   :  { %v8683_v48 = vpop.eup %8682 }
 0xa77   :  { %v1863_v50 = vsel %vm1195_vm6, %v8683_v48, 0.0 }
 0xa78   :  { %1864 = vadd.xlane.f32.xlu0 %v1863_v50  ;;  %v8013_v50 = vld [vmem:[#allocation8 + $0xcc0] ss:$108 sps:$4 sm:$0xff]  }
 0xa7d   :  { %1925 = vrot.lane.b32.xlu1 %v9223_v33, %s8922_s2 }
 0xa8e   :  { %1876 = vrot.lane.b32.xlu0 %v9241_v9, %s8922_s2 }
 0xa92   :  { %7810 = vrot.lane.b32.xlu0 %v7809_v25, %s8922_s2 }
 0xaf9   :  { %v1868_v51 = vpop.xlane.xlu1 %1867 }
 0xafa   :  { %8684 = vrcp.f32 %v1868_v51  ;;  %v8015_v51 = vld [vmem:[#allocation8 + $0xcc4] ss:$108 sps:$4 sm:$0xff]  }
 0xafd   :  { %v1926_v52 = vpop.permute.xlu1 %1925 }
 0xafe   :  { %v1931_v56 = vsel %vm1223_vm4, %v1926_v52, 0 }
 0xaff   :  { %7633 = vmatpush3.bf16.msra.mxu1 %v1931_v56 }
 0xb04   :  { %v8685_v59 = vpop.eup %8684 }
 0xb05   :  { %v1872_v60 = vmul.f32 %v8685_v59, %v8681_v39  ;;  %v1865_v55 = vpop.xlane.xlu0 %1864  ;;  %v8010_v39 = vld [vmem:[#allocation8 + $0xbe8] ss:$108 sps:$4 sm:$0xff]  }
 0xb06   :  { %8686 = vrcp.f32 %v1865_v55 }
 0xb07   :  { %v1874_v7 = vpack.c.bf16 %v1872_v60, %v1872_v60 }
 0xb09   :  { %v1877_v33 = vpop.permute.xlu0 %1876  ;;  %7635 = vmatmul.mubr.msk.bf16.vlgmr.msra.gmra.mrb[36].mxu1 %vm1195_vm6, %v1874_v7 }
 0xb0a   :  { %v1882_v9 = vsel %vm1223_vm4, %v1877_v33, 0 }
 0xb0b   :  { %7627 = vmatpush3.bf16.msra.mxu0 %v1882_v9 }
 0xb0c   :  { %2200 = vmatprep.subr.bf16.mxu0 %v7970_v62 }
 0xb0d   :  { %v7811_v46 = vpop.permute.xlu0 %7810 }
 0xb0e   :  { %v7813_v13 = vunpack.i.h.bf16 %v7811_v46  ;;  %v7812_v23 = vunpack.i.l.bf16 %v7811_v46 }
 0xb10   :  { %v8687_v25 = vpop.eup %8686  ;;  %v9305_v53 = vsel %vm1102_vm3, %v9194_v18, %v7813_v13  ;;  %v9309_v54 = vsel %vm1102_vm3, %v9191_v8, %v7812_v23  ;;  %v7976_v18 = vld [vmem:[#allocation8 + $0x1cc] ss:$108 sps:$4 sm:$0xff]   ;;  %v7979_v8 = vld [vmem:[#allocation8 + $0x2a4] ss:$108 sps:$4 sm:$0xff]  }
 0xb11   :  { %v1871_v49 = vmul.f32 %v8687_v25, %v8683_v48  ;;  %v1993_v58 = vpack.c.bf16 %v9305_v53, %v9309_v54 }
 0xb13   :  { %v1873_v57 = vpack.c.bf16 %v1871_v49, %v1871_v49  ;;  %v2028_v49 = vld [vmem:[#allocation11 + $0x3] ss:$8 sm:$0x3] }
 0xb15   :  { %7629 = vmatmul.mubr.msk.bf16.vlgmr.msra.gmra.mrb[36].mxu0 %vm1195_vm6, %v1873_v57  ;;  %v2033_v57 = vrot.slane %v2028_v49, %v9062_v3 }
 0xb16   :  { %2201 = vmatpush1.bf16.msra.mxu0 %v7968_v61  ;;  %v2037_v61 = vrot.slane %v2028_v49, %v9065_v4 }
 0xb17   :  { %2202 = vmatprep.subr.bf16.mxu0 %v7973_v63 }
 0xb1a   :  { %2203 = vmatpush1.bf16.msra.mxu0 %v7971_v6 }
 0xb1b   :  { %2204 = vmatprep.subr.bf16.mxu0 %v7976_v18 }
 0xb1e   :  { %2205 = vmatpush1.bf16.msra.mxu0 %v7974_v10 }
 0xb1f   :  { %2206 = vmatprep.subr.bf16.mxu0 %v7979_v8 }
 0xb22   :  { %2207 = vmatpush1.bf16.msra.mxu0 %v7977_v38 }
 0xb23   :  { %2208 = vmatprep.subr.bf16.mxu0 %v7982_v11 }
 0xb26   :  { %2209 = vmatpush1.bf16.msra.mxu0 %v7980_v12  ;;  %v8016_v12 = vld [vmem:[#allocation8 + $0x20] ss:$108 sps:$4 sm:$0xff]  }
 0xb27   :  { %2210 = vmatprep.subr.bf16.mxu0 %v7985_v0  ;;  %v8018_v0 = vld [vmem:[#allocation8 + $0x24] ss:$108 sps:$4 sm:$0xff]  }
 0xb28   :  { %2723 = vmatprep.subr.bf16.mxu1 %v8018_v0  ;;  %v8087_v0 = vld [vmem:[#allocation8 + $0x974] ss:$108 sps:$4 sm:$0xff]  }
 0xb29   :  { %2724 = vmatpush1.bf16.msra.mxu1 %v8016_v12  ;;  %v8084_v12 = vld [vmem:[#allocation8 + $0x96c] ss:$108 sps:$4 sm:$0xff]  }
 0xb2a   :  { %2211 = vmatpush1.bf16.msra.mxu0 %v7983_v14  ;;  %v8019_v14 = vld [vmem:[#allocation8 + $0x28] ss:$108 sps:$4 sm:$0xff]  }
 0xb2b   :  { %2212 = vmatprep.subr.bf16.mxu0 %v7988_v15  ;;  %v8024_v15 = vld [vmem:[#allocation8 + $0xfc] ss:$108 sps:$4 sm:$0xff]  }
 0xb2c   :  { %2725 = vmatprep.subr.bf16.mxu1 %v8024_v15  ;;  %v8090_v15 = vld [vmem:[#allocation8 + $0xa44] ss:$108 sps:$4 sm:$0xff]  }
 0xb2e   :  { %2213 = vmatpush1.bf16.msra.mxu0 %v7986_v17  ;;  %v8027_v17 = vld [vmem:[#allocation8 + $0x104] ss:$108 sps:$4 sm:$0xff]  }
 0xb2f   :  { %2214 = vmatprep.subr.bf16.mxu0 %v7991_v5  ;;  %v8030_v5 = vld [vmem:[#allocation8 + $0x1d4] ss:$108 sps:$4 sm:$0xff]  }
 0xb32   :  { %2215 = vmatpush1.bf16.msra.mxu0 %v7989_v20  ;;  %v8033_v20 = vld [vmem:[#allocation8 + $0x1dc] ss:$108 sps:$4 sm:$0xff]  }
 0xb33   :  { %2216 = vmatprep.subr.bf16.mxu0 %v7994_v21  ;;  %v8028_v21 = vld [vmem:[#allocation8 + $0x1d0] ss:$108 sps:$4 sm:$0xff]  }
 0xb36   :  { %2217 = vmatpush1.bf16.msra.mxu0 %v7992_v22  ;;  %v8031_v22 = vld [vmem:[#allocation8 + $0x1d8] ss:$108 sps:$4 sm:$0xff]  }
 0xb37   :  { %2218 = vmatprep.subr.bf16.mxu0 %v7997_v26  ;;  %v8036_v26 = vld [vmem:[#allocation8 + $0x2ac] ss:$108 sps:$4 sm:$0xff]  }
 0xb3a   :  { %2219 = vmatpush1.bf16.msra.mxu0 %v7995_v27  ;;  %v8039_v27 = vld [vmem:[#allocation8 + $0x2b4] ss:$108 sps:$4 sm:$0xff]  }
 0xb3b   :  { %2220 = vmatprep.subr.bf16.mxu0 %v8000_v29  ;;  %v8034_v29 = vld [vmem:[#allocation8 + $0x2a8] ss:$108 sps:$4 sm:$0xff]  }
 0xb3e   :  { %2221 = vmatpush1.bf16.msra.mxu0 %v7998_v30  ;;  %v8037_v30 = vld [vmem:[#allocation8 + $0x2b0] ss:$108 sps:$4 sm:$0xff]  }
 0xb3f   :  { %2222 = vmatprep.subr.bf16.mxu0 %v8003_v31  ;;  %v8042_v31 = vld [vmem:[#allocation8 + $0x384] ss:$108 sps:$4 sm:$0xff]  }
 0xb42   :  { %2223 = vmatpush1.bf16.msra.mxu0 %v8001_v32  ;;  %v8045_v32 = vld [vmem:[#allocation8 + $0x38c] ss:$108 sps:$4 sm:$0xff]  }
 0xb43   :  { %2224 = vmatprep.subr.bf16.mxu0 %v8006_v34  ;;  %v8040_v34 = vld [vmem:[#allocation8 + $0x380] ss:$108 sps:$4 sm:$0xff]  }
 0xb46   :  { %2225 = vmatpush1.bf16.msra.mxu0 %v8004_v35  ;;  %v8043_v35 = vld [vmem:[#allocation8 + $0x388] ss:$108 sps:$4 sm:$0xff]  }
 0xb47   :  { %2226 = vmatprep.subr.bf16.mxu0 %v8009_v36  ;;  %v8048_v36 = vld [vmem:[#allocation8 + $0x45c] ss:$108 sps:$4 sm:$0xff]  }
 0xb4a   :  { %2227 = vmatpush1.bf16.msra.mxu0 %v8007_v28  ;;  %v8051_v28 = vld [vmem:[#allocation8 + $0x464] ss:$108 sps:$4 sm:$0xff]  }
 0xb4b   :  { %2228 = vmatprep.subr.bf16.mxu0 %v8012_v37  ;;  %v8046_v37 = vld [vmem:[#allocation8 + $0x458] ss:$108 sps:$4 sm:$0xff]  }
 0xb4e   :  { %2229 = vmatpush1.bf16.msra.mxu0 %v8010_v39  ;;  %v8049_v39 = vld [vmem:[#allocation8 + $0x460] ss:$108 sps:$4 sm:$0xff]  }
 0xb4f   :  { %2230 = vmatprep.subr.bf16.mxu0 %v8015_v51  ;;  %v8060_v51 = vld [vmem:[#allocation8 + $0x60c] ss:$108 sps:$4 sm:$0xff]  }
 0xb52   :  { %2231 = vmatpush1.bf16.msra.mxu0 %v8013_v50  ;;  %v8055_v50 = vld [vmem:[#allocation8 + $0x538] ss:$108 sps:$4 sm:$0xff]  }
 0xbdc   :  { %v1967_v40 = vpop.f32.mrb[36].mxu1 }
 0xbdd   :  { %v7636_v41 = vpop.f32.mrb[37].mxu1 }
 0xbde   :  { %v1970_v48 = vpop.f32.mrb[38].mxu1  ;;  %v8057_v41 = vld [vmem:[#allocation8 + $0x53c] ss:$108 sps:$4 sm:$0xff]  }
 0xbdf   :  { %v7637_v52 = vpop.f32.mrb[39].mxu1  ;;  %v8052_v48 = vld [vmem:[#allocation8 + $0x530] ss:$108 sps:$4 sm:$0xff]  }
 0xbe0   :  { %v8063_v52 = vld [vmem:[#allocation8 + $0x614] ss:$108 sps:$4 sm:$0xff]  }
 0xbe8   :  { %v1918_v56 = vpop.f32.mrb[36].mxu0 }
 0xbe9   :  { %v7804_v59 = vpack.i.bf16 %v1967_v40, %v1918_v56  ;;  %v7630_v60 = vpop.f32.mrb[37].mxu0  ;;  %v8054_v40 = vld [vmem:[#allocation8 + $0x534] ss:$108 sps:$4 sm:$0xff]  }
 0xbea   :  { %v1921_v55 = vpop.f32.mrb[38].mxu0  ;;  %v8058_v56 = vld [vmem:[#allocation8 + $0x608] ss:$108 sps:$4 sm:$0xff]   ;;  %v8066_v60 = vld [vmem:[#allocation8 + $0x6e4] ss:$108 sps:$4 sm:$0xff]  }
 0xbeb   :  { %v7631_v7 = vpop.f32.mrb[39].mxu0  ;;  %7805 = vrot.lane.b32.xlu1 %v7804_v59, %s8922_s2  ;;  %v8061_v59 = vld [vmem:[#allocation8 + $0x610] ss:$108 sps:$4 sm:$0xff]   ;;  %v8069_v55 = vld [vmem:[#allocation8 + $0x6ec] ss:$108 sps:$4 sm:$0xff]  }
 0xbec   :  { %v8064_v7 = vld [vmem:[#allocation8 + $0x6e0] ss:$108 sps:$4 sm:$0xff]  }
 0xc5d   :  { %v7806_v33 = vpop.permute.xlu1 %7805 }
 0xc5e   :  { %v7808_v9 = vunpack.i.h.bf16 %v7806_v33  ;;  %v7807_v46 = vunpack.i.l.bf16 %v7806_v33  ;;  %v8067_v33 = vld [vmem:[#allocation8 + $0x6e8] ss:$108 sps:$4 sm:$0xff]  }
 0xc60   :  { %v1991_v13 = vsel %vm1102_vm3, %v9286_v19, %v7807_v46  ;;  %v1992_v23 = vsel %vm1102_vm3, %v9282_v47, %v7808_v9  ;;  %v8072_v9 = vld [vmem:[#allocation8 + $0x7bc] ss:$108 sps:$4 sm:$0xff]   ;;  %v8075_v46 = vld [vmem:[#allocation8 + $0x7c4] ss:$108 sps:$4 sm:$0xff]  }
 0xc61   :  { %v1994_v25 = vpack.c.bf16 %v1992_v23, %v1991_v13  ;;  %v8070_v13 = vld [vmem:[#allocation8 + $0x7b8] ss:$108 sps:$4 sm:$0xff]   ;;  %v8073_v23 = vld [vmem:[#allocation8 + $0x7c0] ss:$108 sps:$4 sm:$0xff]  }
 0xc63   :  { %2232 = vmatprep.mubr.bf16.mxu0 %v1994_v25 }
 0xc64   :  { %2233 = vmatmul.mubr.bf16.vlgmr.msra.gmra.mrb[40].mxu0 %v1993_v58 }
 0xd37   :  { %v2234_v62 = vpop.f32.mrb[40].mxu0 }
 0xd38   :  { %v2235_v63 = vadd.f32 %v2234_v62, %v2033_v57  ;;  %v2236_v6 = vpop.f32.mrb[41].mxu0 }
 0xd39   :  { %v2237_v18 = vadd.f32 %v2236_v6, %v2037_v61  ;;  %v2238_v10 = vpop.f32.mrb[42].mxu0 }
 0xd3a   :  { %v9325_v19 = vadd.f32 %v2235_v63, %v9088_v45  ;;  %v2239_v47 = vadd.f32 %v2238_v10, %v2033_v57  ;;  %v2240_v8 = vpop.f32.mrb[43].mxu0 }
 0xd3b   :  { %v9328_v38 = vadd.f32 %v2237_v18, %v9084_v43  ;;  %v2241_v53 = vadd.f32 %v2240_v8, %v2037_v61  ;;  %v8021_v43 = vld [vmem:[#allocation8 + $0x2c] ss:$108 sps:$4 sm:$0xff]  }
 0xd3c   :  { %v9331_v54 = vadd.f32 %v2239_v47, %v9082_v42  ;;  %2766 = vmatprep.subr.bf16.mxu0 %v8021_v43  ;;  %v8022_v42 = vld [vmem:[#allocation8 + $0xf8] ss:$108 sps:$4 sm:$0xff]   ;;  %v8085_v43 = vld [vmem:[#allocation8 + $0x970] ss:$108 sps:$4 sm:$0xff]  }
 0xd3d   :  { %v9334_v58 = vadd.f32 %v2241_v53, %v9086_v44  ;;  %v2251_v11 = vadd.f32 %v9328_v38, %v9325_v19  ;;  %2767 = vmatpush1.bf16.msra.mxu0 %v8019_v14  ;;  %v8025_v44 = vld [vmem:[#allocation8 + $0x100] ss:$108 sps:$4 sm:$0xff]   ;;  %2726 = vmatpush1.bf16.msra.mxu1 %v8022_v42  ;;  %v8082_v14 = vld [vmem:[#allocation8 + $0x968] ss:$108 sps:$4 sm:$0xff]  }
 0xd3e   :  { %2768 = vmatprep.subr.bf16.mxu0 %v8027_v17  ;;  %2727 = vmatprep.subr.bf16.mxu1 %v8030_v5  ;;  %v8093_v17 = vld [vmem:[#allocation8 + $0xa4c] ss:$108 sps:$4 sm:$0xff]   ;;  %v8096_v5 = vld [vmem:[#allocation8 + $0xb1c] ss:$108 sps:$4 sm:$0xff]  }
 0xd3f   :  { %2252 = vadd.xlane.f32.xlu1 %v2251_v11  ;;  %v2254_v45 = vadd.f32 %v9334_v58, %v9331_v54  ;;  %v8081_v11 = vld [vmem:[#allocation8 + $0x89c] ss:$108 sps:$4 sm:$0xff]   ;;  %v8088_v42 = vld [vmem:[#allocation8 + $0xa40] ss:$108 sps:$4 sm:$0xff]  }
 0xd41   :  { %2255 = vadd.xlane.f32.xlu0 %v2254_v45  ;;  %2769 = vmatpush1.bf16.msra.mxu0 %v8025_v44  ;;  %v8079_v45 = vld [vmem:[#allocation8 + $0x898] ss:$108 sps:$4 sm:$0xff]   ;;  %v8091_v44 = vld [vmem:[#allocation8 + $0xa48] ss:$108 sps:$4 sm:$0xff]  }
 0xd42   :  { %2770 = vmatprep.subr.bf16.mxu0 %v8033_v20  ;;  %2728 = vmatpush1.bf16.msra.mxu1 %v8028_v21  ;;  %v8099_v20 = vld [vmem:[#allocation8 + $0xb24] ss:$108 sps:$4 sm:$0xff]  }
 0xd43   :  { %2729 = vmatprep.subr.bf16.mxu1 %v8036_v26  ;;  %v8094_v21 = vld [vmem:[#allocation8 + $0xb18] ss:$108 sps:$4 sm:$0xff]   ;;  %v8100_v26 = vld [vmem:[#allocation8 + $0xbf0] ss:$108 sps:$4 sm:$0xff]  }
 0xd45   :  { %2771 = vmatpush1.bf16.msra.mxu0 %v8031_v22  ;;  %v8097_v22 = vld [vmem:[#allocation8 + $0xb20] ss:$108 sps:$4 sm:$0xff]  }
 0xd46   :  { %2772 = vmatprep.subr.bf16.mxu0 %v8039_v27  ;;  %2730 = vmatpush1.bf16.msra.mxu1 %v8034_v29  ;;  %v8102_v27 = vld [vmem:[#allocation8 + $0xbf4] ss:$108 sps:$4 sm:$0xff]   ;;  %v8103_v29 = vld [vmem:[#allocation8 + $0xbf8] ss:$108 sps:$4 sm:$0xff]  }
 0xd47   :  { %2731 = vmatprep.subr.bf16.mxu1 %v8042_v31  ;;  %v8108_v31 = vld [vmem:[#allocation8 + $0xccc] ss:$108 sps:$4 sm:$0xff]  }
 0xd49   :  { %2773 = vmatpush1.bf16.msra.mxu0 %v8037_v30  ;;  %v8105_v30 = vld [vmem:[#allocation8 + $0xbfc] ss:$108 sps:$4 sm:$0xff]  }
 0xd4a   :  { %2774 = vmatprep.subr.bf16.mxu0 %v8045_v32  ;;  %2732 = vmatpush1.bf16.msra.mxu1 %v8040_v34  ;;  %v8111_v32 = vld [vmem:[#allocation8 + $0xcd4] ss:$108 sps:$4 sm:$0xff]  }
 0xd4b   :  { %2733 = vmatprep.subr.bf16.mxu1 %v8048_v36  ;;  %v8106_v34 = vld [vmem:[#allocation8 + $0xcc8] ss:$108 sps:$4 sm:$0xff]  }
 0xd4c   :  { %v8114_v36 = vld [vmem:[#allocation10 + $0x4] ss:$16 sps:$4 sm:$0xff]  }
 0xd4d   :  { %2775 = vmatpush1.bf16.msra.mxu0 %v8043_v35  ;;  %v8109_v35 = vld [vmem:[#allocation8 + $0xcd0] ss:$108 sps:$4 sm:$0xff]  }
 0xd4e   :  { %2776 = vmatprep.subr.bf16.mxu0 %v8051_v28  ;;  %2734 = vmatpush1.bf16.msra.mxu1 %v8046_v37 }
 0xd4f   :  { %2735 = vmatprep.subr.bf16.mxu1 %v8054_v40 }
 0xd51   :  { %2777 = vmatpush1.bf16.msra.mxu0 %v8049_v39 }
 0xd52   :  { %2778 = vmatprep.subr.bf16.mxu0 %v8057_v41  ;;  %2736 = vmatpush1.bf16.msra.mxu1 %v8052_v48 }
 0xd53   :  { %2737 = vmatprep.subr.bf16.mxu1 %v8060_v51  ;;  %v2250_v51 = vld [vmem:[#allocation11 + $0x5] ss:$8 sm:$0x3] }
 0xd55   :  { %2779 = vmatpush1.bf16.msra.mxu0 %v8055_v50  ;;  %v2248_v50 = vld [vmem:[#allocation11 + $0x4] ss:$8 sm:$0x3] }
 0xd56   :  { %2780 = vmatprep.subr.bf16.mxu0 %v8063_v52  ;;  %2738 = vmatpush1.bf16.msra.mxu1 %v8058_v56  ;;  %v2288_v52 = vrot.slane %v2248_v50, %v9062_v3  ;;  %v2292_v56 = vrot.slane %v2248_v50, %v9065_v4 }
 0xd57   :  { %2739 = vmatprep.subr.bf16.mxu1 %v8066_v60 }
 0xd59   :  { %2781 = vmatpush1.bf16.msra.mxu0 %v8061_v59 }
 0xd5a   :  { %2782 = vmatprep.subr.bf16.mxu0 %v8069_v55  ;;  %2740 = vmatpush1.bf16.msra.mxu1 %v8064_v7 }
 0xd5b   :  { %2741 = vmatprep.subr.bf16.mxu1 %v8072_v9  ;;  %v2307_v9 = vrot.slane %v2250_v51, %v9065_v4 }
 0xd5d   :  { %2783 = vmatpush1.bf16.msra.mxu0 %v8067_v33  ;;  %v2303_v33 = vrot.slane %v2250_v51, %v9062_v3 }
 0xd5e   :  { %2784 = vmatprep.subr.bf16.mxu0 %v8075_v46  ;;  %2742 = vmatpush1.bf16.msra.mxu1 %v8070_v13 }
 0xd61   :  { %2785 = vmatpush1.bf16.msra.mxu0 %v8073_v23 }
 0xd62   :  { %2786 = vmatprep.subr.bf16.mxu0 %v8081_v11  ;;  %v8121_v11 = vld [vmem:[#allocation10 + $0x60] ss:$16 sps:$4 sm:$0xff]  }
 0xd65   :  { %2787 = vmatpush1.bf16.msra.mxu0 %v8079_v45  ;;  %v8124_v45 = vld [vmem:[#allocation10 + $0x80] ss:$16 sps:$4 sm:$0xff]  }
 0xd66   :  { %2788 = vmatprep.subr.bf16.mxu0 %v8087_v0  ;;  %v8127_v0 = vld [vmem:[#allocation10 + $0xa0] ss:$16 sps:$4 sm:$0xff]  }
 0xd69   :  { %2789 = vmatpush1.bf16.msra.mxu0 %v8085_v43  ;;  %v8130_v43 = vld [vmem:[#allocation10 + $0xc0] ss:$16 sps:$4 sm:$0xff]  }
 0xd6a   :  { %2790 = vmatprep.subr.bf16.mxu0 %v8093_v17  ;;  %v8133_v17 = vld [vmem:[#allocation10 + $0xe0] ss:$16 sps:$4 sm:$0xff]  }
 0xd6d   :  { %2791 = vmatpush1.bf16.msra.mxu0 %v8091_v44  ;;  %v8136_v44 = vld [vmem:[#allocation10 + $0x100] ss:$16 sps:$4 sm:$0xff]  }
 0xd6e   :  { %2792 = vmatprep.subr.bf16.mxu0 %v8099_v20  ;;  %v8139_v20 = vld [vmem:[#allocation10 + $0x120] ss:$16 sps:$4 sm:$0xff]  }
 0xd71   :  { %2793 = vmatpush1.bf16.msra.mxu0 %v8097_v22  ;;  %v8142_v22 = vld [vmem:[#allocation10 + $0x140] ss:$16 sps:$4 sm:$0xff]  }
 0xd72   :  { %2794 = vmatprep.subr.bf16.mxu0 %v8105_v30  ;;  %v8148_v30 = vld [vmem:[#allocation10 + $0x180] ss:$16 sps:$4 sm:$0xff]  }
 0xd75   :  { %2795 = vmatpush1.bf16.msra.mxu0 %v8103_v29  ;;  %v8150_v29 = vld [vmem:[#allocation10 + $0x184] ss:$16 sps:$4 sm:$0xff]  }
 0xd76   :  { %2796 = vmatprep.subr.bf16.mxu0 %v8111_v32  ;;  %v8151_v32 = vld [vmem:[#allocation10 + $0x1a0] ss:$16 sps:$4 sm:$0xff]  }
 0xd79   :  { %2797 = vmatpush1.bf16.msra.mxu0 %v8109_v35  ;;  %v8154_v35 = vld [vmem:[#allocation10 + $0x1c0] ss:$16 sps:$4 sm:$0xff]  }
 0xdcc   :  { %v2253_v25 = vpop.xlane.xlu1 %2252 }
 0xdcd   :  { %v2258_v49 = vmul.f32 0.00390625, %v2253_v25 }
 0xdce   :  { %v2256_v57 = vpop.xlane.xlu0 %2255 }
 0xdcf   :  { %v9341_v61 = vsub.f32 %v9325_v19, %v2258_v49  ;;  %v9344_v62 = vsub.f32 %v9328_v38, %v2258_v49  ;;  %v2259_v63 = vmul.f32 0.00390625, %v2256_v57 }
 0xdd1   :  { %v9347_v6 = vsub.f32 %v9331_v54, %v2259_v63  ;;  %v9350_v18 = vsub.f32 %v9334_v58, %v2259_v63  ;;  %v2264_v10 = vmul.f32 %v9341_v61, %v9341_v61  ;;  %v2265_v47 = vmul.f32 %v9344_v62, %v9344_v62  ;;  %v8078_v54 = vld [vmem:[#allocation8 + $0x894] ss:$108 sps:$4 sm:$0xff]   ;;  %v8076_v58 = vld [vmem:[#allocation8 + $0x890] ss:$108 sps:$4 sm:$0xff]  }
 0xdd2   :  { %2743 = vmatprep.subr.bf16.mxu1 %v8078_v54  ;;  %v8123_v54 = vld [vmem:[#allocation10 + $0x64] ss:$16 sps:$4 sm:$0xff]  }
 0xdd3   :  { %v2268_v8 = vadd.f32 %v2265_v47, %v2264_v10  ;;  %v2266_v19 = vmul.f32 %v9347_v6, %v9347_v6  ;;  %v2267_v38 = vmul.f32 %v9350_v18, %v9350_v18  ;;  %2744 = vmatpush1.bf16.msra.mxu1 %v8076_v58  ;;  %v8126_v58 = vld [vmem:[#allocation10 + $0x84] ss:$16 sps:$4 sm:$0xff]  }
 0xdd4   :  { %2745 = vmatprep.subr.bf16.mxu1 %v8084_v12  ;;  %v8129_v12 = vld [vmem:[#allocation10 + $0xa4] ss:$16 sps:$4 sm:$0xff]  }
 0xdd5   :  { %2269 = vadd.xlane.f32.xlu0 %v2268_v8  ;;  %v2271_v53 = vadd.f32 %v2267_v38, %v2266_v19  ;;  %v8112_v8 = vld [vmem:[#allocation10] ss:$16 sps:$4 sm:$0xff]   ;;  %v8120_v38 = vld [vmem:[#allocation10 + $0x44] ss:$16 sps:$4 sm:$0xff]  }
 0xdd6   :  { %v8115_v19 = vld [vmem:[#allocation10 + $0x20] ss:$16 sps:$4 sm:$0xff]  }
 0xdd7   :  { %2272 = vadd.xlane.f32.xlu1 %v2271_v53  ;;  %2746 = vmatpush1.bf16.msra.mxu1 %v8082_v14  ;;  %v8118_v53 = vld [vmem:[#allocation10 + $0x40] ss:$16 sps:$4 sm:$0xff]   ;;  %v8132_v14 = vld [vmem:[#allocation10 + $0xc4] ss:$16 sps:$4 sm:$0xff]  }
 0xdd8   :  { %2747 = vmatprep.subr.bf16.mxu1 %v8090_v15  ;;  %v8135_v15 = vld [vmem:[#allocation10 + $0xe4] ss:$16 sps:$4 sm:$0xff]  }
 0xddb   :  { %2748 = vmatpush1.bf16.msra.mxu1 %v8088_v42  ;;  %v8138_v42 = vld [vmem:[#allocation10 + $0x104] ss:$16 sps:$4 sm:$0xff]  }
 0xddc   :  { %2749 = vmatprep.subr.bf16.mxu1 %v8096_v5  ;;  %v8141_v5 = vld [vmem:[#allocation10 + $0x124] ss:$16 sps:$4 sm:$0xff]  }
 0xddf   :  { %2750 = vmatpush1.bf16.msra.mxu1 %v8094_v21  ;;  %v8144_v21 = vld [vmem:[#allocation10 + $0x144] ss:$16 sps:$4 sm:$0xff]  }
 0xde0   :  { %2751 = vmatprep.subr.bf16.mxu1 %v8102_v27  ;;  %v8145_v27 = vld [vmem:[#allocation10 + $0x160] ss:$16 sps:$4 sm:$0xff]  }
 0xde3   :  { %2752 = vmatpush1.bf16.msra.mxu1 %v8100_v26  ;;  %v8147_v26 = vld [vmem:[#allocation10 + $0x164] ss:$16 sps:$4 sm:$0xff]  }
 0xde4   :  { %2753 = vmatprep.subr.bf16.mxu1 %v8108_v31  ;;  %v8153_v31 = vld [vmem:[#allocation10 + $0x1a4] ss:$16 sps:$4 sm:$0xff]  }
 0xde7   :  { %2754 = vmatpush1.bf16.msra.mxu1 %v8106_v34  ;;  %v8156_v34 = vld [vmem:[#allocation10 + $0x1c4] ss:$16 sps:$4 sm:$0xff]  }
 0xde8   :  { %3218 = vmatprep.subr.bf16.mxu1 %v8114_v36  ;;  %v8159_v36 = vld [vmem:[#allocation10 + $0x1e4] ss:$16 sps:$4 sm:$0xff]  }
 0xe62   :  { %v2270_v28 = vpop.xlane.xlu0 %2269 }
 0xe63   :  { %v2274_v37 = vmul.f32 0.00390625, %v2270_v28  ;;  %v8157_v28 = vld [vmem:[#allocation10 + $0x1e0] ss:$16 sps:$4 sm:$0xff]  }
 0xe64   :  { %v2273_v39 = vpop.xlane.xlu1 %2272 }
 0xe65   :  { %v2276_v40 = vadd.f32 1e-05, %v2274_v37  ;;  %v2275_v41 = vmul.f32 0.00390625, %v2273_v39  ;;  %v8162_v37 = vld [vmem:[#allocation10 + $0x204] ss:$16 sps:$4 sm:$0xff]   ;;  %v2393_v39 = vsub.s32 2, %v9059_v2 }
 0xe67   :  { %8688 = vrsqrt.f32 %v2276_v40  ;;  %v2277_v48 = vadd.f32 1e-05, %v2275_v41  ;;  %v2381_v40 = vld [vmem:[#allocation11 + $0x6] ss:$8 sm:$0xf]  ;;  %v2397_v41 = vsub.s32 3, %v9059_v2 }
 0xe68   :  { %v2394_v50 = vrot.slane %v2381_v40, %v2393_v39  ;;  %v2390_v51 = vrot.slane %v2381_v40, %v9065_v4 }
 0xe69   :  { %8690 = vrsqrt.f32 %v2277_v48  ;;  %v2386_v48 = vrot.slane %v2381_v40, %v9062_v3 }
 0xe71   :  { %v8689_v59 = vpop.eup %8688 }
 0xe72   :  { %v2280_v60 = vmul.f32 %v8689_v59, %v9341_v61  ;;  %v2281_v55 = vmul.f32 %v8689_v59, %v9344_v62 }
 0xe73   :  { %v8691_v7 = vpop.eup %8690 }
 0xe74   :  { %v2282_v46 = vmul.f32 %v8691_v7, %v9347_v6  ;;  %v2283_v13 = vmul.f32 %v8691_v7, %v9350_v18  ;;  %v2296_v23 = vmul.f32 %v2292_v56, %v2281_v55  ;;  %v2295_v25 = vmul.f32 %v2288_v52, %v2280_v60  ;;  %v8117_v18 = vld [vmem:[#allocation10 + $0x24] ss:$16 sps:$4 sm:$0xff]  }
 0xe76   :  { %v2298_v49 = vmul.f32 %v2292_v56, %v2283_v13  ;;  %v2297_v57 = vmul.f32 %v2288_v52, %v2282_v46  ;;  %v9368_v63 = vadd.f32 %v2307_v9, %v2296_v23  ;;  %v9372_v61 = vadd.f32 %v2303_v33, %v2295_v25 }
 0xe77   :  { %v2398_v52 = vrot.slane %v2381_v40, %v2397_v41  ;;  %v8192_v40 = vld [vmem:[#allocation10 + $0x344] ss:$16 sps:$4 sm:$0xff]  }
 0xe78   :  { %v9370_v10 = vadd.f32 %v2307_v9, %v2298_v49  ;;  %v9374_v62 = vadd.f32 %v2303_v33, %v2297_v57 }
 0xe7a   :  { %v2315_v47 = vpack.c.bf16 %v9370_v10, %v9368_v63  ;;  %v2314_v6 = vpack.c.bf16 %v9374_v62, %v9372_v61 }
 0xe7c   :  { %2755 = vmatprep.mubr.bf16.mxu1 %v2315_v47  ;;  %2798 = vmatprep.mubr.bf16.mxu0 %v2315_v47 }
 0xe7d   :  { %2756 = vmatmul.mubr.bf16.vlgmr.msra.gmra.mrb[40].mxu1 %v2314_v6  ;;  %2799 = vmatmul.mubr.bf16.vlgmr.msra.gmra.mrb[44].mxu0 %v2314_v6 }
 0xe7e   :  { %3219 = vmatpush1.bf16.msra.mxu1 %v8112_v8 }
 0xe7f   :  { %3220 = vmatprep.subr.bf16.mxu1 %v8117_v18 }
 0xe82   :  { %3221 = vmatpush1.bf16.msra.mxu1 %v8115_v19 }
 0xe83   :  { %3222 = vmatprep.subr.bf16.mxu1 %v8120_v38 }
 0xe86   :  { %3223 = vmatpush1.bf16.msra.mxu1 %v8118_v53 }
 0xe87   :  { %3224 = vmatprep.subr.bf16.mxu1 %v8123_v54 }
 0xe8a   :  { %3225 = vmatpush1.bf16.msra.mxu1 %v8121_v11 }
 0xe8b   :  { %3226 = vmatprep.subr.bf16.mxu1 %v8126_v58 }
 0xe8e   :  { %3227 = vmatpush1.bf16.msra.mxu1 %v8124_v45 }
 0xe8f   :  { %3228 = vmatprep.subr.bf16.mxu1 %v8129_v12 }
 0xe92   :  { %3229 = vmatpush1.bf16.msra.mxu1 %v8127_v0 }
 0xe93   :  { %3230 = vmatprep.subr.bf16.mxu1 %v8132_v14 }
 0xe96   :  { %3231 = vmatpush1.bf16.msra.mxu1 %v8130_v43 }
 0xe97   :  { %3232 = vmatprep.subr.bf16.mxu1 %v8135_v15  ;;  %v8160_v15 = vld [vmem:[#allocation10 + $0x200] ss:$16 sps:$4 sm:$0xff]  }
 0xe9a   :  { %3233 = vmatpush1.bf16.msra.mxu1 %v8133_v17  ;;  %v8165_v17 = vld [vmem:[#allocation10 + $0x224] ss:$16 sps:$4 sm:$0xff]  }
 0xe9b   :  { %3234 = vmatprep.subr.bf16.mxu1 %v8138_v42  ;;  %v8163_v42 = vld [vmem:[#allocation10 + $0x220] ss:$16 sps:$4 sm:$0xff]  }
 0xe9e   :  { %3235 = vmatpush1.bf16.msra.mxu1 %v8136_v44  ;;  %v8168_v44 = vld [vmem:[#allocation10 + $0x244] ss:$16 sps:$4 sm:$0xff]  }
 0xe9f   :  { %3236 = vmatprep.subr.bf16.mxu1 %v8141_v5  ;;  %v8166_v5 = vld [vmem:[#allocation10 + $0x240] ss:$16 sps:$4 sm:$0xff]  }
 0xea2   :  { %3237 = vmatpush1.bf16.msra.mxu1 %v8139_v20  ;;  %v8171_v20 = vld [vmem:[#allocation10 + $0x264] ss:$16 sps:$4 sm:$0xff]  }
 0xea3   :  { %3238 = vmatprep.subr.bf16.mxu1 %v8144_v21  ;;  %v8169_v21 = vld [vmem:[#allocation10 + $0x260] ss:$16 sps:$4 sm:$0xff]  }
 0xea6   :  { %3239 = vmatpush1.bf16.msra.mxu1 %v8142_v22  ;;  %v8174_v22 = vld [vmem:[#allocation10 + $0x284] ss:$16 sps:$4 sm:$0xff]  }
 0xea7   :  { %3240 = vmatprep.subr.bf16.mxu1 %v8147_v26  ;;  %v8172_v26 = vld [vmem:[#allocation10 + $0x280] ss:$16 sps:$4 sm:$0xff]  }
 0xeaa   :  { %3241 = vmatpush1.bf16.msra.mxu1 %v8145_v27  ;;  %v8177_v27 = vld [vmem:[#allocation10 + $0x2a4] ss:$16 sps:$4 sm:$0xff]  }
 0xeab   :  { %3242 = vmatprep.subr.bf16.mxu1 %v8150_v29  ;;  %v8175_v29 = vld [vmem:[#allocation10 + $0x2a0] ss:$16 sps:$4 sm:$0xff]  }
 0xeae   :  { %3243 = vmatpush1.bf16.msra.mxu1 %v8148_v30  ;;  %v8180_v30 = vld [vmem:[#allocation10 + $0x2c4] ss:$16 sps:$4 sm:$0xff]  }
 0xeaf   :  { %3244 = vmatprep.subr.bf16.mxu1 %v8153_v31  ;;  %v8178_v31 = vld [vmem:[#allocation10 + $0x2c0] ss:$16 sps:$4 sm:$0xff]  }
 0xeb2   :  { %3245 = vmatpush1.bf16.msra.mxu1 %v8151_v32  ;;  %v8183_v32 = vld [vmem:[#allocation10 + $0x2e4] ss:$16 sps:$4 sm:$0xff]  }
 0xeb3   :  { %3246 = vmatprep.subr.bf16.mxu1 %v8156_v34  ;;  %v8181_v34 = vld [vmem:[#allocation10 + $0x2e0] ss:$16 sps:$4 sm:$0xff]  }
 0xeb6   :  { %3247 = vmatpush1.bf16.msra.mxu1 %v8154_v35  ;;  %v8186_v35 = vld [vmem:[#allocation10 + $0x304] ss:$16 sps:$4 sm:$0xff]  }
 0xeb7   :  { %3248 = vmatprep.subr.bf16.mxu1 %v8159_v36  ;;  %v8184_v36 = vld [vmem:[#allocation10 + $0x300] ss:$16 sps:$4 sm:$0xff]  }
 0xeba   :  { %3249 = vmatpush1.bf16.msra.mxu1 %v8157_v28  ;;  %v8189_v28 = vld [vmem:[#allocation10 + $0x324] ss:$16 sps:$4 sm:$0xff]  }
 0xebb   :  { %3261 = vmatprep.subr.bf16.mxu1 %v8162_v37  ;;  %v8187_v37 = vld [vmem:[#allocation10 + $0x320] ss:$16 sps:$4 sm:$0xff]  }
 0xf50   :  { %v2757_v56 = vpop.f32.mrb[40].mxu1  ;;  %v2800_v59 = vpop.f32.mrb[44].mxu0 }
 0xf51   :  { %v2758_v60 = vadd.f32 %v2757_v56, %v2386_v48  ;;  %v2801_v55 = vadd.f32 %v2800_v59, %v2394_v50  ;;  %v2759_v7 = vpop.f32.mrb[41].mxu1  ;;  %v2802_v33 = vpop.f32.mrb[45].mxu0  ;;  %v8196_v56 = vld [vmem:[#allocation10 + $0x380] ss:$16 sps:$4 sm:$0xff]   ;;  %v8201_v59 = vld [vmem:[#allocation10 + $0x3a4] ss:$16 sps:$4 sm:$0xff]  }
 0xf52   :  { %v2760_v9 = vadd.f32 %v2759_v7, %v2390_v51  ;;  %v2803_v46 = vadd.f32 %v2802_v33, %v2398_v52  ;;  %v2761_v13 = vpop.f32.mrb[42].mxu1  ;;  %v2804_v23 = vpop.f32.mrb[46].mxu0  ;;  %v8202_v7 = vld [vmem:[#allocation10 + $0x3c0] ss:$16 sps:$4 sm:$0xff]   ;;  %v8207_v33 = vld [vmem:[#allocation10 + $0x3e4] ss:$16 sps:$4 sm:$0xff]  }
 0xf53   :  { %v2762_v25 = vadd.f32 %v2761_v13, %v2386_v48  ;;  %v2805_v49 = vadd.f32 %v2804_v23, %v2394_v50  ;;  %v2763_v57 = vpop.f32.mrb[43].mxu1  ;;  %v2806_v47 = vpop.f32.mrb[47].mxu0  ;;  %v2809_v18 = vmax.f32 %v2758_v60, 0.0  ;;  %v2811_v19 = vmax.f32 %v2801_v55, 0.0  ;;  %v8190_v48 = vld [vmem:[#allocation10 + $0x340] ss:$16 sps:$4 sm:$0xff]  }
 0xf54   :  { %v2764_v6 = vadd.f32 %v2763_v57, %v2390_v51  ;;  %v2807_v8 = vadd.f32 %v2806_v47, %v2398_v52  ;;  %v2810_v54 = vmax.f32 %v2760_v9, 0.0  ;;  %v2812_v11 = vmax.f32 %v2803_v46, 0.0  ;;  %v8195_v50 = vld [vmem:[#allocation10 + $0x364] ss:$16 sps:$4 sm:$0xff]   ;;  %v8193_v51 = vld [vmem:[#allocation10 + $0x360] ss:$16 sps:$4 sm:$0xff]  }
 0xf55   :  { %v2813_v38 = vmax.f32 %v2762_v25, 0.0  ;;  %v2815_v53 = vmax.f32 %v2805_v49, 0.0  ;;  %v8198_v52 = vld [vmem:[#allocation10 + $0x384] ss:$16 sps:$4 sm:$0xff]   ;;  %v8199_v60 = vld [vmem:[#allocation10 + $0x3a0] ss:$16 sps:$4 sm:$0xff]  }
 0xf56   :  { %v2814_v58 = vmax.f32 %v2764_v6, 0.0  ;;  %v2816_v45 = vmax.f32 %v2807_v8, 0.0  ;;  %v8204_v55 = vld [vmem:[#allocation10 + $0x3c4] ss:$16 sps:$4 sm:$0xff]   ;;  %v8205_v9 = vld [vmem:[#allocation10 + $0x3e0] ss:$16 sps:$4 sm:$0xff]  }
 0xf57   :  { %v2817_v12 = vpack.c.bf16 %v2813_v38, %v2809_v18  ;;  %v9388_v0 = vpack.c.bf16 %v2815_v53, %v2811_v19  ;;  %v2886_v46 = vld [vmem:[#allocation11 + $0x7] ss:$8 sm:$0x3] }
 0xf58   :  { %v2818_v14 = vpack.c.bf16 %v2814_v58, %v2810_v54  ;;  %v2820_v43 = vpack.c.bf16 %v2816_v45, %v2812_v11  ;;  %v2891_v13 = vrot.slane %v2886_v46, %v9062_v3  ;;  %v2895_v23 = vrot.slane %v2886_v46, %v9065_v4  ;;  %v8208_v45 = vld [vmem:[#allocation8 + $0x30] ss:$108 sps:$4 sm:$0xff]   ;;  %v8265_v46 = vld [vmem:[#allocation8 + $0x7d8] ss:$108 sps:$4 sm:$0xff]  }
 0xf5a   :  { %3250 = vmatprep.mubr.bf16.mxu1 %v2818_v14  ;;  %v8216_v14 = vld [vmem:[#allocation8 + $0x10c] ss:$108 sps:$4 sm:$0xff]  }
 0xf5b   :  { %3251 = vmatmul.mubr.bf16.vlgmr.msra.gmra.mrb[44].mxu1 %v2817_v12  ;;  %v8210_v12 = vld [vmem:[#allocation8 + $0x34] ss:$108 sps:$4 sm:$0xff]  }
 0xf5c   :  { %3262 = vmatpush1.bf16.msra.mxu1 %v8160_v15  ;;  %3293 = vmatprep.mubr.bf16.mxu1 %v2820_v43  ;;  %v8219_v43 = vld [vmem:[#allocation8 + $0x11c] ss:$108 sps:$4 sm:$0xff]   ;;  %v8222_v15 = vld [vmem:[#allocation8 + $0x1e4] ss:$108 sps:$4 sm:$0xff]  }
 0xf5d   :  { %3263 = vmatprep.subr.bf16.mxu1 %v8165_v17  ;;  %3581 = vmatprep.subr.bf16.mxu0 %v8210_v12  ;;  %v8225_v17 = vld [vmem:[#allocation8 + $0x1f4] ss:$108 sps:$4 sm:$0xff]   ;;  %v8271_v12 = vld [vmem:[#allocation8 + $0x8b0] ss:$108 sps:$4 sm:$0xff]  }
 0xf5e   :  { %3582 = vmatpush1.bf16.msra.mxu0 %v8208_v45  ;;  %v8268_v45 = vld [vmem:[#allocation8 + $0x8a0] ss:$108 sps:$4 sm:$0xff]  }
 0xf5f   :  { %3583 = vmatprep.subr.bf16.mxu0 %v8216_v14  ;;  %v8279_v14 = vld [vmem:[#allocation8 + $0x98c] ss:$108 sps:$4 sm:$0xff]  }
 0xf60   :  { %3264 = vmatpush1.bf16.msra.mxu1 %v8163_v42  ;;  %v8220_v42 = vld [vmem:[#allocation8 + $0x1e0] ss:$108 sps:$4 sm:$0xff]  }
 0xf61   :  { %3265 = vmatprep.subr.bf16.mxu1 %v8168_v44  ;;  %v8223_v44 = vld [vmem:[#allocation8 + $0x1f0] ss:$108 sps:$4 sm:$0xff]  }
 0xf64   :  { %3266 = vmatpush1.bf16.msra.mxu1 %v8166_v5  ;;  %v8228_v5 = vld [vmem:[#allocation8 + $0x2bc] ss:$108 sps:$4 sm:$0xff]  }
 0xf65   :  { %3267 = vmatprep.subr.bf16.mxu1 %v8171_v20  ;;  %v8231_v20 = vld [vmem:[#allocation8 + $0x2cc] ss:$108 sps:$4 sm:$0xff]  }
 0xf68   :  { %3268 = vmatpush1.bf16.msra.mxu1 %v8169_v21  ;;  %v8226_v21 = vld [vmem:[#allocation8 + $0x2b8] ss:$108 sps:$4 sm:$0xff]  }
 0xf69   :  { %3269 = vmatprep.subr.bf16.mxu1 %v8174_v22  ;;  %v8229_v22 = vld [vmem:[#allocation8 + $0x2c8] ss:$108 sps:$4 sm:$0xff]  }
 0xf6c   :  { %3270 = vmatpush1.bf16.msra.mxu1 %v8172_v26  ;;  %v8234_v26 = vld [vmem:[#allocation8 + $0x394] ss:$108 sps:$4 sm:$0xff]  }
 0xf6d   :  { %3271 = vmatprep.subr.bf16.mxu1 %v8177_v27  ;;  %v8237_v27 = vld [vmem:[#allocation8 + $0x3a4] ss:$108 sps:$4 sm:$0xff]  }
 0xf70   :  { %3272 = vmatpush1.bf16.msra.mxu1 %v8175_v29  ;;  %v8232_v29 = vld [vmem:[#allocation8 + $0x390] ss:$108 sps:$4 sm:$0xff]  }
 0xf71   :  { %3273 = vmatprep.subr.bf16.mxu1 %v8180_v30  ;;  %v8235_v30 = vld [vmem:[#allocation8 + $0x3a0] ss:$108 sps:$4 sm:$0xff]  }
 0xf74   :  { %3274 = vmatpush1.bf16.msra.mxu1 %v8178_v31  ;;  %v8240_v31 = vld [vmem:[#allocation8 + $0x46c] ss:$108 sps:$4 sm:$0xff]  }
 0xf75   :  { %3275 = vmatprep.subr.bf16.mxu1 %v8183_v32  ;;  %v8243_v32 = vld [vmem:[#allocation8 + $0x47c] ss:$108 sps:$4 sm:$0xff]  }
 0xf78   :  { %3276 = vmatpush1.bf16.msra.mxu1 %v8181_v34  ;;  %v8238_v34 = vld [vmem:[#allocation8 + $0x468] ss:$108 sps:$4 sm:$0xff]  }
 0xf79   :  { %3277 = vmatprep.subr.bf16.mxu1 %v8186_v35  ;;  %v8241_v35 = vld [vmem:[#allocation8 + $0x478] ss:$108 sps:$4 sm:$0xff]  }
 0xf7c   :  { %3278 = vmatpush1.bf16.msra.mxu1 %v8184_v36  ;;  %v8246_v36 = vld [vmem:[#allocation8 + $0x544] ss:$108 sps:$4 sm:$0xff]  }
 0xf7d   :  { %3279 = vmatprep.subr.bf16.mxu1 %v8189_v28  ;;  %v8249_v28 = vld [vmem:[#allocation8 + $0x554] ss:$108 sps:$4 sm:$0xff]  }
 0xf80   :  { %3280 = vmatpush1.bf16.msra.mxu1 %v8187_v37  ;;  %v8244_v37 = vld [vmem:[#allocation8 + $0x540] ss:$108 sps:$4 sm:$0xff]  }
 0xf81   :  { %3281 = vmatprep.subr.bf16.mxu1 %v8192_v40  ;;  %v8247_v40 = vld [vmem:[#allocation8 + $0x550] ss:$108 sps:$4 sm:$0xff]  }
 0xf84   :  { %3282 = vmatpush1.bf16.msra.mxu1 %v8190_v48  ;;  %v8252_v48 = vld [vmem:[#allocation8 + $0x61c] ss:$108 sps:$4 sm:$0xff]  }
 0xf85   :  { %3283 = vmatprep.subr.bf16.mxu1 %v8195_v50  ;;  %v8255_v50 = vld [vmem:[#allocation8 + $0x62c] ss:$108 sps:$4 sm:$0xff]  }
 0xf88   :  { %3284 = vmatpush1.bf16.msra.mxu1 %v8193_v51  ;;  %v8250_v51 = vld [vmem:[#allocation8 + $0x618] ss:$108 sps:$4 sm:$0xff]  }
 0xf89   :  { %3285 = vmatprep.subr.bf16.mxu1 %v8198_v52  ;;  %v8253_v52 = vld [vmem:[#allocation8 + $0x628] ss:$108 sps:$4 sm:$0xff]  }
 0xf8c   :  { %3286 = vmatpush1.bf16.msra.mxu1 %v8196_v56  ;;  %v8258_v56 = vld [vmem:[#allocation8 + $0x6f4] ss:$108 sps:$4 sm:$0xff]  }
 0xf8d   :  { %3287 = vmatprep.subr.bf16.mxu1 %v8201_v59  ;;  %v8261_v59 = vld [vmem:[#allocation8 + $0x704] ss:$108 sps:$4 sm:$0xff]  }
 0xf90   :  { %3288 = vmatpush1.bf16.msra.mxu1 %v8199_v60  ;;  %v8256_v60 = vld [vmem:[#allocation8 + $0x6f0] ss:$108 sps:$4 sm:$0xff]  }
 0xf91   :  { %3289 = vmatprep.subr.bf16.mxu1 %v8204_v55  ;;  %v8259_v55 = vld [vmem:[#allocation8 + $0x700] ss:$108 sps:$4 sm:$0xff]  }
 0xf94   :  { %3290 = vmatpush1.bf16.msra.mxu1 %v8202_v7  ;;  %v8264_v7 = vld [vmem:[#allocation8 + $0x7cc] ss:$108 sps:$4 sm:$0xff]  }
 0xf95   :  { %3291 = vmatprep.subr.bf16.mxu1 %v8207_v33  ;;  %v8267_v33 = vld [vmem:[#allocation8 + $0x7dc] ss:$108 sps:$4 sm:$0xff]  }
 0xf98   :  { %3292 = vmatpush1.bf16.msra.mxu1 %v8205_v9  ;;  %v8262_v9 = vld [vmem:[#allocation8 + $0x7c8] ss:$108 sps:$4 sm:$0xff]  }
 0xf9b   :  { %3294 = vmatmul.mubr.bf16.vlgmr.msra.gmra.mrb[44].mxu1 %v9388_v0  ;;  %v8211_v0 = vld [vmem:[#allocation8 + $0x40] ss:$108 sps:$4 sm:$0xff]  }
0x106e   :  { %v3295_v25 = vpop.f32.mrb[44].mxu1 }
0x106f   :  { %v7766_v49 = vadd.f32 %v3295_v25, %v2891_v13  ;;  %v3297_v57 = vpop.f32.mrb[45].mxu1 }
0x1070   :  { %v7767_v47 = vadd.f32 %v3297_v57, %v2895_v23  ;;  %v3299_v6 = vpop.f32.mrb[46].mxu1 }
0x1071   :  { %v9394_v8 = vadd.f32 %v7766_v49, %v9372_v61  ;;  %v7768_v18 = vadd.f32 %v3299_v6, %v2891_v13  ;;  %v3301_v19 = vpop.f32.mrb[47].mxu1 }
0x1072   :  { %v9397_v38 = vadd.f32 %v7767_v47, %v9368_v63  ;;  %v7769_v53 = vadd.f32 %v3301_v19, %v2895_v23  ;;  %v8213_v63 = vld [vmem:[#allocation8 + $0x44] ss:$108 sps:$4 sm:$0xff]  }
0x1073   :  { %v9400_v54 = vadd.f32 %v7768_v18, %v9374_v62  ;;  %4077 = vmatprep.subr.bf16.mxu1 %v8213_v63  ;;  %v8214_v62 = vld [vmem:[#allocation8 + $0x108] ss:$108 sps:$4 sm:$0xff]   ;;  %v8274_v63 = vld [vmem:[#allocation8 + $0x978] ss:$108 sps:$4 sm:$0xff]  }
0x1074   :  { %v9403_v11 = vadd.f32 %v7769_v53, %v9370_v10  ;;  %v3312_v58 = vadd.f32 %v9397_v38, %v9394_v8  ;;  %4078 = vmatpush1.bf16.msra.mxu1 %v8211_v0  ;;  %v8217_v10 = vld [vmem:[#allocation8 + $0x118] ss:$108 sps:$4 sm:$0xff]   ;;  %3584 = vmatpush1.bf16.msra.mxu0 %v8214_v62  ;;  %v8276_v0 = vld [vmem:[#allocation8 + $0x97c] ss:$108 sps:$4 sm:$0xff]   ;;  %v8282_v62 = vld [vmem:[#allocation8 + $0xa54] ss:$108 sps:$4 sm:$0xff]  }
0x1075   :  { %4079 = vmatprep.subr.bf16.mxu1 %v8219_v43  ;;  %3585 = vmatprep.subr.bf16.mxu0 %v8222_v15  ;;  %v8277_v43 = vld [vmem:[#allocation8 + $0x988] ss:$108 sps:$4 sm:$0xff]   ;;  %v8285_v15 = vld [vmem:[#allocation8 + $0xa64] ss:$108 sps:$4 sm:$0xff]  }
0x1076   :  { %3313 = vadd.xlane.f32.xlu0 %v3312_v58  ;;  %v3315_v61 = vadd.f32 %v9403_v11, %v9400_v54 }
0x1078   :  { %3316 = vadd.xlane.f32.xlu1 %v3315_v61  ;;  %4080 = vmatpush1.bf16.msra.mxu1 %v8217_v10  ;;  %v8280_v10 = vld [vmem:[#allocation8 + $0xa50] ss:$108 sps:$4 sm:$0xff]  }
0x1079   :  { %4081 = vmatprep.subr.bf16.mxu1 %v8225_v17  ;;  %3586 = vmatpush1.bf16.msra.mxu0 %v8220_v42  ;;  %v8283_v17 = vld [vmem:[#allocation8 + $0xa60] ss:$108 sps:$4 sm:$0xff]  }
0x107a   :  { %3587 = vmatprep.subr.bf16.mxu0 %v8228_v5  ;;  %v8288_v42 = vld [vmem:[#allocation8 + $0xb2c] ss:$108 sps:$4 sm:$0xff]   ;;  %v8291_v5 = vld [vmem:[#allocation8 + $0xb3c] ss:$108 sps:$4 sm:$0xff]  }
0x107c   :  { %4082 = vmatpush1.bf16.msra.mxu1 %v8223_v44  ;;  %v8286_v44 = vld [vmem:[#allocation8 + $0xb28] ss:$108 sps:$4 sm:$0xff]  }
0x107d   :  { %4083 = vmatprep.subr.bf16.mxu1 %v8231_v20  ;;  %3588 = vmatpush1.bf16.msra.mxu0 %v8226_v21  ;;  %v8289_v20 = vld [vmem:[#allocation8 + $0xb38] ss:$108 sps:$4 sm:$0xff]  }
0x107e   :  { %3589 = vmatprep.subr.bf16.mxu0 %v8234_v26  ;;  %v8294_v21 = vld [vmem:[#allocation8 + $0xc04] ss:$108 sps:$4 sm:$0xff]   ;;  %v8297_v26 = vld [vmem:[#allocation8 + $0xc14] ss:$108 sps:$4 sm:$0xff]  }
0x1080   :  { %4084 = vmatpush1.bf16.msra.mxu1 %v8229_v22  ;;  %v8292_v22 = vld [vmem:[#allocation8 + $0xc00] ss:$108 sps:$4 sm:$0xff]  }
0x1081   :  { %4085 = vmatprep.subr.bf16.mxu1 %v8237_v27  ;;  %3590 = vmatpush1.bf16.msra.mxu0 %v8232_v29  ;;  %v8295_v27 = vld [vmem:[#allocation8 + $0xc10] ss:$108 sps:$4 sm:$0xff]  }
0x1082   :  { %3591 = vmatprep.subr.bf16.mxu0 %v8240_v31  ;;  %v8300_v29 = vld [vmem:[#allocation8 + $0xcdc] ss:$108 sps:$4 sm:$0xff]   ;;  %v8303_v31 = vld [vmem:[#allocation8 + $0xcec] ss:$108 sps:$4 sm:$0xff]  }
0x1084   :  { %4086 = vmatpush1.bf16.msra.mxu1 %v8235_v30  ;;  %v8298_v30 = vld [vmem:[#allocation8 + $0xcd8] ss:$108 sps:$4 sm:$0xff]  }
0x1085   :  { %4087 = vmatprep.subr.bf16.mxu1 %v8243_v32  ;;  %3592 = vmatpush1.bf16.msra.mxu0 %v8238_v34  ;;  %v8301_v32 = vld [vmem:[#allocation8 + $0xce8] ss:$108 sps:$4 sm:$0xff]  }
0x1086   :  { %3593 = vmatprep.subr.bf16.mxu0 %v8246_v36  ;;  %v8306_v34 = vld [vmem:[#allocation8 + $0x3c] ss:$108 sps:$4 sm:$0xff]  }
0x1088   :  { %4088 = vmatpush1.bf16.msra.mxu1 %v8241_v35 }
0x1089   :  { %4089 = vmatprep.subr.bf16.mxu1 %v8249_v28  ;;  %3594 = vmatpush1.bf16.msra.mxu0 %v8244_v37 }
0x108a   :  { %3595 = vmatprep.subr.bf16.mxu0 %v8252_v48 }
0x108c   :  { %4090 = vmatpush1.bf16.msra.mxu1 %v8247_v40 }
0x108d   :  { %4091 = vmatprep.subr.bf16.mxu1 %v8255_v50  ;;  %3596 = vmatpush1.bf16.msra.mxu0 %v8250_v51  ;;  %v3309_v50 = vld [vmem:[#allocation11 + $0x20] ss:$8 sm:$0x3]  ;;  %v3311_v51 = vld [vmem:[#allocation11 + $0x21] ss:$8 sm:$0x3] }
0x108e   :  { %3597 = vmatprep.subr.bf16.mxu0 %v8258_v56  ;;  %v3352_v56 = vrot.slane %v3309_v50, %v9065_v4 }
0x1090   :  { %4092 = vmatpush1.bf16.msra.mxu1 %v8253_v52  ;;  %v3348_v52 = vrot.slane %v3309_v50, %v9062_v3 }
0x1091   :  { %4093 = vmatprep.subr.bf16.mxu1 %v8261_v59  ;;  %3598 = vmatpush1.bf16.msra.mxu0 %v8256_v60 }
0x1092   :  { %3599 = vmatprep.subr.bf16.mxu0 %v8264_v7 }
0x1094   :  { %4094 = vmatpush1.bf16.msra.mxu1 %v8259_v55 }
0x1095   :  { %4095 = vmatprep.subr.bf16.mxu1 %v8267_v33  ;;  %3600 = vmatpush1.bf16.msra.mxu0 %v8262_v9  ;;  %v3363_v33 = vrot.slane %v3311_v51, %v9062_v3  ;;  %v3367_v9 = vrot.slane %v3311_v51, %v9065_v4 }
0x1098   :  { %4096 = vmatpush1.bf16.msra.mxu1 %v8265_v46 }
0x1103   :  { %v3314_v13 = vpop.xlane.xlu0 %3313 }
0x1104   :  { %v3318_v23 = vmul.f32 0.00390625, %v3314_v13 }
0x1105   :  { %v3317_v25 = vpop.xlane.xlu1 %3316 }
0x1106   :  { %v9410_v49 = vsub.f32 %v9394_v8, %v3318_v23  ;;  %v9413_v57 = vsub.f32 %v9397_v38, %v3318_v23  ;;  %v3319_v47 = vmul.f32 0.00390625, %v3317_v25 }
0x1108   :  { %v9416_v6 = vsub.f32 %v9400_v54, %v3319_v47  ;;  %v9419_v18 = vsub.f32 %v9403_v11, %v3319_v47  ;;  %v3324_v19 = vmul.f32 %v9410_v49, %v9410_v49  ;;  %v3325_v53 = vmul.f32 %v9413_v57, %v9413_v57  ;;  %v8270_v54 = vld [vmem:[#allocation8 + $0x8a4] ss:$108 sps:$4 sm:$0xff]   ;;  %v8273_v11 = vld [vmem:[#allocation8 + $0x8b4] ss:$108 sps:$4 sm:$0xff]  }
0x1109   :  { %3601 = vmatprep.subr.bf16.mxu0 %v8270_v54  ;;  %4097 = vmatprep.subr.bf16.mxu1 %v8273_v11  ;;  %v8312_v54 = vld [vmem:[#allocation8 + $0x1ec] ss:$108 sps:$4 sm:$0xff]   ;;  %v8315_v11 = vld [vmem:[#allocation8 + $0x2c4] ss:$108 sps:$4 sm:$0xff]  }
0x110a   :  { %v3328_v58 = vadd.f32 %v3325_v53, %v3324_v19  ;;  %v3326_v8 = vmul.f32 %v9416_v6, %v9416_v6  ;;  %v3327_v38 = vmul.f32 %v9419_v18, %v9419_v18  ;;  %3602 = vmatpush1.bf16.msra.mxu0 %v8268_v45  ;;  %4098 = vmatpush1.bf16.msra.mxu1 %v8271_v12  ;;  %v8310_v45 = vld [vmem:[#allocation8 + $0x1e8] ss:$108 sps:$4 sm:$0xff]   ;;  %v8313_v12 = vld [vmem:[#allocation8 + $0x2c0] ss:$108 sps:$4 sm:$0xff]  }
0x110b   :  { %3603 = vmatprep.subr.bf16.mxu0 %v8276_v0  ;;  %4099 = vmatprep.subr.bf16.mxu1 %v8279_v14  ;;  %v8318_v0 = vld [vmem:[#allocation8 + $0x39c] ss:$108 sps:$4 sm:$0xff]   ;;  %v8321_v14 = vld [vmem:[#allocation8 + $0x474] ss:$108 sps:$4 sm:$0xff]  }
0x110c   :  { %3329 = vadd.xlane.f32.xlu0 %v3328_v58  ;;  %v3331_v61 = vadd.f32 %v3327_v38, %v3326_v8  ;;  %v8304_v38 = vld [vmem:[#allocation8 + $0x38] ss:$108 sps:$4 sm:$0xff]  }
0x110e   :  { %3332 = vadd.xlane.f32.xlu1 %v3331_v61  ;;  %3604 = vmatpush1.bf16.msra.mxu0 %v8274_v63  ;;  %v8307_v61 = vld [vmem:[#allocation8 + $0x110] ss:$108 sps:$4 sm:$0xff]   ;;  %v8316_v63 = vld [vmem:[#allocation8 + $0x398] ss:$108 sps:$4 sm:$0xff]  }
0x110f   :  { %4100 = vmatpush1.bf16.msra.mxu1 %v8277_v43  ;;  %3605 = vmatprep.subr.bf16.mxu0 %v8282_v62  ;;  %v8319_v43 = vld [vmem:[#allocation8 + $0x470] ss:$108 sps:$4 sm:$0xff]   ;;  %v8324_v62 = vld [vmem:[#allocation8 + $0x54c] ss:$108 sps:$4 sm:$0xff]  }
0x1110   :  { %4101 = vmatprep.subr.bf16.mxu1 %v8285_v15  ;;  %v8327_v15 = vld [vmem:[#allocation8 + $0x624] ss:$108 sps:$4 sm:$0xff]  }
0x1112   :  { %3606 = vmatpush1.bf16.msra.mxu0 %v8280_v10  ;;  %v8322_v10 = vld [vmem:[#allocation8 + $0x548] ss:$108 sps:$4 sm:$0xff]  }
0x1113   :  { %4102 = vmatpush1.bf16.msra.mxu1 %v8283_v17  ;;  %3607 = vmatprep.subr.bf16.mxu0 %v8288_v42  ;;  %v8325_v17 = vld [vmem:[#allocation8 + $0x620] ss:$108 sps:$4 sm:$0xff]   ;;  %v8330_v42 = vld [vmem:[#allocation8 + $0x6fc] ss:$108 sps:$4 sm:$0xff]  }
0x1114   :  { %4103 = vmatprep.subr.bf16.mxu1 %v8291_v5  ;;  %v8333_v5 = vld [vmem:[#allocation8 + $0x7d4] ss:$108 sps:$4 sm:$0xff]  }
0x1116   :  { %3608 = vmatpush1.bf16.msra.mxu0 %v8286_v44  ;;  %v8328_v44 = vld [vmem:[#allocation8 + $0x6f8] ss:$108 sps:$4 sm:$0xff]  }
0x1117   :  { %4104 = vmatpush1.bf16.msra.mxu1 %v8289_v20  ;;  %3609 = vmatprep.subr.bf16.mxu0 %v8294_v21  ;;  %v8331_v20 = vld [vmem:[#allocation8 + $0x7d0] ss:$108 sps:$4 sm:$0xff]   ;;  %v8336_v21 = vld [vmem:[#allocation8 + $0x8ac] ss:$108 sps:$4 sm:$0xff]  }
0x1118   :  { %4105 = vmatprep.subr.bf16.mxu1 %v8297_v26  ;;  %v8339_v26 = vld [vmem:[#allocation8 + $0x984] ss:$108 sps:$4 sm:$0xff]  }
0x111a   :  { %3610 = vmatpush1.bf16.msra.mxu0 %v8292_v22  ;;  %v8334_v22 = vld [vmem:[#allocation8 + $0x8a8] ss:$108 sps:$4 sm:$0xff]  }
0x111b   :  { %4106 = vmatpush1.bf16.msra.mxu1 %v8295_v27  ;;  %3611 = vmatprep.subr.bf16.mxu0 %v8300_v29  ;;  %v8337_v27 = vld [vmem:[#allocation8 + $0x980] ss:$108 sps:$4 sm:$0xff]   ;;  %v8342_v29 = vld [vmem:[#allocation8 + $0xa5c] ss:$108 sps:$4 sm:$0xff]  }
0x111c   :  { %4107 = vmatprep.subr.bf16.mxu1 %v8303_v31  ;;  %v8345_v31 = vld [vmem:[#allocation8 + $0xb34] ss:$108 sps:$4 sm:$0xff]  }
0x111e   :  { %3612 = vmatpush1.bf16.msra.mxu0 %v8298_v30  ;;  %v8340_v30 = vld [vmem:[#allocation8 + $0xa58] ss:$108 sps:$4 sm:$0xff]  }
0x111f   :  { %4108 = vmatpush1.bf16.msra.mxu1 %v8301_v32  ;;  %3829 = vmatprep.subr.bf16.mxu0 %v8306_v34  ;;  %v8343_v32 = vld [vmem:[#allocation8 + $0xb30] ss:$108 sps:$4 sm:$0xff]   ;;  %v8348_v34 = vld [vmem:[#allocation8 + $0xc0c] ss:$108 sps:$4 sm:$0xff]  }
0x1120   :  { %7644 = vmatprep.subr.bf16.mxu1 %v8916_v1 }
0x1199   :  { %v3330_v35 = vpop.xlane.xlu0 %3329 }
0x119a   :  { %v3334_v36 = vmul.f32 0.00390625, %v3330_v35  ;;  %v8346_v35 = vld [vmem:[#allocation8 + $0xc08] ss:$108 sps:$4 sm:$0xff]  }
0x119b   :  { %v3333_v28 = vpop.xlane.xlu1 %3332 }
0x119c   :  { %v3336_v37 = vadd.f32 1e-05, %v3334_v36  ;;  %v3335_v40 = vmul.f32 0.00390625, %v3333_v28  ;;  %v8351_v36 = vld [vmem:[#allocation8 + $0xce4] ss:$108 sps:$4 sm:$0xff]  }
0x119d   :  { %v8349_v28 = vld [vmem:[#allocation8 + $0xce0] ss:$108 sps:$4 sm:$0xff]  }
0x119e   :  { %8692 = vrsqrt.f32 %v3336_v37  ;;  %v3337_v48 = vadd.f32 1e-05, %v3335_v40  ;;  %v3905_v37 = vld [vmem:[#allocation11 + $0x24] ss:$8 sm:$0x3] }
0x119f   :  { %v3914_v40 = vrot.slane %v3905_v37, %v9065_v4 }
0x11a0   :  { %8694 = vrsqrt.f32 %v3337_v48 }
0x11a8   :  { %v8693_v59 = vpop.eup %8692 }
0x11a9   :  { %v3340_v60 = vmul.f32 %v8693_v59, %v9410_v49  ;;  %v3341_v55 = vmul.f32 %v8693_v59, %v9413_v57 }
0x11aa   :  { %v8695_v7 = vpop.eup %8694 }
0x11ab   :  { %v3342_v46 = vmul.f32 %v8695_v7, %v9416_v6  ;;  %v3343_v13 = vmul.f32 %v8695_v7, %v9419_v18  ;;  %v3356_v23 = vmul.f32 %v3352_v56, %v3341_v55  ;;  %v3355_v25 = vmul.f32 %v3348_v52, %v3340_v60  ;;  %v8309_v18 = vld [vmem:[#allocation8 + $0x114] ss:$108 sps:$4 sm:$0xff]  }
0x11ad   :  { %v3358_v47 = vmul.f32 %v3352_v56, %v3343_v13  ;;  %v3357_v19 = vmul.f32 %v3348_v52, %v3342_v46  ;;  %v9438_v53 = vadd.f32 %v3367_v9, %v3356_v23  ;;  %v9442_v49 = vadd.f32 %v3363_v33, %v3355_v25  ;;  %v9471_v23 = vld [vmem:[#allocation11 + $0x22] ss:$8 sm:$0x3] }
0x11af   :  { %v9440_v58 = vadd.f32 %v3367_v9, %v3358_v47  ;;  %v9444_v57 = vadd.f32 %v3363_v33, %v3357_v19  ;;  %v3657_v9 = vld [vmem:[#allocation11 + $0x23] ss:$8 sm:$0x3]  ;;  %v3910_v47 = vrot.slane %v3905_v37, %v9062_v3 }
0x11b0   :  { %v3662_v46 = vrot.slane %v3657_v9, %v9062_v3  ;;  %v3666_v13 = vrot.slane %v3657_v9, %v9065_v4 }
0x11b1   :  { %v3375_v8 = vpack.c.bf16 %v9440_v58, %v9438_v53  ;;  %v9450_v6 = vpack.c.bf16 %v9444_v57, %v9442_v49 }
0x11b3   :  { %3613 = vmatprep.mubr.bf16.mxu0 %v3375_v8  ;;  %4109 = vmatprep.mubr.bf16.mxu1 %v3375_v8 }
0x11b4   :  { %3614 = vmatmul.mubr.bf16.vlgmr.msra.gmra.mrb[48].mxu0 %v9450_v6  ;;  %4110 = vmatmul.mubr.bf16.vlgmr.msra.gmra.mrb[48].mxu1 %v9450_v6 }
0x11b5   :  { %3830 = vmatpush1.bf16.msra.mxu0 %v8304_v38  ;;  %3861 = vmatprep.mubr.bf16.mxu0 %v3375_v8 }
0x11b6   :  { %3831 = vmatprep.subr.bf16.mxu0 %v8309_v18  ;;  %7646 = vmatprep.mubr.msk.bf16.mxu1 %vm8918_vm2, %v8916_v1  ;;  %v3414_v18 = vrot.slane %v9471_v23, %v9062_v3 }
0x11b9   :  { %3832 = vmatpush1.bf16.msra.mxu0 %v8307_v61 }
0x11ba   :  { %3833 = vmatprep.subr.bf16.mxu0 %v8312_v54 }
0x11bd   :  { %3834 = vmatpush1.bf16.msra.mxu0 %v8310_v45 }
0x11be   :  { %3835 = vmatprep.subr.bf16.mxu0 %v8315_v11 }
0x11c1   :  { %3836 = vmatpush1.bf16.msra.mxu0 %v8313_v12 }
0x11c2   :  { %3837 = vmatprep.subr.bf16.mxu0 %v8318_v0 }
0x11c5   :  { %3838 = vmatpush1.bf16.msra.mxu0 %v8316_v63 }
0x11c6   :  { %3839 = vmatprep.subr.bf16.mxu0 %v8321_v14 }
0x11c9   :  { %3840 = vmatpush1.bf16.msra.mxu0 %v8319_v43 }
0x11ca   :  { %3841 = vmatprep.subr.bf16.mxu0 %v8324_v62 }
0x11cd   :  { %3842 = vmatpush1.bf16.msra.mxu0 %v8322_v10 }
0x11ce   :  { %3843 = vmatprep.subr.bf16.mxu0 %v8327_v15 }
0x11d1   :  { %3844 = vmatpush1.bf16.msra.mxu0 %v8325_v17 }
0x11d2   :  { %3845 = vmatprep.subr.bf16.mxu0 %v8330_v42 }
0x11d5   :  { %3846 = vmatpush1.bf16.msra.mxu0 %v8328_v44 }
0x11d6   :  { %3847 = vmatprep.subr.bf16.mxu0 %v8333_v5 }
0x11d9   :  { %3848 = vmatpush1.bf16.msra.mxu0 %v8331_v20 }
0x11da   :  { %3849 = vmatprep.subr.bf16.mxu0 %v8336_v21 }
0x11dd   :  { %3850 = vmatpush1.bf16.msra.mxu0 %v8334_v22 }
0x11de   :  { %3851 = vmatprep.subr.bf16.mxu0 %v8339_v26 }
0x11e1   :  { %3852 = vmatpush1.bf16.msra.mxu0 %v8337_v27 }
0x11e2   :  { %3853 = vmatprep.subr.bf16.mxu0 %v8342_v29 }
0x11e5   :  { %3854 = vmatpush1.bf16.msra.mxu0 %v8340_v30 }
0x11e6   :  { %3855 = vmatprep.subr.bf16.mxu0 %v8345_v31 }
0x11e9   :  { %3856 = vmatpush1.bf16.msra.mxu0 %v8343_v32 }
0x11ea   :  { %3857 = vmatprep.subr.bf16.mxu0 %v8348_v34 }
0x11ed   :  { %3858 = vmatpush1.bf16.msra.mxu0 %v8346_v35 }
0x11ee   :  { %3859 = vmatprep.subr.bf16.mxu0 %v8351_v36 }
0x11f1   :  { %3860 = vmatpush1.bf16.msra.mxu0 %v8349_v28 }
0x11f2   :  { %7638 = vmatprep.subr.bf16.mxu0 %v8916_v1 }
0x11f4   :  { %3862 = vmatmul.mubr.bf16.vlgmr.msra.gmra.mrb[52].mxu0 %v9450_v6 }
0x11f5   :  { %7640 = vmatprep.mubr.msk.bf16.mxu0 %vm8918_vm2, %v8916_v1 }
0x1287   :  { %v3615_v48 = vpop.f32.mrb[48].mxu0  ;;  %v4111_v50 = vpop.f32.mrb[48].mxu1 }
0x1288   :  { %v9461_v51 = vpop.f32.mrb[49].mxu0  ;;  %v4113_v52 = vpop.f32.mrb[49].mxu1  ;;  %v4112_v12 = vadd.f32 %v4111_v50, %v3910_v47  ;;  %v3616_v14 = vadd.f32 %v3615_v48, %v3414_v18 }
0x1289   :  { %v9463_v56 = vadd.f32 %v4113_v52, %v3914_v40  ;;  %v3619_v59 = vpop.f32.mrb[50].mxu0  ;;  %v4115_v60 = vpop.f32.mrb[50].mxu1 }
0x128a   :  { %v9465_v55 = vpop.f32.mrb[51].mxu0  ;;  %v4117_v7 = vpop.f32.mrb[51].mxu1  ;;  %v4116_v43 = vadd.f32 %v4115_v60, %v3910_v47  ;;  %v9483_v10 = vpack.c.bf16 %v4112_v12, %v4112_v12  ;;  %v3620_v15 = vadd.f32 %v3619_v59, %v3414_v18  ;;  %v4120_v17 = vpack.c.bf16 %v3616_v14, %v3616_v14 }
0x128b   :  { %v9467_v33 = vadd.f32 %v4117_v7, %v3914_v40 }
0x128c   :  { %v9486_v42 = vpack.c.bf16 %v4116_v43, %v4116_v43  ;;  %v4252_v44 = vsel %vm1223_vm4, %v9483_v10, 0  ;;  %v4122_v5 = vpack.c.bf16 %v3620_v15, %v3620_v15 }
0x128e   :  { %v4298_v20 = vsel %vm1223_vm4, %v9486_v42, 0 }
0x12c7   :  { %v3863_v25 = vpop.f32.mrb[52].mxu0 }
0x12c8   :  { %v3864_v19 = vadd.f32 %v3863_v25, %v3662_v46  ;;  %v3865_v8 = vpop.f32.mrb[53].mxu0 }
0x12c9   :  { %v9474_v38 = vadd.f32 %v3865_v8, %v3666_v13  ;;  %v3867_v6 = vpop.f32.mrb[54].mxu0 }
0x12ca   :  { %v4124_v61 = vpack.c.bf16 %v3864_v19, %v3864_v19  ;;  %v3868_v54 = vadd.f32 %v3867_v6, %v3662_v46  ;;  %v3869_v45 = vpop.f32.mrb[55].mxu0 }
0x12cb   :  { %v9478_v11 = vadd.f32 %v3869_v45, %v3666_v13 }
0x12cc   :  { %v4136_v0 = vsel %vm1102_vm3, %v4124_v61, 0  ;;  %v4126_v63 = vpack.c.bf16 %v3868_v54, %v3868_v54 }
0x12cd   :  { %7639 = vmatpush3.bf16.xpose.msra.mxu0 %v4136_v0 }
0x12ce   :  { %v4182_v62 = vsel %vm1102_vm3, %v4126_v63, 0  ;;  %7650 = vmatprep.subr.bf16.mxu0 %v8916_v1 }
0x12cf   :  { %7645 = vmatpush3.bf16.xpose.msra.mxu1 %v4182_v62 }
0x12d0   :  { %7656 = vmatprep.subr.bf16.mxu1 %v8916_v1 }
0x12d4   :  { %7641 = vmatmul.mubr.msk.bf16.vlgmr.msra.gmra.mrb[56].mxu0 %vm1102_vm3, %v4120_v17 }
0x12d5   :  { %7651 = vmatpush3.bf16.msra.mxu0 %v4252_v44  ;;  %7652 = vmatprep.mubr.msk.bf16.mxu0 %vm8918_vm2, %v8916_v1 }
0x12d6   :  { %7647 = vmatmul.mubr.msk.bf16.vlgmr.msra.gmra.mrb[52].mxu1 %vm1102_vm3, %v4122_v5  ;;  %7662 = vmatprep.subr.bf16.mxu0 %v8916_v1 }
0x12d7   :  { %7657 = vmatpush3.bf16.msra.mxu1 %v4298_v20  ;;  %7658 = vmatprep.mubr.msk.bf16.mxu1 %vm8918_vm2, %v8916_v1 }
0x12d8   :  { %7668 = vmatprep.subr.bf16.mxu1 %v8916_v1 }
0x13a7   :  { %v4172_v21 = vpop.f32.mrb[56].mxu0 }
0x13a8   :  { %v4173_v22 = vadd.f32 %v4172_v21, %v9154_v16  ;;  %v7642_v26 = vpop.f32.mrb[57].mxu0 }
0x13a9   :  { %v4175_v27 = vpop.f32.mrb[58].mxu0  ;;  %v4218_v29 = vpop.f32.mrb[52].mxu1 }
0x13aa   :  { %v4219_v30 = vadd.f32 %v4218_v29, %v9160_v24  ;;  %v7643_v31 = vpop.f32.mrb[59].mxu0  ;;  %v7648_v32 = vpop.f32.mrb[53].mxu1  ;;  %v4224_v34 = vsel %vm1195_vm6, %v4173_v22, -inf }
0x13ab   :  { %v4221_v35 = vpop.f32.mrb[54].mxu1  ;;  %4225 = vmax.xlane.f32.xlu0 %v4224_v34 }
0x13ac   :  { %v7649_v36 = vpop.f32.mrb[55].mxu1  ;;  %v4227_v28 = vsel %vm1195_vm6, %v4219_v30, -inf }
0x13ad   :  { %4228 = vmax.xlane.f32.xlu1 %v4227_v28 }
0x1438   :  { %v4226_v37 = vpop.xlane.xlu0 %4225 }
0x1439   :  { %v4230_v40 = vsub.f32 %v4173_v22, %v4226_v37 }
0x143a   :  { %v4229_v48 = vpop.xlane.xlu1 %4228 }
0x143b   :  { %v4232_v50 = vmul.f32 1.442695, %v4230_v40  ;;  %v4231_v52 = vsub.f32 %v4219_v30, %v4229_v48 }
0x143d   :  { %8696 = vpow2.f32 %v4232_v50  ;;  %v4234_v59 = vmul.f32 1.442695, %v4231_v52 }
0x143f   :  { %8698 = vpow2.f32 %v4234_v59 }
0x1447   :  { %v8697_v60 = vpop.eup %8696 }
0x1448   :  { %v4236_v7 = vsel %vm1195_vm6, %v8697_v60, 0.0 }
0x1449   :  { %v8699_v9 = vpop.eup %8698  ;;  %4237 = vadd.xlane.f32.xlu0 %v4236_v7 }
0x144a   :  { %v4239_v46 = vsel %vm1195_vm6, %v8699_v9, 0.0 }
0x144b   :  { %4240 = vadd.xlane.f32.xlu1 %v4239_v46 }
0x145c   :  { %4396 = vrot.lane.b32.xlu1 %v4126_v63, %s8922_s2 }
0x145f   :  { %4344 = vrot.lane.b32.xlu0 %v4124_v61, %s8922_s2 }
0x1460   :  { %4341 = vrot.lane.b32.xlu1 %v4120_v17, %s8922_s2 }
0x1463   :  { %4393 = vrot.lane.b32.xlu0 %v4122_v5, %s8922_s2 }
0x14d6   :  { %v4238_v13 = vpop.xlane.xlu0 %4237 }
0x14d7   :  { %8700 = vrcp.f32 %v4238_v13 }
0x14d8   :  { %v4241_v25 = vpop.xlane.xlu1 %4240 }
0x14d9   :  { %8702 = vrcp.f32 %v4241_v25 }
0x14da   :  { %v4345_v6 = vpop.permute.xlu0 %4344 }
0x14db   :  { %v4350_v12 = vsel %vm1102_vm3, %v4345_v6, 0 }
0x14dc   :  { %v4397_v45 = vpop.permute.xlu1 %4396 }
0x14dd   :  { %v4402_v0 = vsel %vm1102_vm3, %v4397_v45, 0 }
0x14de   :  { %v4394_v14 = vpop.permute.xlu0 %4393 }
0x14e0   :  { %v4342_v63 = vpop.permute.xlu1 %4341 }
0x14e1   :  { %v8701_v47 = vpop.eup %8700 }
0x14e2   :  { %v4244_v19 = vmul.f32 %v8701_v47, %v8697_v60 }
0x14e3   :  { %v8703_v8 = vpop.eup %8702 }
0x14e4   :  { %v4245_v18 = vmul.f32 %v8703_v8, %v8699_v9  ;;  %v4246_v54 = vpack.c.bf16 %v4244_v19, %v4244_v19 }
0x14e6   :  { %7653 = vmatmul.mubr.msk.bf16.vlgmr.msra.gmra.mrb[60].mxu0 %vm1195_vm6, %v4246_v54  ;;  %v4247_v61 = vpack.c.bf16 %v4245_v18, %v4245_v18 }
0x14e7   :  { %7663 = vmatpush3.bf16.xpose.msra.mxu0 %v4350_v12  ;;  %7664 = vmatprep.mubr.msk.bf16.mxu0 %vm8918_vm2, %v8916_v1  ;;  %v3418_v12 = vrot.slane %v9471_v23, %v9065_v4 }
0x14e8   :  { %7659 = vmatmul.mubr.msk.bf16.vlgmr.msra.gmra.mrb[56].mxu1 %vm1195_vm6, %v4247_v61  ;;  %7674 = vmatprep.subr.bf16.mxu0 %v8916_v1  ;;  %v9552_v61 = vpack.c.bf16 %v9478_v11, %v9478_v11  ;;  %v9568_v11 = vpack.c.bf16 %v9463_v56, %v9463_v56 }
0x14e9   :  { %7669 = vmatpush3.bf16.xpose.msra.mxu1 %v4402_v0  ;;  %7670 = vmatprep.mubr.msk.bf16.mxu1 %vm8918_vm2, %v8916_v1 }
0x14ea   :  { %7680 = vmatprep.subr.bf16.mxu1 %v8916_v1  ;;  %v4616_v23 = vsel %vm1102_vm3, %v9552_v61, 0 }
0x14ee   :  { %7665 = vmatmul.mubr.msk.bf16.vlgmr.msra.gmra.mrb[64].mxu0 %vm1102_vm3, %v4342_v63 }
0x14ef   :  { %7676 = vmatprep.mubr.msk.bf16.mxu0 %vm8918_vm2, %v8916_v1 }
0x14f0   :  { %7671 = vmatmul.mubr.msk.bf16.vlgmr.msra.gmra.mrb[60].mxu1 %vm1102_vm3, %v4394_v14 }
0x14f1   :  { %7682 = vmatprep.mubr.msk.bf16.mxu1 %vm8918_vm2, %v8916_v1 }
0x15b9   :  { %v9526_v43 = vpop.f32.mrb[60].mxu0 }
0x15ba   :  { %v7654_v62 = vpop.f32.mrb[61].mxu0 }
0x15bb   :  { %v4291_v15 = vpop.f32.mrb[62].mxu0  ;;  %v9528_v17 = vpop.f32.mrb[56].mxu1 }
0x15bc   :  { %v7655_v44 = vpop.f32.mrb[63].mxu0  ;;  %v7660_v5 = vpop.f32.mrb[57].mxu1  ;;  %v3622_v15 = vadd.f32 %v9465_v55, %v3418_v12 }
0x15bd   :  { %v4337_v20 = vpop.f32.mrb[58].mxu1  ;;  %v9574_v44 = vpack.c.bf16 %v9467_v33, %v9467_v33  ;;  %v4686_v5 = vsel %vm1223_vm4, %v9568_v11, 0 }
0x15be   :  { %v7661_v21 = vpop.f32.mrb[59].mxu1  ;;  %v4123_v20 = vpack.c.bf16 %v3622_v15, %v3622_v15 }
0x15bf   :  { %v4732_v56 = vsel %vm1223_vm4, %v9574_v44, 0 }
0x15c1   :  { %v4386_v22 = vpop.f32.mrb[64].mxu0 }
0x15c2   :  { %v4387_v26 = vadd.f32 %v4386_v22, %v9154_v16  ;;  %v7666_v27 = vpop.f32.mrb[65].mxu0 }
0x15c3   :  { %v4389_v29 = vpop.f32.mrb[66].mxu0  ;;  %v4438_v30 = vpop.f32.mrb[60].mxu1 }
0x15c4   :  { %v4439_v31 = vadd.f32 %v4438_v30, %v9160_v24  ;;  %v7667_v32 = vpop.f32.mrb[67].mxu0  ;;  %v7672_v34 = vpop.f32.mrb[61].mxu1  ;;  %v4444_v35 = vsel %vm1195_vm6, %v4387_v26, -inf }
0x15c5   :  { %v4441_v36 = vpop.f32.mrb[62].mxu1  ;;  %4445 = vmax.xlane.f32.xlu1 %v4444_v35 }
0x15c6   :  { %v7673_v28 = vpop.f32.mrb[63].mxu1  ;;  %v4447_v37 = vsel %vm1195_vm6, %v4439_v31, -inf }
0x15c7   :  { %4448 = vmax.xlane.f32.xlu0 %v4447_v37 }
0x1652   :  { %v4446_v40 = vpop.xlane.xlu1 %4445 }
0x1653   :  { %v4450_v48 = vsub.f32 %v4387_v26, %v4446_v40 }
0x1654   :  { %v4449_v50 = vpop.xlane.xlu0 %4448 }
0x1655   :  { %v4452_v52 = vmul.f32 1.442695, %v4450_v48  ;;  %v4451_v59 = vsub.f32 %v4439_v31, %v4449_v50 }
0x1657   :  { %8704 = vpow2.f32 %v4452_v52  ;;  %v4454_v60 = vmul.f32 1.442695, %v4451_v59 }
0x1659   :  { %8706 = vpow2.f32 %v4454_v60 }
0x1661   :  { %v8705_v7 = vpop.eup %8704 }
0x1662   :  { %v4456_v9 = vsel %vm1195_vm6, %v8705_v7, 0.0 }
0x1663   :  { %v8707_v46 = vpop.eup %8706  ;;  %4457 = vadd.xlane.f32.xlu0 %v4456_v9 }
0x1664   :  { %v4459_v13 = vsel %vm1195_vm6, %v8707_v46, 0.0 }
0x1665   :  { %4460 = vadd.xlane.f32.xlu1 %v4459_v13 }
0x1676   :  { %4518 = vrot.lane.b32.xlu1 %v9486_v42, %s8922_s2 }
0x1679   :  { %4469 = vrot.lane.b32.xlu0 %v9483_v10, %s8922_s2  ;;  %v9546_v10 = vpack.c.bf16 %v9474_v38, %v9474_v38  ;;  %v3618_v38 = vadd.f32 %v9461_v51, %v3418_v12 }
0x167b   :  { %v4570_v14 = vsel %vm1102_vm3, %v9546_v10, 0  ;;  %v4121_v51 = vpack.c.bf16 %v3618_v38, %v3618_v38 }
0x16f0   :  { %v4458_v25 = vpop.xlane.xlu0 %4457 }
0x16f1   :  { %8708 = vrcp.f32 %v4458_v25 }
0x16f2   :  { %v4461_v47 = vpop.xlane.xlu1 %4460 }
0x16f3   :  { %8710 = vrcp.f32 %v4461_v47 }
0x16f4   :  { %v4470_v19 = vpop.permute.xlu0 %4469 }
0x16f5   :  { %v4475_v8 = vsel %vm1223_vm4, %v4470_v19, 0 }
0x16f6   :  { %7675 = vmatpush3.bf16.msra.mxu0 %v4475_v8  ;;  %v4519_v6 = vpop.permute.xlu1 %4518 }
0x16f7   :  { %v4524_v18 = vsel %vm1223_vm4, %v4519_v6, 0  ;;  %7686 = vmatprep.subr.bf16.mxu0 %v8916_v1 }
0x16f8   :  { %7681 = vmatpush3.bf16.msra.mxu1 %v4524_v18 }
0x16f9   :  { %7692 = vmatprep.subr.bf16.mxu1 %v8916_v1 }
0x16fb   :  { %v8709_v42 = vpop.eup %8708 }
0x16fc   :  { %v4464_v54 = vmul.f32 %v8709_v42, %v8705_v7 }
0x16fd   :  { %v8711_v45 = vpop.eup %8710 }
0x16fe   :  { %v4465_v0 = vmul.f32 %v8711_v45, %v8707_v46  ;;  %v4466_v63 = vpack.c.bf16 %v4464_v54, %v4464_v54 }
0x1700   :  { %7677 = vmatmul.mubr.msk.bf16.vlgmr.msra.gmra.mrb[68].mxu0 %vm1195_vm6, %v4466_v63  ;;  %v4467_v62 = vpack.c.bf16 %v4465_v0, %v4465_v0 }
0x1701   :  { %7687 = vmatpush3.bf16.xpose.msra.mxu0 %v4570_v14  ;;  %7688 = vmatprep.mubr.msk.bf16.mxu0 %vm8918_vm2, %v8916_v1 }
0x1702   :  { %7683 = vmatmul.mubr.msk.bf16.vlgmr.msra.gmra.mrb[64].mxu1 %vm1195_vm6, %v4467_v62  ;;  %7698 = vmatprep.subr.bf16.mxu0 %v8916_v1 }
0x1703   :  { %7693 = vmatpush3.bf16.xpose.msra.mxu1 %v4616_v23  ;;  %7694 = vmatprep.mubr.msk.bf16.mxu1 %vm8918_vm2, %v8916_v1 }
0x1704   :  { %7704 = vmatprep.subr.bf16.mxu1 %v8916_v1 }
0x1708   :  { %7689 = vmatmul.mubr.msk.bf16.vlgmr.msra.gmra.mrb[72].mxu0 %vm1102_vm3, %v4121_v51 }
0x1709   :  { %7699 = vmatpush3.bf16.msra.mxu0 %v4686_v5  ;;  %7700 = vmatprep.mubr.msk.bf16.mxu0 %vm8918_vm2, %v8916_v1 }
0x170a   :  { %7695 = vmatmul.mubr.msk.bf16.vlgmr.msra.gmra.mrb[68].mxu1 %vm1102_vm3, %v4123_v20  ;;  %7710 = vmatprep.subr.bf16.mxu0 %v8916_v1 }
0x170b   :  { %7705 = vmatpush3.bf16.msra.mxu1 %v4732_v56  ;;  %7706 = vmatprep.mubr.msk.bf16.mxu1 %vm8918_vm2, %v8916_v1 }
0x170c   :  { %7716 = vmatprep.subr.bf16.mxu1 %v8916_v1 }
0x17d3   :  { %v9588_v55 = vpop.f32.mrb[68].mxu0 }
0x17d4   :  { %v7678_v33 = vpop.f32.mrb[69].mxu0 }
0x17d5   :  { %v4514_v21 = vpop.f32.mrb[70].mxu0  ;;  %v9590_v22 = vpop.f32.mrb[64].mxu1 }
0x17d6   :  { %v7819_v26 = vpack.i.bf16 %v9590_v22, %v9588_v55  ;;  %v7679_v27 = vpop.f32.mrb[71].mxu0  ;;  %v7684_v29 = vpop.f32.mrb[65].mxu1 }
0x17d7   :  { %v4563_v30 = vpop.f32.mrb[66].mxu1 }
0x17d8   :  { %v7685_v31 = vpop.f32.mrb[67].mxu1 }
0x17db   :  { %v4606_v32 = vpop.f32.mrb[72].mxu0 }
0x17dc   :  { %v4607_v34 = vadd.f32 %v4606_v32, %v9154_v16  ;;  %v7690_v35 = vpop.f32.mrb[73].mxu0 }
0x17dd   :  { %v4609_v36 = vpop.f32.mrb[74].mxu0  ;;  %v4652_v28 = vpop.f32.mrb[68].mxu1 }
0x17de   :  { %v4653_v37 = vadd.f32 %v4652_v28, %v9160_v24  ;;  %v7691_v40 = vpop.f32.mrb[75].mxu0  ;;  %v7696_v48 = vpop.f32.mrb[69].mxu1  ;;  %v4658_v50 = vsel %vm1195_vm6, %v4607_v34, -inf }
0x17df   :  { %v4655_v52 = vpop.f32.mrb[70].mxu1  ;;  %4659 = vmax.xlane.f32.xlu1 %v4658_v50 }
0x17e0   :  { %v7697_v59 = vpop.f32.mrb[71].mxu1  ;;  %v4661_v60 = vsel %vm1195_vm6, %v4653_v37, -inf }
0x17e1   :  { %4662 = vmax.xlane.f32.xlu0 %v4661_v60 }
0x186c   :  { %v4660_v7 = vpop.xlane.xlu1 %4659 }
0x186d   :  { %v4664_v9 = vsub.f32 %v4607_v34, %v4660_v7 }
0x186e   :  { %v4663_v46 = vpop.xlane.xlu0 %4662 }
0x186f   :  { %v4666_v13 = vmul.f32 1.442695, %v4664_v9  ;;  %v4665_v25 = vsub.f32 %v4653_v37, %v4663_v46 }
0x1871   :  { %8712 = vpow2.f32 %v4666_v13  ;;  %v4668_v47 = vmul.f32 1.442695, %v4665_v25 }
0x1873   :  { %8714 = vpow2.f32 %v4668_v47 }
0x187b   :  { %v8713_v19 = vpop.eup %8712 }
0x187c   :  { %v4670_v8 = vsel %vm1195_vm6, %v8713_v19, 0.0 }
0x187d   :  { %v8715_v6 = vpop.eup %8714  ;;  %4671 = vadd.xlane.f32.xlu0 %v4670_v8 }
0x187e   :  { %v4673_v18 = vsel %vm1195_vm6, %v8715_v6, 0.0 }
0x187f   :  { %4674 = vadd.xlane.f32.xlu1 %v4673_v18 }
0x1890   :  { %4830 = vrot.lane.b32.xlu1 %v9552_v61, %s8922_s2 }
0x1893   :  { %4778 = vrot.lane.b32.xlu0 %v9546_v10, %s8922_s2 }
0x1894   :  { %4775 = vrot.lane.b32.xlu1 %v4121_v51, %s8922_s2 }
0x1897   :  { %4827 = vrot.lane.b32.xlu0 %v4123_v20, %s8922_s2 }
0x190a   :  { %v4672_v42 = vpop.xlane.xlu0 %4671 }
0x190b   :  { %8716 = vrcp.f32 %v4672_v42 }
0x190c   :  { %v4675_v54 = vpop.xlane.xlu1 %4674 }
0x190d   :  { %8718 = vrcp.f32 %v4675_v54 }
0x190e   :  { %v4779_v63 = vpop.permute.xlu0 %4778 }
0x190f   :  { %v4784_v61 = vsel %vm1102_vm3, %v4779_v63, 0 }
0x1910   :  { %v4831_v38 = vpop.permute.xlu1 %4830 }
0x1911   :  { %v4836_v23 = vsel %vm1102_vm3, %v4831_v38, 0 }
0x1912   :  { %v4828_v51 = vpop.permute.xlu0 %4827 }
0x1914   :  { %v4776_v15 = vpop.permute.xlu1 %4775 }
0x1915   :  { %v8717_v45 = vpop.eup %8716 }
0x1916   :  { %v4678_v12 = vmul.f32 %v8717_v45, %v8713_v19 }
0x1917   :  { %v8719_v0 = vpop.eup %8718 }
0x1918   :  { %v4679_v14 = vmul.f32 %v8719_v0, %v8715_v6  ;;  %v4680_v62 = vpack.c.bf16 %v4678_v12, %v4678_v12 }
0x191a   :  { %7701 = vmatmul.mubr.msk.bf16.vlgmr.msra.gmra.mrb[76].mxu0 %vm1195_vm6, %v4680_v62  ;;  %v4681_v10 = vpack.c.bf16 %v4679_v14, %v4679_v14 }
0x191b   :  { %7711 = vmatpush3.bf16.xpose.msra.mxu0 %v4784_v61  ;;  %7712 = vmatprep.mubr.msk.bf16.mxu0 %vm8918_vm2, %v8916_v1  ;;  %v8352_v61 = vld [vmem:[#allocation8 + $0x48] ss:$108 sps:$4 sm:$0xff]  }
0x191c   :  { %7707 = vmatmul.mubr.msk.bf16.vlgmr.msra.gmra.mrb[72].mxu1 %vm1195_vm6, %v4681_v10  ;;  %7722 = vmatprep.subr.bf16.mxu0 %v8916_v1  ;;  %v8354_v10 = vld [vmem:[#allocation8 + $0x4c] ss:$108 sps:$4 sm:$0xff]  }
0x191d   :  { %7717 = vmatpush3.bf16.xpose.msra.mxu1 %v4836_v23  ;;  %7718 = vmatprep.mubr.msk.bf16.mxu1 %vm8918_vm2, %v8916_v1  ;;  %v8355_v23 = vld [vmem:[#allocation8 + $0x120] ss:$108 sps:$4 sm:$0xff]  }
0x191e   :  { %7728 = vmatprep.subr.bf16.mxu1 %v8916_v1 }
0x1922   :  { %7713 = vmatmul.mubr.msk.bf16.vlgmr.msra.gmra.mrb[80].mxu0 %vm1102_vm3, %v4776_v15  ;;  %v8358_v15 = vld [vmem:[#allocation8 + $0x1f8] ss:$108 sps:$4 sm:$0xff]  }
0x1923   :  { %7724 = vmatprep.mubr.msk.bf16.mxu0 %vm8918_vm2, %v8916_v1 }
0x1924   :  { %7719 = vmatmul.mubr.msk.bf16.vlgmr.msra.gmra.mrb[76].mxu1 %vm1102_vm3, %v4828_v51  ;;  %v8363_v51 = vld [vmem:[#allocation8 + $0x2d4] ss:$108 sps:$4 sm:$0xff]  }
0x1925   :  { %7730 = vmatprep.mubr.msk.bf16.mxu1 %vm8918_vm2, %v8916_v1 }
0x19ed   :  { %v9622_v5 = vpop.f32.mrb[76].mxu0 }
0x19ee   :  { %v7702_v20 = vpop.f32.mrb[77].mxu0 }
0x19ef   :  { %v4725_v56 = vpop.f32.mrb[78].mxu0  ;;  %v9624_v33 = vpop.f32.mrb[72].mxu1  ;;  %v8361_v20 = vld [vmem:[#allocation8 + $0x2d0] ss:$108 sps:$4 sm:$0xff]  }
0x19f0   :  { %v7703_v21 = vpop.f32.mrb[79].mxu0  ;;  %v7708_v27 = vpop.f32.mrb[73].mxu1  ;;  %v8366_v56 = vld [vmem:[#allocation8 + $0x3ac] ss:$108 sps:$4 sm:$0xff]  }
0x19f1   :  { %v4771_v29 = vpop.f32.mrb[74].mxu1  ;;  %v8364_v21 = vld [vmem:[#allocation8 + $0x3a8] ss:$108 sps:$4 sm:$0xff]   ;;  %v8369_v27 = vld [vmem:[#allocation8 + $0x484] ss:$108 sps:$4 sm:$0xff]  }
0x19f2   :  { %v7709_v30 = vpop.f32.mrb[75].mxu1  ;;  %v8367_v29 = vld [vmem:[#allocation8 + $0x480] ss:$108 sps:$4 sm:$0xff]  }
0x19f3   :  { %v8372_v30 = vld [vmem:[#allocation8 + $0x55c] ss:$108 sps:$4 sm:$0xff]  }
0x19f5   :  { %v4820_v31 = vpop.f32.mrb[80].mxu0 }
0x19f6   :  { %v4821_v32 = vadd.f32 %v4820_v31, %v9154_v16  ;;  %v7714_v34 = vpop.f32.mrb[81].mxu0  ;;  %v8370_v31 = vld [vmem:[#allocation8 + $0x558] ss:$108 sps:$4 sm:$0xff]  }
0x19f7   :  { %v4823_v35 = vpop.f32.mrb[82].mxu0  ;;  %v4872_v36 = vpop.f32.mrb[76].mxu1  ;;  %v8373_v34 = vld [vmem:[#allocation8 + $0x630] ss:$108 sps:$4 sm:$0xff]  }
0x19f8   :  { %v4873_v28 = vadd.f32 %v4872_v36, %v9160_v24  ;;  %v7715_v37 = vpop.f32.mrb[83].mxu0  ;;  %v7720_v1 = vpop.f32.mrb[77].mxu1  ;;  %v4878_v40 = vsel %vm1195_vm6, %v4821_v32, -inf  ;;  %v8378_v35 = vld [vmem:[#allocation8 + $0x70c] ss:$108 sps:$4 sm:$0xff]  }
0x19f9   :  { %v4875_v48 = vpop.f32.mrb[78].mxu1  ;;  %4879 = vmax.xlane.f32.xlu1 %v4878_v40  ;;  %v8376_v36 = vld [vmem:[#allocation8 + $0x708] ss:$108 sps:$4 sm:$0xff]   ;;  %v8379_v37 = vld [vmem:[#allocation8 + $0x7e0] ss:$108 sps:$4 sm:$0xff]  }
0x19fa   :  { %v7721_v50 = vpop.f32.mrb[79].mxu1  ;;  %v4881_v52 = vsel %vm1195_vm6, %v4873_v28, -inf  ;;  %v8384_v1 = vld [vmem:[#allocation8 + $0x8bc] ss:$108 sps:$4 sm:$0xff]   ;;  %v8382_v40 = vld [vmem:[#allocation8 + $0x8b8] ss:$108 sps:$4 sm:$0xff]  }
0x19fb   :  { %4882 = vmax.xlane.f32.xlu0 %v4881_v52  ;;  %v8387_v48 = vld [vmem:[#allocation8 + $0x994] ss:$108 sps:$4 sm:$0xff]   ;;  %v8385_v50 = vld [vmem:[#allocation8 + $0x990] ss:$108 sps:$4 sm:$0xff]   ;;  %v8390_v52 = vld [vmem:[#allocation8 + $0xa6c] ss:$108 sps:$4 sm:$0xff]  }
0x1a86   :  { %v4880_v59 = vpop.xlane.xlu1 %4879 }
0x1a87   :  { %v4884_v60 = vsub.f32 %v4821_v32, %v4880_v59  ;;  %v8375_v32 = vld [vmem:[#allocation8 + $0x634] ss:$108 sps:$4 sm:$0xff]  }
0x1a88   :  { %v4883_v7 = vpop.xlane.xlu0 %4882  ;;  %v8388_v59 = vld [vmem:[#allocation8 + $0xa68] ss:$108 sps:$4 sm:$0xff]  }
0x1a89   :  { %v4886_v9 = vmul.f32 1.442695, %v4884_v60  ;;  %v4885_v16 = vsub.f32 %v4873_v28, %v4883_v7  ;;  %v8381_v28 = vld [vmem:[#allocation8 + $0x7e4] ss:$108 sps:$4 sm:$0xff]   ;;  %v8391_v7 = vld [vmem:[#allocation8 + $0xb40] ss:$108 sps:$4 sm:$0xff]  }
0x1a8a   :  { %v8393_v60 = vld [vmem:[#allocation8 + $0xb44] ss:$108 sps:$4 sm:$0xff]  }
0x1a8b   :  { %8720 = vpow2.f32 %v4886_v9  ;;  %v4888_v46 = vmul.f32 1.442695, %v4885_v16  ;;  %v8396_v9 = vld [vmem:[#allocation8 + $0xc1c] ss:$108 sps:$4 sm:$0xff]   ;;  %v8394_v16 = vld [vmem:[#allocation8 + $0xc18] ss:$108 sps:$4 sm:$0xff]  }
0x1a8d   :  { %8722 = vpow2.f32 %v4888_v46  ;;  %v8397_v46 = vld [vmem:[#allocation8 + $0xcf0] ss:$108 sps:$4 sm:$0xff]  }
0x1a95   :  { %v8721_v13 = vpop.eup %8720 }
0x1a96   :  { %v4890_v24 = vsel %vm1195_vm6, %v8721_v13, 0.0 }
0x1a97   :  { %v8723_v25 = vpop.eup %8722  ;;  %4891 = vadd.xlane.f32.xlu0 %v4890_v24 }
0x1a98   :  { %v4893_v47 = vsel %vm1195_vm6, %v8723_v25, 0.0 }
0x1a99   :  { %4894 = vadd.xlane.f32.xlu1 %v4893_v47 }
0x1aaa   :  { %4952 = vrot.lane.b32.xlu1 %v9574_v44, %s8922_s2 }
0x1aad   :  { %4903 = vrot.lane.b32.xlu0 %v9568_v11, %s8922_s2 }
0x1ab1   :  { %7820 = vrot.lane.b32.xlu0 %v7819_v26, %s8922_s2 }
0x1b24   :  { %v4892_v19 = vpop.xlane.xlu0 %4891 }
0x1b25   :  { %8724 = vrcp.f32 %v4892_v19 }
0x1b26   :  { %v4895_v8 = vpop.xlane.xlu1 %4894 }
0x1b27   :  { %8726 = vrcp.f32 %v4895_v8 }
0x1b28   :  { %v4904_v6 = vpop.permute.xlu0 %4903 }
0x1b29   :  { %v4909_v18 = vsel %vm1223_vm4, %v4904_v6, 0 }
0x1b2a   :  { %7723 = vmatpush3.bf16.msra.mxu0 %v4909_v18  ;;  %v4953_v42 = vpop.permute.xlu1 %4952 }
0x1b2b   :  { %v4958_v54 = vsel %vm1223_vm4, %v4953_v42, 0  ;;  %5227 = vmatprep.subr.bf16.mxu0 %v8354_v10 }
0x1b2c   :  { %v7821_v44 = vpop.permute.xlu0 %7820  ;;  %7729 = vmatpush3.bf16.msra.mxu1 %v4958_v54 }
0x1b2d   :  { %v7823_v45 = vunpack.i.h.bf16 %v7821_v44  ;;  %v7822_v11 = vunpack.i.l.bf16 %v7821_v44 }
0x1b2f   :  { %v8725_v12 = vpop.eup %8724  ;;  %v9644_v55 = vsel %vm1102_vm3, %v9528_v17, %v7823_v45  ;;  %v9648_v22 = vsel %vm1102_vm3, %v9526_v43, %v7822_v11  ;;  %v8357_v17 = vld [vmem:[#allocation8 + $0x124] ss:$108 sps:$4 sm:$0xff]   ;;  %v8360_v43 = vld [vmem:[#allocation8 + $0x1fc] ss:$108 sps:$4 sm:$0xff]  }
0x1b30   :  { %v4898_v26 = vmul.f32 %v8725_v12, %v8721_v13  ;;  %v5020_v0 = vpack.c.bf16 %v9644_v55, %v9648_v22  ;;  %v8399_v13 = vld [vmem:[#allocation8 + $0xcf4] ss:$108 sps:$4 sm:$0xff]  }
0x1b31   :  { %v8727_v63 = vpop.eup %8726 }
0x1b32   :  { %v4899_v14 = vmul.f32 %v8727_v63, %v8723_v25  ;;  %v4900_v62 = vpack.c.bf16 %v4898_v26, %v4898_v26 }
0x1b34   :  { %7725 = vmatmul.mubr.msk.bf16.vlgmr.msra.gmra.mrb[84].mxu0 %vm1195_vm6, %v4900_v62  ;;  %v4901_v38 = vpack.c.bf16 %v4899_v14, %v4899_v14  ;;  %v5055_v14 = vld [vmem:[#allocation11 + $0x25] ss:$8 sm:$0x3] }
0x1b35   :  { %5228 = vmatpush1.bf16.msra.mxu0 %v8352_v61  ;;  %v5060_v62 = vrot.slane %v5055_v14, %v9062_v3 }
0x1b36   :  { %7731 = vmatmul.mubr.msk.bf16.vlgmr.msra.gmra.mrb[80].mxu1 %vm1195_vm6, %v4901_v38  ;;  %5229 = vmatprep.subr.bf16.mxu0 %v8357_v17  ;;  %v5064_v38 = vrot.slane %v5055_v14, %v9065_v4 }
0x1b39   :  { %5230 = vmatpush1.bf16.msra.mxu0 %v8355_v23 }
0x1b3a   :  { %5231 = vmatprep.subr.bf16.mxu0 %v8360_v43 }
0x1b3d   :  { %5232 = vmatpush1.bf16.msra.mxu0 %v8358_v15 }
0x1b3e   :  { %5233 = vmatprep.subr.bf16.mxu0 %v8363_v51 }
0x1b41   :  { %5234 = vmatpush1.bf16.msra.mxu0 %v8361_v20 }
0x1b42   :  { %5235 = vmatprep.subr.bf16.mxu0 %v8366_v56  ;;  %v8400_v56 = vld [vmem:[#allocation8 + $0x50] ss:$108 sps:$4 sm:$0xff]  }
0x1b45   :  { %5236 = vmatpush1.bf16.msra.mxu0 %v8364_v21  ;;  %v8402_v21 = vld [vmem:[#allocation8 + $0x54] ss:$108 sps:$4 sm:$0xff]  }
0x1b46   :  { %5237 = vmatprep.subr.bf16.mxu0 %v8369_v27  ;;  %v8403_v27 = vld [vmem:[#allocation8 + $0x58] ss:$108 sps:$4 sm:$0xff]   ;;  %5749 = vmatprep.subr.bf16.mxu1 %v8402_v21 }
0x1b47   :  { %5750 = vmatpush1.bf16.msra.mxu1 %v8400_v56  ;;  %v8471_v56 = vld [vmem:[#allocation8 + $0x9a4] ss:$108 sps:$4 sm:$0xff]  }
0x1b48   :  { %v8466_v21 = vld [vmem:[#allocation8 + $0x998] ss:$108 sps:$4 sm:$0xff]  }
0x1b49   :  { %5238 = vmatpush1.bf16.msra.mxu0 %v8367_v29  ;;  %v8408_v29 = vld [vmem:[#allocation8 + $0x12c] ss:$108 sps:$4 sm:$0xff]  }
0x1b4a   :  { %5239 = vmatprep.subr.bf16.mxu0 %v8372_v30  ;;  %v8411_v30 = vld [vmem:[#allocation8 + $0x134] ss:$108 sps:$4 sm:$0xff]   ;;  %5751 = vmatprep.subr.bf16.mxu1 %v8408_v29  ;;  %v8477_v29 = vld [vmem:[#allocation8 + $0xa7c] ss:$108 sps:$4 sm:$0xff]  }
0x1b4d   :  { %5240 = vmatpush1.bf16.msra.mxu0 %v8370_v31  ;;  %v8414_v31 = vld [vmem:[#allocation8 + $0x204] ss:$108 sps:$4 sm:$0xff]  }
0x1b4e   :  { %5241 = vmatprep.subr.bf16.mxu0 %v8375_v32  ;;  %v8417_v32 = vld [vmem:[#allocation8 + $0x20c] ss:$108 sps:$4 sm:$0xff]  }
0x1b51   :  { %5242 = vmatpush1.bf16.msra.mxu0 %v8373_v34  ;;  %v8412_v34 = vld [vmem:[#allocation8 + $0x200] ss:$108 sps:$4 sm:$0xff]  }
0x1b52   :  { %5243 = vmatprep.subr.bf16.mxu0 %v8378_v35  ;;  %v8415_v35 = vld [vmem:[#allocation8 + $0x208] ss:$108 sps:$4 sm:$0xff]  }
0x1b55   :  { %5244 = vmatpush1.bf16.msra.mxu0 %v8376_v36  ;;  %v8420_v36 = vld [vmem:[#allocation8 + $0x2dc] ss:$108 sps:$4 sm:$0xff]  }
0x1b56   :  { %5245 = vmatprep.subr.bf16.mxu0 %v8381_v28  ;;  %v8423_v28 = vld [vmem:[#allocation8 + $0x2e4] ss:$108 sps:$4 sm:$0xff]  }
0x1b59   :  { %5246 = vmatpush1.bf16.msra.mxu0 %v8379_v37  ;;  %v8418_v37 = vld [vmem:[#allocation8 + $0x2d8] ss:$108 sps:$4 sm:$0xff]  }
0x1b5a   :  { %5247 = vmatprep.subr.bf16.mxu0 %v8384_v1  ;;  %v8421_v1 = vld [vmem:[#allocation8 + $0x2e0] ss:$108 sps:$4 sm:$0xff]  }
0x1b5d   :  { %5248 = vmatpush1.bf16.msra.mxu0 %v8382_v40  ;;  %v8426_v40 = vld [vmem:[#allocation8 + $0x3b4] ss:$108 sps:$4 sm:$0xff]  }
0x1b5e   :  { %5249 = vmatprep.subr.bf16.mxu0 %v8387_v48  ;;  %v8429_v48 = vld [vmem:[#allocation8 + $0x3bc] ss:$108 sps:$4 sm:$0xff]  }
0x1b61   :  { %5250 = vmatpush1.bf16.msra.mxu0 %v8385_v50  ;;  %v8424_v50 = vld [vmem:[#allocation8 + $0x3b0] ss:$108 sps:$4 sm:$0xff]  }
0x1b62   :  { %5251 = vmatprep.subr.bf16.mxu0 %v8390_v52  ;;  %v8427_v52 = vld [vmem:[#allocation8 + $0x3b8] ss:$108 sps:$4 sm:$0xff]  }
0x1b65   :  { %5252 = vmatpush1.bf16.msra.mxu0 %v8388_v59  ;;  %v8432_v59 = vld [vmem:[#allocation8 + $0x48c] ss:$108 sps:$4 sm:$0xff]  }
0x1b66   :  { %5253 = vmatprep.subr.bf16.mxu0 %v8393_v60  ;;  %v8435_v60 = vld [vmem:[#allocation8 + $0x494] ss:$108 sps:$4 sm:$0xff]  }
0x1b69   :  { %5254 = vmatpush1.bf16.msra.mxu0 %v8391_v7  ;;  %v8430_v7 = vld [vmem:[#allocation8 + $0x488] ss:$108 sps:$4 sm:$0xff]  }
0x1b6a   :  { %5255 = vmatprep.subr.bf16.mxu0 %v8396_v9  ;;  %v8433_v9 = vld [vmem:[#allocation8 + $0x490] ss:$108 sps:$4 sm:$0xff]  }
0x1b6d   :  { %5256 = vmatpush1.bf16.msra.mxu0 %v8394_v16  ;;  %v8438_v16 = vld [vmem:[#allocation8 + $0x564] ss:$108 sps:$4 sm:$0xff]  }
0x1b6e   :  { %5257 = vmatprep.subr.bf16.mxu0 %v8399_v13  ;;  %v8436_v13 = vld [vmem:[#allocation8 + $0x560] ss:$108 sps:$4 sm:$0xff]  }
0x1b71   :  { %5258 = vmatpush1.bf16.msra.mxu0 %v8397_v46  ;;  %v8441_v46 = vld [vmem:[#allocation8 + $0x56c] ss:$108 sps:$4 sm:$0xff]  }
0x1c07   :  { %v4945_v24 = vpop.f32.mrb[84].mxu0 }
0x1c08   :  { %v7726_v25 = vpop.f32.mrb[85].mxu0 }
0x1c09   :  { %v4948_v47 = vpop.f32.mrb[86].mxu0  ;;  %v4994_v19 = vpop.f32.mrb[80].mxu1  ;;  %v8444_v25 = vld [vmem:[#allocation8 + $0x63c] ss:$108 sps:$4 sm:$0xff]  }
0x1c0a   :  { %v7814_v8 = vpack.i.bf16 %v4994_v19, %v4945_v24  ;;  %v7727_v6 = vpop.f32.mrb[87].mxu0  ;;  %v7732_v18 = vpop.f32.mrb[81].mxu1  ;;  %v8439_v24 = vld [vmem:[#allocation8 + $0x568] ss:$108 sps:$4 sm:$0xff]   ;;  %v8447_v47 = vld [vmem:[#allocation8 + $0x644] ss:$108 sps:$4 sm:$0xff]  }
0x1c0b   :  { %v4997_v42 = vpop.f32.mrb[82].mxu1  ;;  %v8442_v19 = vld [vmem:[#allocation8 + $0x638] ss:$108 sps:$4 sm:$0xff]   ;;  %v8450_v6 = vld [vmem:[#allocation8 + $0x714] ss:$108 sps:$4 sm:$0xff]  }
0x1c0c   :  { %v7733_v54 = vpop.f32.mrb[83].mxu1  ;;  %7815 = vrot.lane.b32.xlu1 %v7814_v8, %s8922_s2  ;;  %v8445_v8 = vld [vmem:[#allocation8 + $0x640] ss:$108 sps:$4 sm:$0xff]   ;;  %v8453_v18 = vld [vmem:[#allocation8 + $0x71c] ss:$108 sps:$4 sm:$0xff]  }
0x1c0d   :  { %v8448_v42 = vld [vmem:[#allocation8 + $0x710] ss:$108 sps:$4 sm:$0xff]   ;;  %v8451_v54 = vld [vmem:[#allocation8 + $0x718] ss:$108 sps:$4 sm:$0xff]  }
0x1c7e   :  { %v7816_v44 = vpop.permute.xlu1 %7815 }
0x1c7f   :  { %v7818_v45 = vunpack.i.h.bf16 %v7816_v44  ;;  %v7817_v11 = vunpack.i.l.bf16 %v7816_v44  ;;  %v8456_v44 = vld [vmem:[#allocation8 + $0x7ec] ss:$108 sps:$4 sm:$0xff]  }
0x1c81   :  { %v5018_v12 = vsel %vm1102_vm3, %v9622_v5, %v7817_v11  ;;  %v5019_v26 = vsel %vm1102_vm3, %v9624_v33, %v7818_v45  ;;  %v8459_v45 = vld [vmem:[#allocation8 + $0x7f4] ss:$108 sps:$4 sm:$0xff]  }
0x1c82   :  { %v5021_v63 = vpack.c.bf16 %v5019_v26, %v5018_v12  ;;  %v8454_v11 = vld [vmem:[#allocation8 + $0x7e8] ss:$108 sps:$4 sm:$0xff]   ;;  %v8457_v12 = vld [vmem:[#allocation8 + $0x7f0] ss:$108 sps:$4 sm:$0xff]  }
0x1c84   :  { %5259 = vmatprep.mubr.bf16.mxu0 %v5021_v63 }
0x1c85   :  { %5260 = vmatmul.mubr.bf16.vlgmr.msra.gmra.mrb[88].mxu0 %v5020_v0 }
0x1d58   :  { %v5261_v61 = vpop.f32.mrb[88].mxu0 }
0x1d59   :  { %v5262_v10 = vadd.f32 %v5261_v61, %v5060_v62  ;;  %v5263_v17 = vpop.f32.mrb[89].mxu0 }
0x1d5a   :  { %v5264_v23 = vadd.f32 %v5263_v17, %v5064_v38  ;;  %v5265_v43 = vpop.f32.mrb[90].mxu0 }
0x1d5b   :  { %v9665_v5 = vadd.f32 %v5262_v10, %v9442_v49  ;;  %v5266_v33 = vadd.f32 %v5265_v43, %v5060_v62  ;;  %v5267_v15 = vpop.f32.mrb[91].mxu0 }
0x1d5c   :  { %v9668_v51 = vadd.f32 %v5264_v23, %v9438_v53  ;;  %v5268_v55 = vadd.f32 %v5267_v15, %v5064_v38  ;;  %v8405_v53 = vld [vmem:[#allocation8 + $0x5c] ss:$108 sps:$4 sm:$0xff]  }
0x1d5d   :  { %v9671_v22 = vadd.f32 %v5266_v33, %v9444_v57  ;;  %5792 = vmatprep.subr.bf16.mxu0 %v8405_v53  ;;  %v8406_v57 = vld [vmem:[#allocation8 + $0x128] ss:$108 sps:$4 sm:$0xff]  }
0x1d5e   :  { %v9674_v0 = vadd.f32 %v5268_v55, %v9440_v58  ;;  %v5278_v20 = vadd.f32 %v9668_v51, %v9665_v5  ;;  %5793 = vmatpush1.bf16.msra.mxu0 %v8403_v27  ;;  %v8409_v58 = vld [vmem:[#allocation8 + $0x130] ss:$108 sps:$4 sm:$0xff]   ;;  %5752 = vmatpush1.bf16.msra.mxu1 %v8406_v57  ;;  %v8469_v27 = vld [vmem:[#allocation8 + $0x9a0] ss:$108 sps:$4 sm:$0xff]   ;;  %v8475_v57 = vld [vmem:[#allocation8 + $0xa78] ss:$108 sps:$4 sm:$0xff]  }
0x1d5f   :  { %5794 = vmatprep.subr.bf16.mxu0 %v8411_v30  ;;  %5753 = vmatprep.subr.bf16.mxu1 %v8414_v31  ;;  %v8462_v55 = vld [vmem:[#allocation8 + $0x8c4] ss:$108 sps:$4 sm:$0xff]   ;;  %v8474_v53 = vld [vmem:[#allocation8 + $0xa74] ss:$108 sps:$4 sm:$0xff]  }
0x1d60   :  { %5279 = vadd.xlane.f32.xlu1 %v5278_v20  ;;  %v5281_v49 = vadd.f32 %v9674_v0, %v9671_v22  ;;  %v8463_v20 = vld [vmem:[#allocation8 + $0x8c8] ss:$108 sps:$4 sm:$0xff]   ;;  %v8472_v30 = vld [vmem:[#allocation8 + $0xa70] ss:$108 sps:$4 sm:$0xff]  }
0x1d61   :  { %v8483_v31 = vld [vmem:[#allocation8 + $0xb54] ss:$108 sps:$4 sm:$0xff]  }
0x1d62   :  { %5282 = vadd.xlane.f32.xlu0 %v5281_v49  ;;  %5795 = vmatpush1.bf16.msra.mxu0 %v8409_v58  ;;  %v8468_v49 = vld [vmem:[#allocation8 + $0x99c] ss:$108 sps:$4 sm:$0xff]   ;;  %v8480_v58 = vld [vmem:[#allocation8 + $0xb4c] ss:$108 sps:$4 sm:$0xff]  }
0x1d63   :  { %5796 = vmatprep.subr.bf16.mxu0 %v8417_v32  ;;  %5754 = vmatpush1.bf16.msra.mxu1 %v8412_v34  ;;  %v8478_v32 = vld [vmem:[#allocation8 + $0xb48] ss:$108 sps:$4 sm:$0xff]   ;;  %v8481_v34 = vld [vmem:[#allocation8 + $0xb50] ss:$108 sps:$4 sm:$0xff]  }
0x1d64   :  { %5755 = vmatprep.subr.bf16.mxu1 %v8420_v36  ;;  %v8486_v36 = vld [vmem:[#allocation8 + $0xc24] ss:$108 sps:$4 sm:$0xff]  }
0x1d66   :  { %5797 = vmatpush1.bf16.msra.mxu0 %v8415_v35  ;;  %v8484_v35 = vld [vmem:[#allocation8 + $0xc20] ss:$108 sps:$4 sm:$0xff]  }
0x1d67   :  { %5798 = vmatprep.subr.bf16.mxu0 %v8423_v28  ;;  %5756 = vmatpush1.bf16.msra.mxu1 %v8418_v37  ;;  %v8487_v28 = vld [vmem:[#allocation8 + $0xc28] ss:$108 sps:$4 sm:$0xff]   ;;  %v8489_v37 = vld [vmem:[#allocation8 + $0xc2c] ss:$108 sps:$4 sm:$0xff]  }
0x1d68   :  { %5757 = vmatprep.subr.bf16.mxu1 %v8426_v40  ;;  %v8495_v40 = vld [vmem:[#allocation8 + $0xd04] ss:$108 sps:$4 sm:$0xff]  }
0x1d6a   :  { %5799 = vmatpush1.bf16.msra.mxu0 %v8421_v1  ;;  %v8492_v1 = vld [vmem:[#allocation8 + $0xcfc] ss:$108 sps:$4 sm:$0xff]  }
0x1d6b   :  { %5800 = vmatprep.subr.bf16.mxu0 %v8429_v48  ;;  %5758 = vmatpush1.bf16.msra.mxu1 %v8424_v50  ;;  %v8490_v48 = vld [vmem:[#allocation8 + $0xcf8] ss:$108 sps:$4 sm:$0xff]   ;;  %v8493_v50 = vld [vmem:[#allocation8 + $0xd00] ss:$108 sps:$4 sm:$0xff]  }
0x1d6c   :  { %5759 = vmatprep.subr.bf16.mxu1 %v8432_v59 }
0x1d6e   :  { %5801 = vmatpush1.bf16.msra.mxu0 %v8427_v52  ;;  %v8498_v52 = vld [vmem:[#allocation10 + $0xc] ss:$16 sps:$4 sm:$0xff]  }
0x1d6f   :  { %5802 = vmatprep.subr.bf16.mxu0 %v8435_v60  ;;  %5760 = vmatpush1.bf16.msra.mxu1 %v8430_v7 }
0x1d70   :  { %5761 = vmatprep.subr.bf16.mxu1 %v8438_v16 }
0x1d72   :  { %5803 = vmatpush1.bf16.msra.mxu0 %v8433_v9 }
0x1d73   :  { %5804 = vmatprep.subr.bf16.mxu0 %v8441_v46  ;;  %5762 = vmatpush1.bf16.msra.mxu1 %v8436_v13  ;;  %v5275_v13 = vld [vmem:[#allocation11 + $0x26] ss:$8 sm:$0x3] }
0x1d74   :  { %5763 = vmatprep.subr.bf16.mxu1 %v8444_v25  ;;  %v5314_v25 = vrot.slane %v5275_v13, %v9062_v3 }
0x1d76   :  { %5805 = vmatpush1.bf16.msra.mxu0 %v8439_v24  ;;  %v5277_v24 = vld [vmem:[#allocation11 + $0x27] ss:$8 sm:$0x3] }
0x1d77   :  { %5806 = vmatprep.subr.bf16.mxu0 %v8447_v47  ;;  %5764 = vmatpush1.bf16.msra.mxu1 %v8442_v19  ;;  %v5318_v47 = vrot.slane %v5275_v13, %v9065_v4 }
0x1d78   :  { %5765 = vmatprep.subr.bf16.mxu1 %v8450_v6 }
0x1d7a   :  { %5807 = vmatpush1.bf16.msra.mxu0 %v8445_v8 }
0x1d7b   :  { %5808 = vmatprep.subr.bf16.mxu0 %v8453_v18  ;;  %5766 = vmatpush1.bf16.msra.mxu1 %v8448_v42  ;;  %v5329_v42 = vrot.slane %v5277_v24, %v9062_v3 }
0x1d7c   :  { %5767 = vmatprep.subr.bf16.mxu1 %v8456_v44 }
0x1d7e   :  { %5809 = vmatpush1.bf16.msra.mxu0 %v8451_v54  ;;  %v5333_v54 = vrot.slane %v5277_v24, %v9065_v4 }
0x1d7f   :  { %5810 = vmatprep.subr.bf16.mxu0 %v8459_v45  ;;  %5768 = vmatpush1.bf16.msra.mxu1 %v8454_v11 }
0x1d80   :  { %5769 = vmatprep.subr.bf16.mxu1 %v8462_v55  ;;  %v8505_v55 = vld [vmem:[#allocation10 + $0x68] ss:$16 sps:$4 sm:$0xff]  }
0x1d82   :  { %5811 = vmatpush1.bf16.msra.mxu0 %v8457_v12 }
0x1ded   :  { %v5280_v26 = vpop.xlane.xlu1 %5279 }
0x1dee   :  { %v5284_v63 = vmul.f32 0.00390625, %v5280_v26 }
0x1def   :  { %v5283_v14 = vpop.xlane.xlu0 %5282 }
0x1df0   :  { %v9681_v62 = vsub.f32 %v9665_v5, %v5284_v63  ;;  %v9684_v38 = vsub.f32 %v9668_v51, %v5284_v63  ;;  %v5285_v61 = vmul.f32 0.00390625, %v5283_v14 }
0x1df2   :  { %v9687_v10 = vsub.f32 %v9671_v22, %v5285_v61  ;;  %v9690_v17 = vsub.f32 %v9674_v0, %v5285_v61  ;;  %v5290_v23 = vmul.f32 %v9681_v62, %v9681_v62  ;;  %v5291_v43 = vmul.f32 %v9684_v38, %v9684_v38  ;;  %v8465_v22 = vld [vmem:[#allocation8 + $0x8cc] ss:$108 sps:$4 sm:$0xff]  }
0x1df3   :  { %v8460_v0 = vld [vmem:[#allocation8 + $0x8c0] ss:$108 sps:$4 sm:$0xff]   ;;  %5812 = vmatprep.subr.bf16.mxu0 %v8465_v22 }
0x1df4   :  { %v5294_v33 = vadd.f32 %v5291_v43, %v5290_v23  ;;  %v5292_v5 = vmul.f32 %v9687_v10, %v9687_v10  ;;  %v5293_v15 = vmul.f32 %v9690_v17, %v9690_v17  ;;  %5770 = vmatpush1.bf16.msra.mxu1 %v8460_v0  ;;  %5813 = vmatpush1.bf16.msra.mxu0 %v8463_v20  ;;  %v8496_v43 = vld [vmem:[#allocation10 + $0x8] ss:$16 sps:$4 sm:$0xff]   ;;  %v8510_v22 = vld [vmem:[#allocation10 + $0x8c] ss:$16 sps:$4 sm:$0xff]  }
0x1df5   :  { %5771 = vmatprep.subr.bf16.mxu1 %v8468_v49  ;;  %5814 = vmatprep.subr.bf16.mxu0 %v8471_v56  ;;  %v8508_v0 = vld [vmem:[#allocation10 + $0x88] ss:$16 sps:$4 sm:$0xff]   ;;  %v8513_v20 = vld [vmem:[#allocation10 + $0xac] ss:$16 sps:$4 sm:$0xff]  }
0x1df6   :  { %5295 = vadd.xlane.f32.xlu0 %v5294_v33  ;;  %v5297_v51 = vadd.f32 %v5293_v15, %v5292_v5  ;;  %v8499_v33 = vld [vmem:[#allocation10 + $0x28] ss:$16 sps:$4 sm:$0xff]   ;;  %v8504_v5 = vld [vmem:[#allocation10 + $0x4c] ss:$16 sps:$4 sm:$0xff]  }
0x1df7   :  { %v8502_v15 = vld [vmem:[#allocation10 + $0x48] ss:$16 sps:$4 sm:$0xff]   ;;  %v8516_v56 = vld [vmem:[#allocation10 + $0xcc] ss:$16 sps:$4 sm:$0xff]  }
0x1df8   :  { %5298 = vadd.xlane.f32.xlu1 %v5297_v51  ;;  %5772 = vmatpush1.bf16.msra.mxu1 %v8466_v21  ;;  %v8507_v51 = vld [vmem:[#allocation10 + $0x6c] ss:$16 sps:$4 sm:$0xff]   ;;  %v8511_v49 = vld [vmem:[#allocation10 + $0xa8] ss:$16 sps:$4 sm:$0xff]  }
0x1df9   :  { %5815 = vmatpush1.bf16.msra.mxu0 %v8469_v27  ;;  %5773 = vmatprep.subr.bf16.mxu1 %v8474_v53  ;;  %v8514_v21 = vld [vmem:[#allocation10 + $0xc8] ss:$16 sps:$4 sm:$0xff]   ;;  %v8519_v27 = vld [vmem:[#allocation10 + $0xec] ss:$16 sps:$4 sm:$0xff]  }
0x1dfa   :  { %5816 = vmatprep.subr.bf16.mxu0 %v8477_v29  ;;  %v8517_v53 = vld [vmem:[#allocation10 + $0xe8] ss:$16 sps:$4 sm:$0xff]   ;;  %v8522_v29 = vld [vmem:[#allocation10 + $0x10c] ss:$16 sps:$4 sm:$0xff]  }
0x1dfc   :  { %5774 = vmatpush1.bf16.msra.mxu1 %v8472_v30  ;;  %v8520_v30 = vld [vmem:[#allocation10 + $0x108] ss:$16 sps:$4 sm:$0xff]  }
0x1dfd   :  { %5817 = vmatpush1.bf16.msra.mxu0 %v8475_v57  ;;  %5775 = vmatprep.subr.bf16.mxu1 %v8480_v58  ;;  %v8525_v57 = vld [vmem:[#allocation10 + $0x12c] ss:$16 sps:$4 sm:$0xff]   ;;  %v8523_v58 = vld [vmem:[#allocation10 + $0x128] ss:$16 sps:$4 sm:$0xff]  }
0x1dfe   :  { %5818 = vmatprep.subr.bf16.mxu0 %v8483_v31  ;;  %v8528_v31 = vld [vmem:[#allocation10 + $0x14c] ss:$16 sps:$4 sm:$0xff]  }
0x1e00   :  { %5776 = vmatpush1.bf16.msra.mxu1 %v8478_v32  ;;  %v8526_v32 = vld [vmem:[#allocation10 + $0x148] ss:$16 sps:$4 sm:$0xff]  }
0x1e01   :  { %5819 = vmatpush1.bf16.msra.mxu0 %v8481_v34  ;;  %5777 = vmatprep.subr.bf16.mxu1 %v8486_v36  ;;  %v8531_v34 = vld [vmem:[#allocation10 + $0x16c] ss:$16 sps:$4 sm:$0xff]  }
0x1e02   :  { %5820 = vmatprep.subr.bf16.mxu0 %v8489_v37  ;;  %v8534_v36 = vld [vmem:[#allocation10 + $0x18c] ss:$16 sps:$4 sm:$0xff]  }
0x1e03   :  { %v8537_v37 = vld [vmem:[#allocation10 + $0x1ac] ss:$16 sps:$4 sm:$0xff]  }
0x1e04   :  { %5778 = vmatpush1.bf16.msra.mxu1 %v8484_v35  ;;  %v8529_v35 = vld [vmem:[#allocation10 + $0x168] ss:$16 sps:$4 sm:$0xff]  }
0x1e05   :  { %5821 = vmatpush1.bf16.msra.mxu0 %v8487_v28  ;;  %5779 = vmatprep.subr.bf16.mxu1 %v8492_v1  ;;  %v8532_v28 = vld [vmem:[#allocation10 + $0x188] ss:$16 sps:$4 sm:$0xff]  }
0x1e06   :  { %5822 = vmatprep.subr.bf16.mxu0 %v8495_v40  ;;  %v8535_v1 = vld [vmem:[#allocation10 + $0x1a8] ss:$16 sps:$4 sm:$0xff]   ;;  %v8540_v40 = vld [vmem:[#allocation10 + $0x1cc] ss:$16 sps:$4 sm:$0xff]  }
0x1e08   :  { %5780 = vmatpush1.bf16.msra.mxu1 %v8490_v48  ;;  %v8538_v48 = vld [vmem:[#allocation10 + $0x1c8] ss:$16 sps:$4 sm:$0xff]  }
0x1e09   :  { %5823 = vmatpush1.bf16.msra.mxu0 %v8493_v50  ;;  %6244 = vmatprep.subr.bf16.mxu1 %v8498_v52  ;;  %v8543_v50 = vld [vmem:[#allocation10 + $0x1ec] ss:$16 sps:$4 sm:$0xff]   ;;  %v8541_v52 = vld [vmem:[#allocation10 + $0x1e8] ss:$16 sps:$4 sm:$0xff]  }
0x1e83   :  { %v5296_v59 = vpop.xlane.xlu0 %5295 }
0x1e84   :  { %v5300_v60 = vmul.f32 0.00390625, %v5296_v59  ;;  %v8546_v59 = vld [vmem:[#allocation10 + $0x20c] ss:$16 sps:$4 sm:$0xff]  }
0x1e85   :  { %v5299_v7 = vpop.xlane.xlu1 %5298 }
0x1e86   :  { %v5302_v9 = vadd.f32 1e-05, %v5300_v60  ;;  %v5301_v16 = vmul.f32 0.00390625, %v5299_v7  ;;  %v5407_v60 = vld [vmem:[#allocation11 + $0x40] ss:$8 sm:$0xf] }
0x1e87   :  { %v5412_v7 = vrot.slane %v5407_v60, %v9062_v3 }
0x1e88   :  { %8728 = vrsqrt.f32 %v5302_v9  ;;  %v5303_v46 = vadd.f32 1e-05, %v5301_v16  ;;  %v5420_v9 = vrot.slane %v5407_v60, %v2393_v39  ;;  %v5416_v16 = vrot.slane %v5407_v60, %v9065_v4 }
0x1e8a   :  { %8730 = vrsqrt.f32 %v5303_v46  ;;  %v5424_v46 = vrot.slane %v5407_v60, %v2397_v41  ;;  %v8585_v60 = vld [vmem:[#allocation10 + $0x3ac] ss:$16 sps:$4 sm:$0xff]  }
0x1e92   :  { %v8729_v19 = vpop.eup %8728 }
0x1e93   :  { %v5306_v8 = vmul.f32 %v8729_v19, %v9681_v62  ;;  %v5307_v6 = vmul.f32 %v8729_v19, %v9684_v38 }
0x1e94   :  { %v8731_v18 = vpop.eup %8730 }
0x1e95   :  { %v5308_v44 = vmul.f32 %v8731_v18, %v9687_v10  ;;  %v5309_v45 = vmul.f32 %v8731_v18, %v9690_v17  ;;  %v5322_v11 = vmul.f32 %v5318_v47, %v5307_v6  ;;  %v5321_v12 = vmul.f32 %v5314_v25, %v5306_v8  ;;  %v8501_v17 = vld [vmem:[#allocation10 + $0x2c] ss:$16 sps:$4 sm:$0xff]  }
0x1e97   :  { %v5324_v26 = vmul.f32 %v5318_v47, %v5309_v45  ;;  %v5323_v63 = vmul.f32 %v5314_v25, %v5308_v44  ;;  %v9708_v14 = vadd.f32 %v5333_v54, %v5322_v11  ;;  %v9712_v62 = vadd.f32 %v5329_v42, %v5321_v12 }
0x1e99   :  { %v9710_v61 = vadd.f32 %v5333_v54, %v5324_v26  ;;  %v9714_v38 = vadd.f32 %v5329_v42, %v5323_v63 }
0x1e9b   :  { %v5341_v23 = vpack.c.bf16 %v9710_v61, %v9708_v14  ;;  %v5340_v10 = vpack.c.bf16 %v9714_v38, %v9712_v62 }
0x1e9d   :  { %5781 = vmatprep.mubr.bf16.mxu1 %v5341_v23  ;;  %5824 = vmatprep.mubr.bf16.mxu0 %v5341_v23 }
0x1e9e   :  { %5782 = vmatmul.mubr.bf16.vlgmr.msra.gmra.mrb[84].mxu1 %v5340_v10  ;;  %5825 = vmatmul.mubr.bf16.vlgmr.msra.gmra.mrb[92].mxu0 %v5340_v10 }
0x1e9f   :  { %6245 = vmatpush1.bf16.msra.mxu1 %v8496_v43 }
0x1ea0   :  { %6246 = vmatprep.subr.bf16.mxu1 %v8501_v17 }
0x1ea3   :  { %6247 = vmatpush1.bf16.msra.mxu1 %v8499_v33 }
0x1ea4   :  { %6248 = vmatprep.subr.bf16.mxu1 %v8504_v5 }
0x1ea7   :  { %6249 = vmatpush1.bf16.msra.mxu1 %v8502_v15 }
0x1ea8   :  { %6250 = vmatprep.subr.bf16.mxu1 %v8507_v51 }
0x1eab   :  { %6251 = vmatpush1.bf16.msra.mxu1 %v8505_v55 }
0x1eac   :  { %6252 = vmatprep.subr.bf16.mxu1 %v8510_v22  ;;  %v8544_v22 = vld [vmem:[#allocation10 + $0x208] ss:$16 sps:$4 sm:$0xff]  }
0x1eaf   :  { %6253 = vmatpush1.bf16.msra.mxu1 %v8508_v0  ;;  %v8549_v0 = vld [vmem:[#allocation10 + $0x22c] ss:$16 sps:$4 sm:$0xff]  }
0x1eb0   :  { %6254 = vmatprep.subr.bf16.mxu1 %v8513_v20  ;;  %v8547_v20 = vld [vmem:[#allocation10 + $0x228] ss:$16 sps:$4 sm:$0xff]  }
0x1eb3   :  { %6255 = vmatpush1.bf16.msra.mxu1 %v8511_v49  ;;  %v8552_v49 = vld [vmem:[#allocation10 + $0x24c] ss:$16 sps:$4 sm:$0xff]  }
0x1eb4   :  { %6256 = vmatprep.subr.bf16.mxu1 %v8516_v56  ;;  %v8550_v56 = vld [vmem:[#allocation10 + $0x248] ss:$16 sps:$4 sm:$0xff]  }
0x1eb7   :  { %6257 = vmatpush1.bf16.msra.mxu1 %v8514_v21  ;;  %v8555_v21 = vld [vmem:[#allocation10 + $0x26c] ss:$16 sps:$4 sm:$0xff]  }
0x1eb8   :  { %6258 = vmatprep.subr.bf16.mxu1 %v8519_v27  ;;  %v8553_v27 = vld [vmem:[#allocation10 + $0x268] ss:$16 sps:$4 sm:$0xff]  }
0x1ebb   :  { %6259 = vmatpush1.bf16.msra.mxu1 %v8517_v53  ;;  %v8558_v53 = vld [vmem:[#allocation10 + $0x28c] ss:$16 sps:$4 sm:$0xff]  }
0x1ebc   :  { %6260 = vmatprep.subr.bf16.mxu1 %v8522_v29  ;;  %v8556_v29 = vld [vmem:[#allocation10 + $0x288] ss:$16 sps:$4 sm:$0xff]  }
0x1ebf   :  { %6261 = vmatpush1.bf16.msra.mxu1 %v8520_v30  ;;  %v8561_v30 = vld [vmem:[#allocation10 + $0x2ac] ss:$16 sps:$4 sm:$0xff]  }
0x1ec0   :  { %6262 = vmatprep.subr.bf16.mxu1 %v8525_v57  ;;  %v8559_v57 = vld [vmem:[#allocation10 + $0x2a8] ss:$16 sps:$4 sm:$0xff]  }
0x1ec3   :  { %6263 = vmatpush1.bf16.msra.mxu1 %v8523_v58  ;;  %v8564_v58 = vld [vmem:[#allocation10 + $0x2cc] ss:$16 sps:$4 sm:$0xff]  }
0x1ec4   :  { %6264 = vmatprep.subr.bf16.mxu1 %v8528_v31  ;;  %v8562_v31 = vld [vmem:[#allocation10 + $0x2c8] ss:$16 sps:$4 sm:$0xff]  }
0x1ec7   :  { %6265 = vmatpush1.bf16.msra.mxu1 %v8526_v32  ;;  %v8567_v32 = vld [vmem:[#allocation10 + $0x2ec] ss:$16 sps:$4 sm:$0xff]  }
0x1ec8   :  { %6266 = vmatprep.subr.bf16.mxu1 %v8531_v34  ;;  %v8565_v34 = vld [vmem:[#allocation10 + $0x2e8] ss:$16 sps:$4 sm:$0xff]  }
0x1ecb   :  { %6267 = vmatpush1.bf16.msra.mxu1 %v8529_v35  ;;  %v8570_v35 = vld [vmem:[#allocation10 + $0x30c] ss:$16 sps:$4 sm:$0xff]  }
0x1ecc   :  { %6268 = vmatprep.subr.bf16.mxu1 %v8534_v36  ;;  %v8568_v36 = vld [vmem:[#allocation10 + $0x308] ss:$16 sps:$4 sm:$0xff]  }
0x1ecf   :  { %6269 = vmatpush1.bf16.msra.mxu1 %v8532_v28  ;;  %v8573_v28 = vld [vmem:[#allocation10 + $0x32c] ss:$16 sps:$4 sm:$0xff]  }
0x1ed0   :  { %6270 = vmatprep.subr.bf16.mxu1 %v8537_v37  ;;  %v8571_v37 = vld [vmem:[#allocation10 + $0x328] ss:$16 sps:$4 sm:$0xff]  }
0x1ed3   :  { %6271 = vmatpush1.bf16.msra.mxu1 %v8535_v1  ;;  %v8576_v1 = vld [vmem:[#allocation10 + $0x34c] ss:$16 sps:$4 sm:$0xff]  }
0x1ed4   :  { %6272 = vmatprep.subr.bf16.mxu1 %v8540_v40  ;;  %v8574_v40 = vld [vmem:[#allocation10 + $0x348] ss:$16 sps:$4 sm:$0xff]  }
0x1ed7   :  { %6273 = vmatpush1.bf16.msra.mxu1 %v8538_v48  ;;  %v8579_v48 = vld [vmem:[#allocation10 + $0x36c] ss:$16 sps:$4 sm:$0xff]  }
0x1ed8   :  { %6274 = vmatprep.subr.bf16.mxu1 %v8543_v50  ;;  %v8577_v50 = vld [vmem:[#allocation10 + $0x368] ss:$16 sps:$4 sm:$0xff]  }
0x1edb   :  { %6275 = vmatpush1.bf16.msra.mxu1 %v8541_v52  ;;  %v8582_v52 = vld [vmem:[#allocation10 + $0x38c] ss:$16 sps:$4 sm:$0xff]  }
0x1edc   :  { %6287 = vmatprep.subr.bf16.mxu1 %v8546_v59  ;;  %v8580_v59 = vld [vmem:[#allocation10 + $0x388] ss:$16 sps:$4 sm:$0xff]  }
0x1f71   :  { %v5783_v13 = vpop.f32.mrb[84].mxu1  ;;  %v5826_v24 = vpop.f32.mrb[92].mxu0 }
0x1f72   :  { %v5784_v25 = vadd.f32 %v5783_v13, %v5412_v7  ;;  %v5827_v47 = vadd.f32 %v5826_v24, %v5420_v9  ;;  %v5785_v19 = vpop.f32.mrb[85].mxu1  ;;  %v5828_v8 = vpop.f32.mrb[93].mxu0  ;;  %v8589_v13 = vld [vmem:[#allocation10 + $0x3e8] ss:$16 sps:$4 sm:$0xff]  }
0x1f73   :  { %v5786_v6 = vadd.f32 %v5785_v19, %v5416_v16  ;;  %v5829_v18 = vadd.f32 %v5828_v8, %v5424_v46  ;;  %v5787_v42 = vpop.f32.mrb[86].mxu1  ;;  %v5830_v54 = vpop.f32.mrb[94].mxu0  ;;  %v5912_v24 = vld [vmem:[#allocation11 + $0x41] ss:$8 sm:$0x3] }
0x1f74   :  { %v5788_v44 = vadd.f32 %v5787_v42, %v5412_v7  ;;  %v5831_v45 = vadd.f32 %v5830_v54, %v5420_v9  ;;  %v5789_v11 = vpop.f32.mrb[87].mxu1  ;;  %v5832_v12 = vpop.f32.mrb[95].mxu0  ;;  %v5835_v63 = vmax.f32 %v5784_v25, 0.0  ;;  %v5837_v23 = vmax.f32 %v5827_v47, 0.0  ;;  %v8583_v7 = vld [vmem:[#allocation10 + $0x3a8] ss:$16 sps:$4 sm:$0xff]  }
0x1f75   :  { %v5790_v39 = vadd.f32 %v5789_v11, %v5416_v16  ;;  %v5833_v26 = vadd.f32 %v5832_v12, %v5424_v46  ;;  %v5836_v10 = vmax.f32 %v5786_v6, 0.0  ;;  %v5838_v43 = vmax.f32 %v5829_v18, 0.0  ;;  %v8588_v9 = vld [vmem:[#allocation10 + $0x3cc] ss:$16 sps:$4 sm:$0xff]   ;;  %v8586_v16 = vld [vmem:[#allocation10 + $0x3c8] ss:$16 sps:$4 sm:$0xff]  }
0x1f76   :  { %v5839_v2 = vmax.f32 %v5788_v44, 0.0  ;;  %v5841_v41 = vmax.f32 %v5831_v45, 0.0  ;;  %v8591_v46 = vld [vmem:[#allocation10 + $0x3ec] ss:$16 sps:$4 sm:$0xff]   ;;  %v5917_v25 = vrot.slane %v5912_v24, %v9062_v3  ;;  %v5921_v47 = vrot.slane %v5912_v24, %v9065_v4  ;;  %v8637_v24 = vld [vmem:[#allocation8 + $0xd08] ss:$108 sps:$4 sm:$0xff]  }
0x1f77   :  { %v5840_v17 = vmax.f32 %v5790_v39, 0.0  ;;  %v5842_v33 = vmax.f32 %v5833_v26, 0.0 }
0x1f78   :  { %v5843_v5 = vpack.c.bf16 %v5839_v2, %v5835_v63  ;;  %v9726_v15 = vpack.c.bf16 %v5841_v41, %v5837_v23  ;;  %v8592_v2 = vld [vmem:[#allocation8 + $0x60] ss:$108 sps:$4 sm:$0xff]   ;;  %v8594_v41 = vld [vmem:[#allocation8 + $0x64] ss:$108 sps:$4 sm:$0xff]  }
0x1f79   :  { %v5844_v51 = vpack.c.bf16 %v5840_v17, %v5836_v10  ;;  %v5846_v55 = vpack.c.bf16 %v5842_v33, %v5838_v43  ;;  %v8597_v10 = vld [vmem:[#allocation8 + $0x13c] ss:$108 sps:$4 sm:$0xff]   ;;  %6626 = vmatprep.subr.bf16.mxu0 %v8594_v41  ;;  %v8595_v43 = vld [vmem:[#allocation8 + $0x138] ss:$108 sps:$4 sm:$0xff]   ;;  %v8604_v33 = vld [vmem:[#allocation8 + $0x3c0] ss:$108 sps:$4 sm:$0xff]  }
0x1f7a   :  { %6627 = vmatpush1.bf16.msra.mxu0 %v8592_v2  ;;  %v8598_v17 = vld [vmem:[#allocation8 + $0x210] ss:$108 sps:$4 sm:$0xff]  }
0x1f7b   :  { %6276 = vmatprep.mubr.bf16.mxu1 %v5844_v51  ;;  %6628 = vmatprep.subr.bf16.mxu0 %v8597_v10  ;;  %v8612_v51 = vld [vmem:[#allocation8 + $0x574] ss:$108 sps:$4 sm:$0xff]  }
0x1f7c   :  { %6277 = vmatmul.mubr.bf16.vlgmr.msra.gmra.mrb[88].mxu1 %v5843_v5  ;;  %v8609_v5 = vld [vmem:[#allocation8 + $0x49c] ss:$108 sps:$4 sm:$0xff]  }
0x1f7d   :  { %6288 = vmatpush1.bf16.msra.mxu1 %v8544_v22  ;;  %6319 = vmatprep.mubr.bf16.mxu1 %v5846_v55  ;;  %v8610_v55 = vld [vmem:[#allocation8 + $0x570] ss:$108 sps:$4 sm:$0xff]   ;;  %v8615_v22 = vld [vmem:[#allocation8 + $0x64c] ss:$108 sps:$4 sm:$0xff]  }
0x1f7e   :  { %6289 = vmatprep.subr.bf16.mxu1 %v8549_v0  ;;  %6629 = vmatpush1.bf16.msra.mxu0 %v8595_v43  ;;  %v8613_v0 = vld [vmem:[#allocation8 + $0x648] ss:$108 sps:$4 sm:$0xff]  }
0x1f81   :  { %6290 = vmatpush1.bf16.msra.mxu1 %v8547_v20 }
0x1f82   :  { %6291 = vmatprep.subr.bf16.mxu1 %v8552_v49 }
0x1f85   :  { %6292 = vmatpush1.bf16.msra.mxu1 %v8550_v56 }
0x1f86   :  { %6293 = vmatprep.subr.bf16.mxu1 %v8555_v21 }
0x1f89   :  { %6294 = vmatpush1.bf16.msra.mxu1 %v8553_v27 }
0x1f8a   :  { %6295 = vmatprep.subr.bf16.mxu1 %v8558_v53 }
0x1f8d   :  { %6296 = vmatpush1.bf16.msra.mxu1 %v8556_v29 }
0x1f8e   :  { %6297 = vmatprep.subr.bf16.mxu1 %v8561_v30 }
0x1f91   :  { %6298 = vmatpush1.bf16.msra.mxu1 %v8559_v57 }
0x1f92   :  { %6299 = vmatprep.subr.bf16.mxu1 %v8564_v58 }
0x1f95   :  { %6300 = vmatpush1.bf16.msra.mxu1 %v8562_v31 }
0x1f96   :  { %6301 = vmatprep.subr.bf16.mxu1 %v8567_v32 }
0x1f99   :  { %6302 = vmatpush1.bf16.msra.mxu1 %v8565_v34 }
0x1f9a   :  { %6303 = vmatprep.subr.bf16.mxu1 %v8570_v35 }
0x1f9d   :  { %6304 = vmatpush1.bf16.msra.mxu1 %v8568_v36  ;;  %v8618_v36 = vld [vmem:[#allocation8 + $0x724] ss:$108 sps:$4 sm:$0xff]  }
0x1f9e   :  { %6305 = vmatprep.subr.bf16.mxu1 %v8573_v28  ;;  %v8616_v28 = vld [vmem:[#allocation8 + $0x720] ss:$108 sps:$4 sm:$0xff]  }
0x1fa1   :  { %6306 = vmatpush1.bf16.msra.mxu1 %v8571_v37  ;;  %v8621_v37 = vld [vmem:[#allocation8 + $0x7fc] ss:$108 sps:$4 sm:$0xff]  }
0x1fa2   :  { %6307 = vmatprep.subr.bf16.mxu1 %v8576_v1  ;;  %v8619_v1 = vld [vmem:[#allocation8 + $0x7f8] ss:$108 sps:$4 sm:$0xff]  }
0x1fa5   :  { %6308 = vmatpush1.bf16.msra.mxu1 %v8574_v40  ;;  %v8624_v40 = vld [vmem:[#allocation8 + $0x8d4] ss:$108 sps:$4 sm:$0xff]  }
0x1fa6   :  { %6309 = vmatprep.subr.bf16.mxu1 %v8579_v48  ;;  %v8622_v48 = vld [vmem:[#allocation8 + $0x8d0] ss:$108 sps:$4 sm:$0xff]  }
0x1fa9   :  { %6310 = vmatpush1.bf16.msra.mxu1 %v8577_v50  ;;  %v8627_v50 = vld [vmem:[#allocation8 + $0x9ac] ss:$108 sps:$4 sm:$0xff]  }
0x1faa   :  { %6311 = vmatprep.subr.bf16.mxu1 %v8582_v52  ;;  %v8625_v52 = vld [vmem:[#allocation8 + $0x9a8] ss:$108 sps:$4 sm:$0xff]  }
0x1fad   :  { %6312 = vmatpush1.bf16.msra.mxu1 %v8580_v59  ;;  %v8630_v59 = vld [vmem:[#allocation8 + $0xa84] ss:$108 sps:$4 sm:$0xff]  }
0x1fae   :  { %6313 = vmatprep.subr.bf16.mxu1 %v8585_v60  ;;  %v8628_v60 = vld [vmem:[#allocation8 + $0xa80] ss:$108 sps:$4 sm:$0xff]  }
0x1fb1   :  { %6314 = vmatpush1.bf16.msra.mxu1 %v8583_v7  ;;  %v8631_v7 = vld [vmem:[#allocation8 + $0xb58] ss:$108 sps:$4 sm:$0xff]  }
0x1fb2   :  { %6315 = vmatprep.subr.bf16.mxu1 %v8588_v9  ;;  %v8633_v9 = vld [vmem:[#allocation8 + $0xb5c] ss:$108 sps:$4 sm:$0xff]  }
0x1fb5   :  { %6316 = vmatpush1.bf16.msra.mxu1 %v8586_v16  ;;  %v8636_v16 = vld [vmem:[#allocation8 + $0xc34] ss:$108 sps:$4 sm:$0xff]  }
0x1fb6   :  { %6317 = vmatprep.subr.bf16.mxu1 %v8591_v46  ;;  %v8634_v46 = vld [vmem:[#allocation8 + $0xc30] ss:$108 sps:$4 sm:$0xff]  }
0x1fb9   :  { %6318 = vmatpush1.bf16.msra.mxu1 %v8589_v13  ;;  %v8639_v13 = vld [vmem:[#allocation8 + $0xd0c] ss:$108 sps:$4 sm:$0xff]  }
0x1fbc   :  { %6320 = vmatmul.mubr.bf16.vlgmr.msra.gmra.mrb[88].mxu1 %v9726_v15  ;;  %v8607_v15 = vld [vmem:[#allocation8 + $0x498] ss:$108 sps:$4 sm:$0xff]  }
0x208f   :  { %v6321_v19 = vpop.f32.mrb[88].mxu1 }
0x2090   :  { %v7770_v8 = vadd.f32 %v6321_v19, %v5917_v25  ;;  %v6323_v6 = vpop.f32.mrb[89].mxu1 }
0x2091   :  { %v7771_v18 = vadd.f32 %v6323_v6, %v5921_v47  ;;  %v6325_v42 = vpop.f32.mrb[90].mxu1 }
0x2092   :  { %v6330_v54 = vadd.f32 %v7770_v8, %v9712_v62  ;;  %v7772_v44 = vadd.f32 %v6325_v42, %v5917_v25  ;;  %v6327_v45 = vpop.f32.mrb[91].mxu1  ;;  %v8600_v62 = vld [vmem:[#allocation8 + $0x214] ss:$108 sps:$4 sm:$0xff]  }
0x2093   :  { %v6331_v11 = vadd.f32 %v7771_v18, %v9708_v14  ;;  %v7773_v12 = vadd.f32 %v6327_v45, %v5921_v47  ;;  %6630 = vmatprep.subr.bf16.mxu0 %v8600_v62  ;;  %v8603_v14 = vld [vmem:[#allocation8 + $0x2ec] ss:$108 sps:$4 sm:$0xff]   ;;  %v8640_v25 = vld [vmem:[#allocation8 + $0x728] ss:$108 sps:$4 sm:$0xff]  }
0x2094   :  { %v6332_v39 = vadd.f32 %v7772_v44, %v9714_v38  ;;  %6631 = vmatpush1.bf16.msra.mxu0 %v8598_v17  ;;  %v8601_v38 = vld [vmem:[#allocation8 + $0x2e8] ss:$108 sps:$4 sm:$0xff]  }
0x2095   :  { %v6333_v26 = vadd.f32 %v7773_v12, %v9710_v61  ;;  %v6338_v63 = vadd.f32 %v6331_v11, %v6330_v54  ;;  %6632 = vmatprep.subr.bf16.mxu0 %v8603_v14  ;;  %v8606_v61 = vld [vmem:[#allocation8 + $0x3c4] ss:$108 sps:$4 sm:$0xff]   ;;  %v6337_v44 = vld [vmem:[#allocation11 + $0x43] ss:$8 sm:$0x3] }
0x2097   :  { %6339 = vadd.xlane.f32.xlu1 %v6338_v63  ;;  %v6341_v23 = vadd.f32 %v6333_v26, %v6332_v39  ;;  %v6389_v63 = vrot.slane %v6337_v44, %v9062_v3 }
0x2098   :  { %6633 = vmatpush1.bf16.msra.mxu0 %v8601_v38 }
0x2099   :  { %6342 = vadd.xlane.f32.xlu0 %v6341_v23  ;;  %6634 = vmatprep.subr.bf16.mxu0 %v8606_v61  ;;  %v6393_v23 = vrot.slane %v6337_v44, %v9065_v4  ;;  %v6703_v44 = vld [vmem:[#allocation11 + $0x45] ss:$0 sm:$0xff] }
0x209c   :  { %6635 = vmatpush1.bf16.msra.mxu0 %v8604_v33 }
0x209d   :  { %6636 = vmatprep.subr.bf16.mxu0 %v8609_v5 }
0x20a0   :  { %6637 = vmatpush1.bf16.msra.mxu0 %v8607_v15 }
0x20a1   :  { %6638 = vmatprep.subr.bf16.mxu0 %v8612_v51 }
0x20a4   :  { %6639 = vmatpush1.bf16.msra.mxu0 %v8610_v55 }
0x20a5   :  { %6640 = vmatprep.subr.bf16.mxu0 %v8615_v22 }
0x20a8   :  { %6641 = vmatpush1.bf16.msra.mxu0 %v8613_v0 }
0x20a9   :  { %6642 = vmatprep.subr.bf16.mxu0 %v8618_v36  ;;  %v8646_v36 = vld [vmem:[#allocation8 + $0x9b0] ss:$108 sps:$4 sm:$0xff]  }
0x20ac   :  { %6643 = vmatpush1.bf16.msra.mxu0 %v8616_v28  ;;  %v8647_v28 = vld [vmem:[#allocation8 + $0x2f0] ss:$108 sps:$4 sm:$0xff]  }
0x20ad   :  { %6644 = vmatprep.subr.bf16.mxu0 %v8621_v37  ;;  %v8648_v37 = vld [vmem:[#allocation8 + $0xa88] ss:$108 sps:$4 sm:$0xff]  }
0x20b0   :  { %6645 = vmatpush1.bf16.msra.mxu0 %v8619_v1  ;;  %v8649_v1 = vld [vmem:[#allocation8 + $0x3c8] ss:$108 sps:$4 sm:$0xff]  }
0x20b1   :  { %6646 = vmatprep.subr.bf16.mxu0 %v8624_v40  ;;  %v8650_v40 = vld [vmem:[#allocation8 + $0xb60] ss:$108 sps:$4 sm:$0xff]  }
0x20b4   :  { %6647 = vmatpush1.bf16.msra.mxu0 %v8622_v48  ;;  %v8651_v48 = vld [vmem:[#allocation8 + $0x4a0] ss:$108 sps:$4 sm:$0xff]  }
0x20b5   :  { %6648 = vmatprep.subr.bf16.mxu0 %v8627_v50  ;;  %v8652_v50 = vld [vmem:[#allocation8 + $0xc38] ss:$108 sps:$4 sm:$0xff]  }
0x20b8   :  { %6649 = vmatpush1.bf16.msra.mxu0 %v8625_v52  ;;  %v8653_v52 = vld [vmem:[#allocation8 + $0x578] ss:$108 sps:$4 sm:$0xff]  }
0x20b9   :  { %6650 = vmatprep.subr.bf16.mxu0 %v8630_v59  ;;  %v8654_v59 = vld [vmem:[#allocation8 + $0xd10] ss:$108 sps:$4 sm:$0xff]  }
0x20bc   :  { %6651 = vmatpush1.bf16.msra.mxu0 %v8628_v60  ;;  %v8655_v60 = vld [vmem:[#allocation8 + $0x650] ss:$108 sps:$4 sm:$0xff]  }
0x20bd   :  { %6652 = vmatprep.subr.bf16.mxu0 %v8633_v9 }
0x20c0   :  { %6653 = vmatpush1.bf16.msra.mxu0 %v8631_v7  ;;  %v6437_v7 = vld [vmem:[#allocation11 + $0x44] ss:$8 sm:$0x3] }
0x20c1   :  { %6654 = vmatprep.subr.bf16.mxu0 %v8636_v16  ;;  %v6442_v9 = vrot.slane %v6437_v7, %v9062_v3  ;;  %v6446_v16 = vrot.slane %v6437_v7, %v9065_v4 }
0x20c4   :  { %6655 = vmatpush1.bf16.msra.mxu0 %v8634_v46 }
0x20c5   :  { %6656 = vmatprep.subr.bf16.mxu0 %v8639_v13 }
0x20c8   :  { %6657 = vmatpush1.bf16.msra.mxu0 %v8637_v24 }
0x20c9   :  { %7520 = vmatprep.subr.bf16.mxu0 %v8640_v25 }
0x2124   :  { %v6340_v20 = vpop.xlane.xlu1 %6339 }
0x2125   :  { %v6344_v49 = vmul.f32 0.00390625, %v6340_v20 }
0x2126   :  { %v6343_v56 = vpop.xlane.xlu0 %6342 }
0x2127   :  { %v6346_v21 = vsub.f32 %v6330_v54, %v6344_v49  ;;  %v6347_v27 = vsub.f32 %v6331_v11, %v6344_v49  ;;  %v6345_v53 = vmul.f32 0.00390625, %v6343_v56  ;;  %v6335_v54 = vld [vmem:[#allocation11 + $0x42] ss:$8 sm:$0x3] }
0x2128   :  { %v6374_v45 = vrot.slane %v6335_v54, %v9062_v3  ;;  %v6378_v11 = vrot.slane %v6335_v54, %v9065_v4 }
0x2129   :  { %v9735_v29 = vsub.f32 %v6332_v39, %v6345_v53  ;;  %v9737_v30 = vsub.f32 %v6333_v26, %v6345_v53  ;;  %v6350_v57 = vmul.f32 %v6346_v21, %v6346_v21  ;;  %v6351_v58 = vmul.f32 %v6347_v27, %v6347_v27 }
0x212b   :  { %v6354_v31 = vadd.f32 %v6351_v58, %v6350_v57  ;;  %v6352_v32 = vmul.f32 %v9735_v29, %v9735_v29  ;;  %v6353_v34 = vmul.f32 %v9737_v30, %v9737_v30  ;;  %v8641_v58 = vld [vmem:[#allocation8 + $0x68] ss:$108 sps:$4 sm:$0xff]  }
0x212d   :  { %6355 = vadd.xlane.f32.xlu1 %v6354_v31  ;;  %v6357_v35 = vadd.f32 %v6353_v34, %v6352_v32  ;;  %v8642_v31 = vld [vmem:[#allocation8 + $0x800] ss:$108 sps:$4 sm:$0xff]   ;;  %v8644_v34 = vld [vmem:[#allocation8 + $0x8d8] ss:$108 sps:$4 sm:$0xff]  }
0x212e   :  { %v8643_v32 = vld [vmem:[#allocation8 + $0x140] ss:$108 sps:$4 sm:$0xff]  }
0x212f   :  { %6358 = vadd.xlane.f32.xlu0 %v6357_v35  ;;  %v8645_v35 = vld [vmem:[#allocation8 + $0x218] ss:$108 sps:$4 sm:$0xff]  }
0x21ba   :  { %v6356_v47 = vpop.xlane.xlu1 %6355 }
0x21bb   :  { %v6360_v19 = vmul.f32 0.00390625, %v6356_v47 }
0x21bc   :  { %v6359_v8 = vpop.xlane.xlu0 %6358 }
0x21bd   :  { %v6362_v6 = vadd.f32 1e-05, %v6360_v19  ;;  %v6361_v18 = vmul.f32 0.00390625, %v6359_v8 }
0x21bf   :  { %8732 = vrsqrt.f32 %v6362_v6  ;;  %v6363_v42 = vadd.f32 1e-05, %v6361_v18 }
0x21c1   :  { %8734 = vrsqrt.f32 %v6363_v42 }
0x21c9   :  { %v8733_v12 = vpop.eup %8732 }
0x21ca   :  { %v6366_v39 = vmul.f32 %v8733_v12, %v6346_v21  ;;  %v6367_v26 = vmul.f32 %v8733_v12, %v6347_v27 }
0x21cb   :  { %v8735_v2 = vpop.eup %8734 }
0x21cc   :  { %v6381_v41 = vmul.f32 %v6374_v45, %v6366_v39  ;;  %v6368_v10 = vmul.f32 %v8735_v2, %v9735_v29  ;;  %v6369_v43 = vmul.f32 %v8735_v2, %v9737_v30  ;;  %v6382_v62 = vmul.f32 %v6378_v11, %v6367_v26 }
0x21ce   :  { %v6383_v17 = vmul.f32 %v6374_v45, %v6368_v10  ;;  %v6384_v14 = vmul.f32 %v6378_v11, %v6369_v43  ;;  %v6397_v38 = vadd.f32 %v6393_v23, %v6382_v62  ;;  %v6396_v61 = vadd.f32 %v6389_v63, %v6381_v41 }
0x21d0   :  { %v6399_v33 = vadd.f32 %v6393_v23, %v6384_v14  ;;  %v6398_v5 = vadd.f32 %v6389_v63, %v6383_v17  ;;  %v6401_v15 = vpack.c.bf16 %v6397_v38, %v6397_v38  ;;  %v6400_v55 = vpack.c.bf16 %v6396_v61, %v6396_v61 }
0x21d2   :  { %v6403_v51 = vpack.c.bf16 %v6399_v33, %v6399_v33  ;;  %v6402_v22 = vpack.c.bf16 %v6398_v5, %v6398_v5  ;;  %v6454_v49 = vunpack.c.l.b16 %v6401_v15  ;;  %v6453_v21 = vunpack.c.l.b16 %v6400_v55 }
0x21d4   :  { %v6456_v0 = vunpack.c.l.b16 %v6403_v51  ;;  %v6455_v20 = vunpack.c.l.b16 %v6402_v22 }
0x21d6   :  { %v6460_v56 = vrot.slane %v6456_v0, 7  ;;  %v6457_v27 = vrot.slane %v6455_v20, 7 }
0x21d8   :  { %v6461_v53 = vsel %vm6458_vm8, %v6460_v56, %v6454_v49  ;;  %v6459_v29 = vsel %vm6458_vm8, %v6457_v27, %v6453_v21 }
0x21d9   :  { %v6463_v30 = vpack.c.b16 %v6461_v53, %v6461_v53  ;;  %v6462_v57 = vpack.c.b16 %v6459_v29, %v6459_v29 }
0x21db   :  { %6658 = vmatprep.mubr.bf16.mxu0 %v6463_v30 }
0x21dc   :  { %6659 = vmatmul.mubr.bf16.vlgmr.msra.gmra.mrb[96].mxu0 %v6462_v57 }
0x21dd   :  { %7521 = vmatpush3.bf16.msra.mxu0 %v8641_v58 }
0x21de   :  { %7522 = vmatprep.subr.bf16.mxu0 %v8642_v31 }
0x21e1   :  { %7523 = vmatpush3.bf16.msra.mxu0 %v8643_v32 }
0x21e2   :  { %7524 = vmatprep.subr.bf16.mxu0 %v8644_v34 }
0x21e5   :  { %7525 = vmatpush3.bf16.msra.mxu0 %v8645_v35 }
0x21e6   :  { %7526 = vmatprep.subr.bf16.mxu0 %v8646_v36 }
0x21e9   :  { %7527 = vmatpush3.bf16.msra.mxu0 %v8647_v28 }
0x21ea   :  { %7528 = vmatprep.subr.bf16.mxu0 %v8648_v37 }
0x21ed   :  { %7529 = vmatpush3.bf16.msra.mxu0 %v8649_v1 }
0x21ee   :  { %7530 = vmatprep.subr.bf16.mxu0 %v8650_v40 }
0x21f1   :  { %7531 = vmatpush3.bf16.msra.mxu0 %v8651_v48 }
0x21f2   :  { %7532 = vmatprep.subr.bf16.mxu0 %v8652_v50 }
0x21f5   :  { %7533 = vmatpush3.bf16.msra.mxu0 %v8653_v52 }
0x21f6   :  { %7534 = vmatprep.subr.bf16.mxu0 %v8654_v59 }
0x21f9   :  { %7535 = vmatpush3.bf16.msra.mxu0 %v8655_v60 }
0x22af   :  { %v6660_v46 = vpop.f32.mrb[96].mxu0 }
0x22b0   :  { %v6661_v13 = vadd.f32 %v6660_v46, %v6442_v9  ;;  %v6662_v24 = vpop.f32.mrb[97].mxu0 }
0x22b1   :  { %v6663_v25 = vadd.f32 %v6662_v24, %v6446_v16  ;;  %v6664_v47 = vpop.f32.mrb[98].mxu0 }
0x22b2   :  { %8736 = vtanh.f32 %v6661_v13  ;;  %v6665_v19 = vpop.f32.mrb[99].mxu0 }
0x22b3   :  { %8738 = vtanh.f32 %v6663_v25 }
0x22bc   :  { %v8737_v8 = vpop.eup %8736 }
0x22bd   :  { %v8739_v6 = vpop.eup %8738  ;;  %v6669_v42 = vpack.c.bf16 %v8737_v8, %v8737_v8 }
0x22be   :  { %v6670_v18 = vpack.c.bf16 %v8739_v6, %v8739_v6 }
0x22c0   :  { %6832 = vmatprep.mubr.bf16.mxu0 %v6670_v18 }
0x22c1   :  { %6833 = vmatmul.mubr.bf16.vlgmr.msra.gmra.mrb[100].mxu0 %v6669_v42 }
0x2394   :  { %v7536_v54 = vpop.f32.mrb[100].mxu0 }
0x2395   :  { %v7537_v45 = vpop.f32.mrb[101].mxu0 }
0x2396   :  { %v7538_v3 = vadd.f32 %v7537_v45, %v7536_v54  ;;  %v7539_v4 = vpop.f32.mrb[102].mxu0 }
0x2397   :  { %v7540_v11 = vpop.f32.mrb[103].mxu0 }
0x2398   :  { %v6835_v12 = vadd.f32 %v7538_v3, %v6703_v44 }
0x239a   :  { %6840 = vst [vmem:[#allocation13] sm:$0x3] %v6835_v12 }
0x239b   :  { %8883 = shalt.err (!%p8880_p10)
}
0x239c   :  { %s8884_s9 = scalar_lea.hbm %s9770_s7, 32 }
0x239d   :  { %p8885_p11 = scmp.ne.s32.totalorder %s9770_s7, %s8884_s9  ;;  %p8888_p12 = scmp.lt.u32.totalorder %s8884_s9, %s9770_s7 }
0x239f   :  { %p8890_p13 = pnand %p8888_p12, %p8885_p11 }
0x23a1   :  { %8893 = shalt.err (!%p8890_p13)
}
0x23a2   :  { %6850 = dma.vmem_to_hbm [thread:$0]  %s6848_s26, 32, %s9770_s7, [#allocation4]  }
0x23a3   :  { %8902 = dma.done.wait [#allocation4], 32  }
0x23a4   :  { %8903 = vsyncadd [#allocation4], 4294967264 }
0x23a5   :  { %6854 = vsyncpa [#allocation3], 1 }
0x23a6   :  { %6855 = vsyncpa [#allocation6], 1 }
0x23a7   :  { %6856 = vsyncpa [#allocation9], 1 }
0x23a8   :  { %6857 = vsyncpa [#allocation12], 1 }
0x23a9   :  { %6858 = vsyncpa [#allocation4], 1 }

</bundles_post_ra>
